<compile_context>
chip_gen: v6e
topology: v6e:2x2x1
jax: 0.10.0
libtpu: 0.0.40
codegen_flags: <defaults>
</compile_context>

<pallas_src>
import functools

import jax
import jax.numpy as jnp
from jax import lax
from jax.experimental import pallas as pl
from jax.experimental.pallas import tpu as pltpu


def _round_up(x, m):
    return (x + m - 1) // m * m


# ----------------------------------------------------------------------------
# Kernel A: conv_1 (4x4, stride 2, pad 1) + ReLU as 4 shifted GEMMs.
# ----------------------------------------------------------------------------
def _conv1_kernel(x_ref, w_ref, b_ref, o_ref, *, tap_offsets, rows):
    # x_ref : (1, R1, 4*Cin) bf16   space-to-depth flattened padded input
    # w_ref : (4, 4*Cin, HP) bf16   one weight matrix per 2x2 tap
    # b_ref : (1, HP)        f32
    # o_ref : (1, rows, HP)  bf16   dense rows (stride wi); cols sliced in JAX
    acc = None
    for t, off in enumerate(tap_offsets):
        part = jnp.dot(x_ref[0, off:off + rows, :], w_ref[t],
                       preferred_element_type=jnp.float32)
        acc = part if acc is None else acc + part
    acc = jnp.maximum(acc + b_ref[...], 0.0)
    o_ref[0, :, :] = acc.astype(o_ref.dtype)


def _conv1_call(flat, w_taps, bias, *, wi, oh):
    n, r_in, k1 = flat.shape
    t, _, hp = w_taps.shape
    rows = oh * wi
    kern = functools.partial(_conv1_kernel, tap_offsets=(0, 1, wi, wi + 1),
                             rows=rows)
    flops = 2 * n * rows * k1 * hp * t
    bytes_accessed = (flat.size + w_taps.size + n * rows * hp) * 2 + bias.size * 4
    return pl.pallas_call(
        kern,
        out_shape=jax.ShapeDtypeStruct((n, rows, hp), jnp.bfloat16),
        grid_spec=pltpu.PrefetchScalarGridSpec(
            num_scalar_prefetch=0,
            grid=(n,),
            in_specs=[
                pl.BlockSpec((1, r_in, k1), lambda i: (i, 0, 0)),
                pl.BlockSpec((t, k1, hp), lambda i: (0, 0, 0)),
                pl.BlockSpec((1, hp), lambda i: (0, 0)),
            ],
            out_specs=pl.BlockSpec((1, rows, hp), lambda i: (i, 0, 0)),
        ),
        compiler_params=pltpu.CompilerParams(dimension_semantics=("parallel",)),
        cost_estimate=pl.CostEstimate(flops=flops, transcendentals=0,
                                      bytes_accessed=bytes_accessed),
    )(flat, w_taps, bias)


# ----------------------------------------------------------------------------
# Kernel B: conv_2 + conv_3 + residual stack, fused, frame resident in VMEM.
# ----------------------------------------------------------------------------
def _fused_kernel(x2_ref, w2_ref, b2_ref, w3_ref, b3_ref, wa_ref, wb_ref,
                  mask_ref, o_ref, hx_ref, *, fw, rows3, num_layers):
    # x2_ref : (1, R2, 4*HP)   bf16  frame-stride s2d layout of conv_1 output
    # w2_ref : (4, 4*HP, C)    bf16  conv_2 tap weights
    # b2_ref : (1, C)          f32
    # w3_ref : (9, C, C)       bf16  conv_3 tap weights
    # b3_ref : (1, C)          f32
    # wa_ref : (L*9, C, RH)    bf16  3x3 resblock weights (no bias)
    # wb_ref : (L, RH, C)      bf16  1x1 resblock weights (no bias)
    # mask_ref: (rows3, 1)     f32   0/1 column-pad mask
    # o_ref  : (1, rows3, C)   f32   final activations (interior frame rows)
    # hx_ref : (R_f, C)        bf16  scratch: zero-padded activation frame
    taps2 = (0, 1, fw, fw + 1)
    taps3 = tuple(di * fw + dj for di in range(3) for dj in range(3))
    lo = fw + 1                  # first interior frame row
    hi = lo + rows3              # one past last interior frame row
    r_f, c = hx_ref.shape
    mask = mask_ref[...]

    # Zero only the border rows of the padded frame once; every layer's single
    # contiguous column-masked store rewrites the full interior.
    hx_ref[0:lo, :] = jnp.zeros((lo, c), hx_ref.dtype)
    hx_ref[hi:r_f, :] = jnp.zeros((r_f - hi, c), hx_ref.dtype)

    def conv_taps(load, offsets, get_w):
        acc = None
        for t, off in enumerate(offsets):
            part = jnp.dot(load(off), get_w(t),
                           preferred_element_type=jnp.float32)
            acc = part if acc is None else acc + part
        return acc

    # ---- conv_2: 4x4/s2/p1 rewritten as 4-tap 2x2 conv on s2d input, + ReLU.
    acc2 = conv_taps(lambda off: x2_ref[0, off:off + rows3, :], taps2,
                     lambda t: w2_ref[t])
    v2 = jnp.maximum(acc2 + b2_ref[...], 0.0) * mask
    hx_ref[lo:hi, :] = v2.astype(hx_ref.dtype)        # frame for conv_3 taps

    # ---- conv_3: 3x3/s1/p1 (+ bias, no activation).  f32 residual carry.
    acc3 = conv_taps(lambda off: hx_ref[off:off + rows3, :], taps3,
                     lambda t: w3_ref[t])
    cur = (acc3 + b3_ref[...]) * mask

    # ---- residual stack (ReLU hoisted out of the tap loop; skip path in f32).
    for l in range(num_layers):
        hx_ref[lo:hi, :] = jnp.maximum(cur, 0.0).astype(hx_ref.dtype)
        ha = conv_taps(lambda off: hx_ref[off:off + rows3, :], taps3,
                       lambda t, _l=l: wa_ref[_l * 9 + t])
        hmid = jnp.maximum(ha, 0.0).astype(jnp.bfloat16)
        y = jnp.dot(hmid, wb_ref[l], preferred_element_type=jnp.float32)
        cur = y * mask + cur

    o_ref[0, :, :] = jnp.maximum(cur, 0.0)             # stack's final ReLU


def _fused_call(flat2, w2, b2, w3, b3, wa_all, wb_all, mask, *, p, q):
    fw = q + 2
    rows3 = p * fw
    r_f = _round_up((p + 2) * fw + 2, 8)
    n, r2, k2 = flat2.shape
    c = w2.shape[-1]
    rh = wa_all.shape[-1]
    num_layers = wb_all.shape[0]
    assert mask.shape == (rows3, 1)

    kern = functools.partial(_fused_kernel, fw=fw, rows3=rows3,
                             num_layers=num_layers)
    flops = 2 * n * p * q * (4 * k2 * c + 9 * c * c
                             + num_layers * (9 * c * rh + rh * c))
    bytes_accessed = ((flat2.size + w2.size + w3.size + wa_all.size
                       + wb_all.size) * 2
                      + (b2.size + b3.size + mask.size) * 4
                      + n * rows3 * c * 4)

    return pl.pallas_call(
        kern,
        out_shape=jax.ShapeDtypeStruct((n, rows3, c), jnp.float32),
        grid_spec=pltpu.PrefetchScalarGridSpec(
            num_scalar_prefetch=0,
            grid=(n,),
            in_specs=[
                pl.BlockSpec((1, r2, k2), lambda i: (i, 0, 0)),
                pl.BlockSpec((4, k2, c), lambda i: (0, 0, 0)),
                pl.BlockSpec((1, c), lambda i: (0, 0)),
                pl.BlockSpec((9, c, c), lambda i: (0, 0, 0)),
                pl.BlockSpec((1, c), lambda i: (0, 0)),
                pl.BlockSpec((num_layers * 9, c, rh), lambda i: (0, 0, 0)),
                pl.BlockSpec((num_layers, rh, c), lambda i: (0, 0, 0)),
                pl.BlockSpec((rows3, 1), lambda i: (0, 0)),
            ],
            out_specs=pl.BlockSpec((1, rows3, c), lambda i: (i, 0, 0)),
            scratch_shapes=[pltpu.VMEM((r_f, c), jnp.bfloat16)],
        ),
        compiler_params=pltpu.CompilerParams(dimension_semantics=("parallel",)),
        cost_estimate=pl.CostEstimate(flops=flops, transcendentals=0,
                                      bytes_accessed=bytes_accessed),
    )(flat2, w2, b2, w3, b3, wa_all, wb_all, mask)


# ----------------------------------------------------------------------------
# JAX glue: layout-only data movement (pad / space-to-depth / flatten).
# ----------------------------------------------------------------------------
# TODO(synk): the NCHW<->NHWC transpose and space-to-depth reshuffles are pure
# layout glue left to XLA (actual-size copies, no compute, no patch dup).
def _s2d_flat_input(x_nhwc):
    """pad 1, 2x2 space-to-depth, flatten rows (rounded up to 8 with >=1
    trailing zero row).  Turns a 4x4 / s2 / pad-1 conv into a 2x2 valid conv."""
    n, h, w, c = x_nhwc.shape
    assert h % 2 == 0 and w % 2 == 0, "spatial dims must be even"
    xp = jnp.pad(x_nhwc, ((0, 0), (1, 1), (1, 1), (0, 0)))
    hi, wi = (h + 2) // 2, (w + 2) // 2
    xs = xp.reshape(n, hi, 2, wi, 2, c).transpose(0, 1, 3, 2, 4, 5)
    flat = xs.reshape(n, hi * wi, 4 * c)
    r = _round_up(hi * wi + 1, 8)
    flat = jnp.pad(flat, ((0, 0), (0, r - hi * wi), (0, 0)))
    return flat, hi, wi


def _s2_weight(w, cin_pad, cout_pad):
    """(4,4,I,O) conv weight -> (4, 4*cin_pad, cout_pad) s2d tap weights
    (zero-padded input/output channels)."""
    _, _, ci, co = w.shape
    w2 = w.reshape(2, 2, 2, 2, ci, co).transpose(0, 2, 1, 3, 4, 5)
    w2 = jnp.pad(w2, ((0, 0), (0, 0), (0, 0), (0, 0),
                      (0, cin_pad - ci), (0, cout_pad - co)))
    return w2.reshape(4, 4 * cin_pad, cout_pad).astype(jnp.bfloat16)


# ----------------------------------------------------------------------------
# Parameter construction (deterministic, shapes from Encoder.__init__).
# ----------------------------------------------------------------------------
def init_params(key, in_channels, num_hiddens, num_residual_layers,
                num_residual_hiddens):
    keys = jax.random.split(key, 8 + 2 * num_residual_layers)
    half = num_hiddens // 2

    def w(k, kh, kw, ic, oc):
        scale = 1.0 / jnp.sqrt(kh * kw * ic)
        return scale * jax.random.normal(k, (kh, kw, ic, oc), jnp.float32)

    params = {
        "conv1_w": w(keys[0], 4, 4, in_channels, half),
        "conv1_b": 0.1 * jax.random.normal(keys[1], (half,), jnp.float32),
        "conv2_w": w(keys[2], 4, 4, half, num_hiddens),
        "conv2_b": 0.1 * jax.random.normal(keys[3], (num_hiddens,), jnp.float32),
        "conv3_w": w(keys[4], 3, 3, num_hiddens, num_hiddens),
        "conv3_b": 0.1 * jax.random.normal(keys[5], (num_hiddens,), jnp.float32),
        "res": [],
    }
    for l in range(num_residual_layers):
        wa = w(keys[6 + 2 * l], 3, 3, num_hiddens, num_residual_hiddens)
        wb = w(keys[7 + 2 * l], 1, 1, num_residual_hiddens, num_hiddens)
        params["res"].append((wa, wb))
    return params


# ----------------------------------------------------------------------------
# Encoder forward (Pallas path).
# ----------------------------------------------------------------------------
def encoder_forward(x_nchw, params):
    num_hiddens = params["conv3_w"].shape[-1]
    in_channels = params["conv1_w"].shape[2]
    half = params["conv1_w"].shape[-1]
    num_layers = len(params["res"])
    assert num_layers >= 1, "fused kernel expects >=1 residual layer"
    rh_real = params["res"][0][0].shape[-1]

    hp = _round_up(half, 128)          # conv_1 out channels, 128-lane padded
    c = _round_up(num_hiddens, 128)    # frame channels, 128-lane padded
    rh = _round_up(rh_real, 128)       # residual hidden, 128-lane padded

    n, _, h, w = x_nchw.shape
    assert h % 4 == 0 and w % 4 == 0, "spatial dims must be divisible by 4"

    x = jnp.transpose(x_nchw, (0, 2, 3, 1)).astype(jnp.bfloat16)   # NHWC bf16

    # ---- conv_1: 4x4 s2 p1 + ReLU -------------------------------------------
    flat1, hi1, wi1 = _s2d_flat_input(x)
    oh, ow = hi1 - 1, wi1 - 1
    w1 = _s2_weight(params["conv1_w"], in_channels, hp)
    b1 = jnp.pad(params["conv1_b"], (0, hp - half)).reshape(1, hp)
    b1 = b1.astype(jnp.float32)
    y1 = _conv1_call(flat1, w1, b1, wi=wi1, oh=oh)        # (n, oh*wi1, hp)
    y1 = y1.reshape(n, oh, wi1, hp)[:, :, :ow, :]         # (n, oh, ow, hp)

    # ---- frame-stride space-to-depth layout for conv_2 ----------------------
    yp = jnp.pad(y1, ((0, 0), (1, 1), (1, 1), (0, 0)))
    hi2, wi2 = (oh + 2) // 2, (ow + 2) // 2
    ys = yp.reshape(n, hi2, 2, wi2, 2, hp).transpose(0, 1, 3, 2, 4, 5)
    ys = ys.reshape(n, hi2, wi2, 4 * hp)
    p, q = hi2 - 1, wi2 - 1            # conv_2 output grid == latent grid
    fw = q + 2                         # padded frame width for 3x3 stages
    ys = jnp.pad(ys, ((0, 0), (0, 0), (0, fw - wi2), (0, 0)))
    flat2 = ys.reshape(n, hi2 * fw, 4 * hp)
    r2 = _round_up(hi2 * fw + 1, 8)
    flat2 = jnp.pad(flat2, ((0, 0), (1, r2 - hi2 * fw - 1), (0, 0)))

    # ---- weights for the fused conv_2 + conv_3 + residual-stack kernel ------
    w2 = _s2_weight(params["conv2_w"], hp, c)
    b2 = jnp.pad(params["conv2_b"], (0, c - num_hiddens)).reshape(1, c)
    b2 = b2.astype(jnp.float32)
    w3 = params["conv3_w"].reshape(9, num_hiddens, num_hiddens)
    w3 = jnp.pad(w3, ((0, 0), (0, c - num_hiddens),
                      (0, c - num_hiddens))).astype(jnp.bfloat16)
    b3 = jnp.pad(params["conv3_b"], (0, c - num_hiddens)).reshape(1, c)
    b3 = b3.astype(jnp.float32)
    wa_all = jnp.concatenate([
        jnp.pad(wa.reshape(9, num_hiddens, rh_real),
                ((0, 0), (0, c - num_hiddens), (0, rh - rh_real)))
        for wa, _ in params["res"]], axis=0).astype(jnp.bfloat16)   # (L*9,c,rh)
    wb_all = jnp.stack([
        jnp.pad(wb.reshape(rh_real, num_hiddens),
                ((0, rh - rh_real), (0, c - num_hiddens)))
        for _, wb in params["res"]]).astype(jnp.bfloat16)           # (L,rh,c)

    rows3 = p * fw
    col = jnp.arange(rows3, dtype=jnp.int32) % fw
    mask = ((col >= 1) & (col <= q)).astype(jnp.float32).reshape(rows3, 1)

    out = _fused_call(flat2, w2, b2, w3, b3, wa_all, wb_all, mask, p=p, q=q)
    out = out.reshape(n, p, fw, c)[:, :, 1:1 + q, :num_hiddens]     # (n,p,q,nh)
    return jnp.transpose(out, (0, 3, 1, 2)).astype(jnp.float32)


# ----------------------------------------------------------------------------
# Pure-JAX f32 reference (mirrors the PyTorch module exactly) for validation.
# ----------------------------------------------------------------------------
def _conv_ref(x_nchw, w_khwio, b, stride, pad):
    out = lax.conv_general_dilated(
        x_nchw, jnp.transpose(w_khwio, (3, 2, 0, 1)),
        window_strides=(stride, stride), padding=[(pad, pad), (pad, pad)],
        dimension_numbers=("NCHW", "OIHW", "NCHW"))
    if b is not None:
        out = out + b[None, :, None, None]
    return out


def encoder_ref(x, params):
    x = jax.nn.relu(_conv_ref(x, params["conv1_w"], params["conv1_b"], 2, 1))
    x = jax.nn.relu(_conv_ref(x, params["conv2_w"], params["conv2_b"], 2, 1))
    x = _conv_ref(x, params["conv3_w"], params["conv3_b"], 1, 1)
    for wa, wb in params["res"]:
        h = _conv_ref(jax.nn.relu(x), wa, None, 1, 1)
        h = _conv_ref(jax.nn.relu(h), wb, None, 1, 0)
        x = x + h
    return jax.nn.relu(x)


if __name__ == "__main__":
    batch, in_channels, hw = 2, 4, 16
    num_hiddens, num_residual_layers, num_residual_hiddens = 32, 2, 8

    key = jax.random.PRNGKey(0)
    kx, kp = jax.random.split(key)
    x = jax.random.normal(kx, (batch, in_channels, hw, hw), jnp.float32)
    params = init_params(kp, in_channels, num_hiddens, num_residual_layers,
                         num_residual_hiddens)

    fwd = jax.jit(encoder_forward)
    out = jax.block_until_ready(fwd(x, params))
    ref = jax.block_until_ready(encoder_ref(x, params))

    assert out.shape == (batch, num_hiddens, hw // 4, hw // 4), out.shape
    max_err = float(jnp.max(jnp.abs(out - ref)))
    # bf16 activations / weights on the MXU path, f32 accumulation + f32
    # residual carry inside the fused kernel -> comfortable tolerance.
    assert jnp.allclose(out, ref, atol=5e-2, rtol=5e-2), max_err

    print("KERNEL_OK")
</pallas_src>

<mosaic_0001>
module attributes {stable_mosaic.version = 11 : i64} {
  func.func @_conv1_kernel(%arg0: i32, %arg1: memref<1x88x16xbf16, #tpu.memory_space<vmem>>, %arg2: memref<4x16x128xbf16, #tpu.memory_space<vmem>>, %arg3: memref<1x128xf32, #tpu.memory_space<vmem>>, %arg4: memref<1x72x128xbf16, #tpu.memory_space<vmem>>) attributes {dimension_semantics = [#tpu.dimension_semantics<parallel>], iteration_bounds = array<i64: 2>, scalar_prefetch = 0 : i64, scratch_operands = 0 : i64, tpu.core_type = #tpu.core_type<tc>, window_params = [{transform_indices = @transform_0, window_bounds = array<i64: 1, 88, 16>}, {pipeline_mode = #tpu.pipeline_mode<synchronous>, transform_indices = @transform_1, window_bounds = array<i64: 4, 16, 128>}, {pipeline_mode = #tpu.pipeline_mode<synchronous>, transform_indices = @transform_2, window_bounds = array<i64: 1, 128>}, {transform_indices = @transform_3, window_bounds = array<i64: 1, 72, 128>}]} {
    %c0 = arith.constant 0 : index
    %c0_0 = arith.constant 0 : index
    %c0_1 = arith.constant 0 : index
    %0 = vector.load %arg1[%c0, %c0_0, %c0_1] : memref<1x88x16xbf16, #tpu.memory_space<vmem>>, vector<1x72x16xbf16>
    %1 = vector.shape_cast %0 : vector<1x72x16xbf16> to vector<72x16xbf16>
    %c0_2 = arith.constant 0 : index
    %c0_3 = arith.constant 0 : index
    %c0_4 = arith.constant 0 : index
    %2 = vector.load %arg2[%c0_2, %c0_3, %c0_4] : memref<4x16x128xbf16, #tpu.memory_space<vmem>>, vector<1x16x128xbf16>
    %3 = vector.shape_cast %2 : vector<1x16x128xbf16> to vector<16x128xbf16>
    %cst = arith.constant dense<0.000000e+00> : vector<72x128xf32>
    %4 = tpu.matmul %1, %3, %cst {dimension_numbers = #tpu.dot_dimension_numbers<[1], [0], [0], [1], [0, 0, 1, 1], [], []>} : vector<72x16xbf16>, vector<16x128xbf16>, vector<72x128xf32> -> vector<72x128xf32>
    %c0_5 = arith.constant 0 : index
    %c1 = arith.constant 1 : index
    %c0_6 = arith.constant 0 : index
    %5 = vector.load %arg1[%c0_5, %c1, %c0_6] : memref<1x88x16xbf16, #tpu.memory_space<vmem>>, vector<1x72x16xbf16>
    %6 = vector.shape_cast %5 : vector<1x72x16xbf16> to vector<72x16xbf16>
    %c1_7 = arith.constant 1 : index
    %c0_8 = arith.constant 0 : index
    %c0_9 = arith.constant 0 : index
    %7 = vector.load %arg2[%c1_7, %c0_8, %c0_9] : memref<4x16x128xbf16, #tpu.memory_space<vmem>>, vector<1x16x128xbf16>
    %8 = vector.shape_cast %7 : vector<1x16x128xbf16> to vector<16x128xbf16>
    %cst_10 = arith.constant dense<0.000000e+00> : vector<72x128xf32>
    %9 = tpu.matmul %6, %8, %cst_10 {dimension_numbers = #tpu.dot_dimension_numbers<[1], [0], [0], [1], [0, 0, 1, 1], [], []>} : vector<72x16xbf16>, vector<16x128xbf16>, vector<72x128xf32> -> vector<72x128xf32>
    %10 = arith.addf %4, %9 : vector<72x128xf32>
    %c0_11 = arith.constant 0 : index
    %c9 = arith.constant 9 : index
    %c0_12 = arith.constant 0 : index
    %11 = vector.load %arg1[%c0_11, %c9, %c0_12] : memref<1x88x16xbf16, #tpu.memory_space<vmem>>, vector<1x72x16xbf16>
    %12 = vector.shape_cast %11 : vector<1x72x16xbf16> to vector<72x16xbf16>
    %c2 = arith.constant 2 : index
    %c0_13 = arith.constant 0 : index
    %c0_14 = arith.constant 0 : index
    %13 = vector.load %arg2[%c2, %c0_13, %c0_14] : memref<4x16x128xbf16, #tpu.memory_space<vmem>>, vector<1x16x128xbf16>
    %14 = vector.shape_cast %13 : vector<1x16x128xbf16> to vector<16x128xbf16>
    %cst_15 = arith.constant dense<0.000000e+00> : vector<72x128xf32>
    %15 = tpu.matmul %12, %14, %cst_15 {dimension_numbers = #tpu.dot_dimension_numbers<[1], [0], [0], [1], [0, 0, 1, 1], [], []>} : vector<72x16xbf16>, vector<16x128xbf16>, vector<72x128xf32> -> vector<72x128xf32>
    %16 = arith.addf %10, %15 : vector<72x128xf32>
    %c0_16 = arith.constant 0 : index
    %c10 = arith.constant 10 : index
    %c0_17 = arith.constant 0 : index
    %17 = vector.load %arg1[%c0_16, %c10, %c0_17] : memref<1x88x16xbf16, #tpu.memory_space<vmem>>, vector<1x72x16xbf16>
    %18 = vector.shape_cast %17 : vector<1x72x16xbf16> to vector<72x16xbf16>
    %c3 = arith.constant 3 : index
    %c0_18 = arith.constant 0 : index
    %c0_19 = arith.constant 0 : index
    %19 = vector.load %arg2[%c3, %c0_18, %c0_19] : memref<4x16x128xbf16, #tpu.memory_space<vmem>>, vector<1x16x128xbf16>
    %20 = vector.shape_cast %19 : vector<1x16x128xbf16> to vector<16x128xbf16>
    %cst_20 = arith.constant dense<0.000000e+00> : vector<72x128xf32>
    %21 = tpu.matmul %18, %20, %cst_20 {dimension_numbers = #tpu.dot_dimension_numbers<[1], [0], [0], [1], [0, 0, 1, 1], [], []>} : vector<72x16xbf16>, vector<16x128xbf16>, vector<72x128xf32> -> vector<72x128xf32>
    %22 = arith.addf %16, %21 : vector<72x128xf32>
    %c0_21 = arith.constant 0 : index
    %c0_22 = arith.constant 0 : index
    %23 = vector.load %arg3[%c0_21, %c0_22] : memref<1x128xf32, #tpu.memory_space<vmem>>, vector<1x128xf32>
    %24 = vector.broadcast %23 : vector<1x128xf32> to vector<72x128xf32>
    %25 = arith.addf %22, %24 : vector<72x128xf32>
    %cst_23 = arith.constant 0.000000e+00 : f32
    %26 = vector.broadcast %cst_23 : f32 to vector<72x128xf32>
    %27 = arith.maximumf %25, %26 : vector<72x128xf32>
    %28 = arith.truncf %27 : vector<72x128xf32> to vector<72x128xbf16>
    %c0_24 = arith.constant 0 : index
    %c0_25 = arith.constant 0 : index
    %c0_26 = arith.constant 0 : index
    %29 = vector.load %arg4[%c0_24, %c0_25, %c0_26] : memref<1x72x128xbf16, #tpu.memory_space<vmem>>, vector<1x72x128xbf16>
    %30 = vector.shape_cast %29 : vector<1x72x128xbf16> to vector<72x128xbf16>
    %31 = vector.shape_cast %28 : vector<72x128xbf16> to vector<1x72x128xbf16>
    tpu.vector_store %arg4[%c0_24, %c0_25, %c0_26], %31 {strides = array<i32>} : memref<1x72x128xbf16, #tpu.memory_space<vmem>>, vector<1x72x128xbf16>,
    return
  }
  func.func @transform_0(%arg0: i32) -> (i32, i32, i32) {
    %c0_i32 = arith.constant 0 : i32
    %c0_i32_0 = arith.constant 0 : i32
    %c0_i32_1 = arith.constant 0 : i32
    return %arg0, %c0_i32, %c0_i32_0 : i32, i32, i32
  }
  func.func @transform_1(%arg0: i32) -> (i32, i32, i32) {
    %c0_i32 = arith.constant 0 : i32
    %c0_i32_0 = arith.constant 0 : i32
    %c0_i32_1 = arith.constant 0 : i32
    %c0_i32_2 = arith.constant 0 : i32
    return %c0_i32, %c0_i32_0, %c0_i32_1 : i32, i32, i32
  }
  func.func @transform_2(%arg0: i32) -> (i32, i32) {
    %c0_i32 = arith.constant 0 : i32
    %c0_i32_0 = arith.constant 0 : i32
    %c0_i32_1 = arith.constant 0 : i32
    return %c0_i32, %c0_i32_0 : i32, i32
  }
  func.func @transform_3(%arg0: i32) -> (i32, i32, i32) {
    %c0_i32 = arith.constant 0 : i32
    %c0_i32_0 = arith.constant 0 : i32
    %c0_i32_1 = arith.constant 0 : i32
    return %arg0, %c0_i32, %c0_i32_0 : i32, i32, i32
  }
}

module attributes {stable_mosaic.version = 11 : i64} {
  func.func @_fused_kernel(%arg0: i32, %arg1: memref<1x32x512xbf16, #tpu.memory_space<vmem>>, %arg2: memref<4x512x128xbf16, #tpu.memory_space<vmem>>, %arg3: memref<1x128xf32, #tpu.memory_space<vmem>>, %arg4: memref<9x128x128xbf16, #tpu.memory_space<vmem>>, %arg5: memref<1x128xf32, #tpu.memory_space<vmem>>, %arg6: memref<18x128x128xbf16, #tpu.memory_space<vmem>>, %arg7: memref<2x128x128xbf16, #tpu.memory_space<vmem>>, %arg8: memref<24x1xf32, #tpu.memory_space<vmem>>, %arg9: memref<1x24x128xf32, #tpu.memory_space<vmem>>, %arg10: memref<40x128xbf16, #tpu.memory_space<vmem>>) attributes {dimension_semantics = [#tpu.dimension_semantics<parallel>], iteration_bounds = array<i64: 2>, scalar_prefetch = 0 : i64, scratch_operands = 1 : i64, tpu.core_type = #tpu.core_type<tc>, window_params = [{transform_indices = @transform_0, window_bounds = array<i64: 1, 32, 512>}, {pipeline_mode = #tpu.pipeline_mode<synchronous>, transform_indices = @transform_1, window_bounds = array<i64: 4, 512, 128>}, {pipeline_mode = #tpu.pipeline_mode<synchronous>, transform_indices = @transform_2, window_bounds = array<i64: 1, 128>}, {pipeline_mode = #tpu.pipeline_mode<synchronous>, transform_indices = @transform_3, window_bounds = array<i64: 9, 128, 128>}, {pipeline_mode = #tpu.pipeline_mode<synchronous>, transform_indices = @transform_4, window_bounds = array<i64: 1, 128>}, {pipeline_mode = #tpu.pipeline_mode<synchronous>, transform_indices = @transform_5, window_bounds = array<i64: 18, 128, 128>}, {pipeline_mode = #tpu.pipeline_mode<synchronous>, transform_indices = @transform_6, window_bounds = array<i64: 2, 128, 128>}, {pipeline_mode = #tpu.pipeline_mode<synchronous>, transform_indices = @transform_7, window_bounds = array<i64: 24, 1>}, {transform_indices = @transform_8, window_bounds = array<i64: 1, 24, 128>}]} {
    %c0 = arith.constant 0 : index
    %c0_0 = arith.constant 0 : index
    %0 = vector.load %arg8[%c0, %c0_0] : memref<24x1xf32, #tpu.memory_space<vmem>>, vector<24x1xf32>
    %cst = arith.constant 0.000000e+00 : bf16
    %1 = vector.broadcast %cst : bf16 to vector<7x128xbf16>
    %c0_1 = arith.constant 0 : index
    %c0_2 = arith.constant 0 : index
    %2 = vector.load %arg10[%c0_1, %c0_2] : memref<40x128xbf16, #tpu.memory_space<vmem>>, vector<7x128xbf16>
    tpu.vector_store %arg10[%c0_1, %c0_2], %1 {strides = array<i32>} : memref<40x128xbf16, #tpu.memory_space<vmem>>, vector<7x128xbf16>,
    %cst_3 = arith.constant 0.000000e+00 : bf16
    %3 = vector.broadcast %cst_3 : bf16 to vector<9x128xbf16>
    %c31 = arith.constant 31 : index
    %c0_4 = arith.constant 0 : index
    %4 = vector.load %arg10[%c31, %c0_4] : memref<40x128xbf16, #tpu.memory_space<vmem>>, vector<9x128xbf16>
    tpu.vector_store %arg10[%c31, %c0_4], %3 {strides = array<i32>} : memref<40x128xbf16, #tpu.memory_space<vmem>>, vector<9x128xbf16>,
    %c0_5 = arith.constant 0 : index
    %c0_6 = arith.constant 0 : index
    %c0_7 = arith.constant 0 : index
    %5 = vector.load %arg1[%c0_5, %c0_6, %c0_7] : memref<1x32x512xbf16, #tpu.memory_space<vmem>>, vector<1x24x512xbf16>
    %6 = vector.shape_cast %5 : vector<1x24x512xbf16> to vector<24x512xbf16>
    %c0_8 = arith.constant 0 : index
    %c0_9 = arith.constant 0 : index
    %c0_10 = arith.constant 0 : index
    %7 = vector.load %arg2[%c0_8, %c0_9, %c0_10] : memref<4x512x128xbf16, #tpu.memory_space<vmem>>, vector<1x512x128xbf16>
    %8 = vector.shape_cast %7 : vector<1x512x128xbf16> to vector<512x128xbf16>
    %cst_11 = arith.constant dense<0.000000e+00> : vector<24x128xf32>
    %9 = tpu.matmul %6, %8, %cst_11 {dimension_numbers = #tpu.dot_dimension_numbers<[1], [0], [0], [1], [0, 0, 1, 1], [], []>} : vector<24x512xbf16>, vector<512x128xbf16>, vector<24x128xf32> -> vector<24x128xf32>
    %c0_12 = arith.constant 0 : index
    %c1 = arith.constant 1 : index
    %c0_13 = arith.constant 0 : index
    %10 = vector.load %arg1[%c0_12, %c1, %c0_13] : memref<1x32x512xbf16, #tpu.memory_space<vmem>>, vector<1x24x512xbf16>
    %11 = vector.shape_cast %10 : vector<1x24x512xbf16> to vector<24x512xbf16>
    %c1_14 = arith.constant 1 : index
    %c0_15 = arith.constant 0 : index
    %c0_16 = arith.constant 0 : index
    %12 = vector.load %arg2[%c1_14, %c0_15, %c0_16] : memref<4x512x128xbf16, #tpu.memory_space<vmem>>, vector<1x512x128xbf16>
    %13 = vector.shape_cast %12 : vector<1x512x128xbf16> to vector<512x128xbf16>
    %cst_17 = arith.constant dense<0.000000e+00> : vector<24x128xf32>
    %14 = tpu.matmul %11, %13, %cst_17 {dimension_numbers = #tpu.dot_dimension_numbers<[1], [0], [0], [1], [0, 0, 1, 1], [], []>} : vector<24x512xbf16>, vector<512x128xbf16>, vector<24x128xf32> -> vector<24x128xf32>
    %15 = arith.addf %9, %14 : vector<24x128xf32>
    %c0_18 = arith.constant 0 : index
    %c6 = arith.constant 6 : index
    %c0_19 = arith.constant 0 : index
    %16 = vector.load %arg1[%c0_18, %c6, %c0_19] : memref<1x32x512xbf16, #tpu.memory_space<vmem>>, vector<1x24x512xbf16>
    %17 = vector.shape_cast %16 : vector<1x24x512xbf16> to vector<24x512xbf16>
    %c2 = arith.constant 2 : index
    %c0_20 = arith.constant 0 : index
    %c0_21 = arith.constant 0 : index
    %18 = vector.load %arg2[%c2, %c0_20, %c0_21] : memref<4x512x128xbf16, #tpu.memory_space<vmem>>, vector<1x512x128xbf16>
    %19 = vector.shape_cast %18 : vector<1x512x128xbf16> to vector<512x128xbf16>
    %cst_22 = arith.constant dense<0.000000e+00> : vector<24x128xf32>
    %20 = tpu.matmul %17, %19, %cst_22 {dimension_numbers = #tpu.dot_dimension_numbers<[1], [0], [0], [1], [0, 0, 1, 1], [], []>} : vector<24x512xbf16>, vector<512x128xbf16>, vector<24x128xf32> -> vector<24x128xf32>
    %21 = arith.addf %15, %20 : vector<24x128xf32>
    %c0_23 = arith.constant 0 : index
    %c7 = arith.constant 7 : index
    %c0_24 = arith.constant 0 : index
    %22 = vector.load %arg1[%c0_23, %c7, %c0_24] : memref<1x32x512xbf16, #tpu.memory_space<vmem>>, vector<1x24x512xbf16>
    %23 = vector.shape_cast %22 : vector<1x24x512xbf16> to vector<24x512xbf16>
    %c3 = arith.constant 3 : index
    %c0_25 = arith.constant 0 : index
    %c0_26 = arith.constant 0 : index
    %24 = vector.load %arg2[%c3, %c0_25, %c0_26] : memref<4x512x128xbf16, #tpu.memory_space<vmem>>, vector<1x512x128xbf16>
    %25 = vector.shape_cast %24 : vector<1x512x128xbf16> to vector<512x128xbf16>
    %cst_27 = arith.constant dense<0.000000e+00> : vector<24x128xf32>
    %26 = tpu.matmul %23, %25, %cst_27 {dimension_numbers = #tpu.dot_dimension_numbers<[1], [0], [0], [1], [0, 0, 1, 1], [], []>} : vector<24x512xbf16>, vector<512x128xbf16>, vector<24x128xf32> -> vector<24x128xf32>
    %27 = arith.addf %21, %26 : vector<24x128xf32>
    %c0_28 = arith.constant 0 : index
    %c0_29 = arith.constant 0 : index
    %28 = vector.load %arg3[%c0_28, %c0_29] : memref<1x128xf32, #tpu.memory_space<vmem>>, vector<1x128xf32>
    %29 = vector.broadcast %28 : vector<1x128xf32> to vector<24x128xf32>
    %30 = arith.addf %27, %29 : vector<24x128xf32>
    %cst_30 = arith.constant 0.000000e+00 : f32
    %31 = vector.broadcast %cst_30 : f32 to vector<24x128xf32>
    %32 = arith.maximumf %30, %31 : vector<24x128xf32>
    %33 = vector.broadcast %0 : vector<24x1xf32> to vector<24x128xf32>
    %34 = arith.mulf %32, %33 : vector<24x128xf32>
    %35 = arith.truncf %34 : vector<24x128xf32> to vector<24x128xbf16>
    %c7_31 = arith.constant 7 : index
    %c0_32 = arith.constant 0 : index
    %36 = vector.load %arg10[%c7_31, %c0_32] : memref<40x128xbf16, #tpu.memory_space<vmem>>, vector<24x128xbf16>
    tpu.vector_store %arg10[%c7_31, %c0_32], %35 {strides = array<i32>} : memref<40x128xbf16, #tpu.memory_space<vmem>>, vector<24x128xbf16>,
    %c0_33 = arith.constant 0 : index
    %c0_34 = arith.constant 0 : index
    %37 = vector.load %arg10[%c0_33, %c0_34] : memref<40x128xbf16, #tpu.memory_space<vmem>>, vector<24x128xbf16>
    %c0_35 = arith.constant 0 : index
    %c0_36 = arith.constant 0 : index
    %c0_37 = arith.constant 0 : index
    %38 = vector.load %arg4[%c0_35, %c0_36, %c0_37] : memref<9x128x128xbf16, #tpu.memory_space<vmem>>, vector<1x128x128xbf16>
    %39 = vector.shape_cast %38 : vector<1x128x128xbf16> to vector<128x128xbf16>
    %cst_38 = arith.constant dense<0.000000e+00> : vector<24x128xf32>
    %40 = tpu.matmul %37, %39, %cst_38 {dimension_numbers = #tpu.dot_dimension_numbers<[1], [0], [0], [1], [0, 0, 1, 1], [], []>} : vector<24x128xbf16>, vector<128x128xbf16>, vector<24x128xf32> -> vector<24x128xf32>
    %c1_39 = arith.constant 1 : index
    %c0_40 = arith.constant 0 : index
    %41 = vector.load %arg10[%c1_39, %c0_40] : memref<40x128xbf16, #tpu.memory_space<vmem>>, vector<24x128xbf16>
    %c1_41 = arith.constant 1 : index
    %c0_42 = arith.constant 0 : index
    %c0_43 = arith.constant 0 : index
    %42 = vector.load %arg4[%c1_41, %c0_42, %c0_43] : memref<9x128x128xbf16, #tpu.memory_space<vmem>>, vector<1x128x128xbf16>
    %43 = vector.shape_cast %42 : vector<1x128x128xbf16> to vector<128x128xbf16>
    %cst_44 = arith.constant dense<0.000000e+00> : vector<24x128xf32>
    %44 = tpu.matmul %41, %43, %cst_44 {dimension_numbers = #tpu.dot_dimension_numbers<[1], [0], [0], [1], [0, 0, 1, 1], [], []>} : vector<24x128xbf16>, vector<128x128xbf16>, vector<24x128xf32> -> vector<24x128xf32>
    %45 = arith.addf %40, %44 : vector<24x128xf32>
    %c2_45 = arith.constant 2 : index
    %c0_46 = arith.constant 0 : index
    %46 = vector.load %arg10[%c2_45, %c0_46] : memref<40x128xbf16, #tpu.memory_space<vmem>>, vector<24x128xbf16>
    %c2_47 = arith.constant 2 : index
    %c0_48 = arith.constant 0 : index
    %c0_49 = arith.constant 0 : index
    %47 = vector.load %arg4[%c2_47, %c0_48, %c0_49] : memref<9x128x128xbf16, #tpu.memory_space<vmem>>, vector<1x128x128xbf16>
    %48 = vector.shape_cast %47 : vector<1x128x128xbf16> to vector<128x128xbf16>
    %cst_50 = arith.constant dense<0.000000e+00> : vector<24x128xf32>
    %49 = tpu.matmul %46, %48, %cst_50 {dimension_numbers = #tpu.dot_dimension_numbers<[1], [0], [0], [1], [0, 0, 1, 1], [], []>} : vector<24x128xbf16>, vector<128x128xbf16>, vector<24x128xf32> -> vector<24x128xf32>
    %50 = arith.addf %45, %49 : vector<24x128xf32>
    %c6_51 = arith.constant 6 : index
    %c0_52 = arith.constant 0 : index
    %51 = vector.load %arg10[%c6_51, %c0_52] : memref<40x128xbf16, #tpu.memory_space<vmem>>, vector<24x128xbf16>
    %c3_53 = arith.constant 3 : index
    %c0_54 = arith.constant 0 : index
    %c0_55 = arith.constant 0 : index
    %52 = vector.load %arg4[%c3_53, %c0_54, %c0_55] : memref<9x128x128xbf16, #tpu.memory_space<vmem>>, vector<1x128x128xbf16>
    %53 = vector.shape_cast %52 : vector<1x128x128xbf16> to vector<128x128xbf16>
    %cst_56 = arith.constant dense<0.000000e+00> : vector<24x128xf32>
    %54 = tpu.matmul %51, %53, %cst_56 {dimension_numbers = #tpu.dot_dimension_numbers<[1], [0], [0], [1], [0, 0, 1, 1], [], []>} : vector<24x128xbf16>, vector<128x128xbf16>, vector<24x128xf32> -> vector<24x128xf32>
    %55 = arith.addf %50, %54 : vector<24x128xf32>
    %c7_57 = arith.constant 7 : index
    %c0_58 = arith.constant 0 : index
    %56 = vector.load %arg10[%c7_57, %c0_58] : memref<40x128xbf16, #tpu.memory_space<vmem>>, vector<24x128xbf16>
    %c4 = arith.constant 4 : index
    %c0_59 = arith.constant 0 : index
    %c0_60 = arith.constant 0 : index
    %57 = vector.load %arg4[%c4, %c0_59, %c0_60] : memref<9x128x128xbf16, #tpu.memory_space<vmem>>, vector<1x128x128xbf16>
    %58 = vector.shape_cast %57 : vector<1x128x128xbf16> to vector<128x128xbf16>
    %cst_61 = arith.constant dense<0.000000e+00> : vector<24x128xf32>
    %59 = tpu.matmul %56, %58, %cst_61 {dimension_numbers = #tpu.dot_dimension_numbers<[1], [0], [0], [1], [0, 0, 1, 1], [], []>} : vector<24x128xbf16>, vector<128x128xbf16>, vector<24x128xf32> -> vector<24x128xf32>
    %60 = arith.addf %55, %59 : vector<24x128xf32>
    %c8 = arith.constant 8 : index
    %c0_62 = arith.constant 0 : index
    %61 = vector.load %arg10[%c8, %c0_62] : memref<40x128xbf16, #tpu.memory_space<vmem>>, vector<24x128xbf16>
    %c5 = arith.constant 5 : index
    %c0_63 = arith.constant 0 : index
    %c0_64 = arith.constant 0 : index
    %62 = vector.load %arg4[%c5, %c0_63, %c0_64] : memref<9x128x128xbf16, #tpu.memory_space<vmem>>, vector<1x128x128xbf16>
    %63 = vector.shape_cast %62 : vector<1x128x128xbf16> to vector<128x128xbf16>
    %cst_65 = arith.constant dense<0.000000e+00> : vector<24x128xf32>
    %64 = tpu.matmul %61, %63, %cst_65 {dimension_numbers = #tpu.dot_dimension_numbers<[1], [0], [0], [1], [0, 0, 1, 1], [], []>} : vector<24x128xbf16>, vector<128x128xbf16>, vector<24x128xf32> -> vector<24x128xf32>
    %65 = arith.addf %60, %64 : vector<24x128xf32>
    %c12 = arith.constant 12 : index
    %c0_66 = arith.constant 0 : index
    %66 = vector.load %arg10[%c12, %c0_66] : memref<40x128xbf16, #tpu.memory_space<vmem>>, vector<24x128xbf16>
    %c6_67 = arith.constant 6 : index
    %c0_68 = arith.constant 0 : index
    %c0_69 = arith.constant 0 : index
    %67 = vector.load %arg4[%c6_67, %c0_68, %c0_69] : memref<9x128x128xbf16, #tpu.memory_space<vmem>>, vector<1x128x128xbf16>
    %68 = vector.shape_cast %67 : vector<1x128x128xbf16> to vector<128x128xbf16>
    %cst_70 = arith.constant dense<0.000000e+00> : vector<24x128xf32>
    %69 = tpu.matmul %66, %68, %cst_70 {dimension_numbers = #tpu.dot_dimension_numbers<[1], [0], [0], [1], [0, 0, 1, 1], [], []>} : vector<24x128xbf16>, vector<128x128xbf16>, vector<24x128xf32> -> vector<24x128xf32>
    %70 = arith.addf %65, %69 : vector<24x128xf32>
    %c13 = arith.constant 13 : index
    %c0_71 = arith.constant 0 : index
    %71 = vector.load %arg10[%c13, %c0_71] : memref<40x128xbf16, #tpu.memory_space<vmem>>, vector<24x128xbf16>
    %c7_72 = arith.constant 7 : index
    %c0_73 = arith.constant 0 : index
    %c0_74 = arith.constant 0 : index
    %72 = vector.load %arg4[%c7_72, %c0_73, %c0_74] : memref<9x128x128xbf16, #tpu.memory_space<vmem>>, vector<1x128x128xbf16>
    %73 = vector.shape_cast %72 : vector<1x128x128xbf16> to vector<128x128xbf16>
    %cst_75 = arith.constant dense<0.000000e+00> : vector<24x128xf32>
    %74 = tpu.matmul %71, %73, %cst_75 {dimension_numbers = #tpu.dot_dimension_numbers<[1], [0], [0], [1], [0, 0, 1, 1], [], []>} : vector<24x128xbf16>, vector<128x128xbf16>, vector<24x128xf32> -> vector<24x128xf32>
    %75 = arith.addf %70, %74 : vector<24x128xf32>
    %c14 = arith.constant 14 : index
    %c0_76 = arith.constant 0 : index
    %76 = vector.load %arg10[%c14, %c0_76] : memref<40x128xbf16, #tpu.memory_space<vmem>>, vector<24x128xbf16>
    %c8_77 = arith.constant 8 : index
    %c0_78 = arith.constant 0 : index
    %c0_79 = arith.constant 0 : index
    %77 = vector.load %arg4[%c8_77, %c0_78, %c0_79] : memref<9x128x128xbf16, #tpu.memory_space<vmem>>, vector<1x128x128xbf16>
    %78 = vector.shape_cast %77 : vector<1x128x128xbf16> to vector<128x128xbf16>
    %cst_80 = arith.constant dense<0.000000e+00> : vector<24x128xf32>
    %79 = tpu.matmul %76, %78, %cst_80 {dimension_numbers = #tpu.dot_dimension_numbers<[1], [0], [0], [1], [0, 0, 1, 1], [], []>} : vector<24x128xbf16>, vector<128x128xbf16>, vector<24x128xf32> -> vector<24x128xf32>
    %80 = arith.addf %75, %79 : vector<24x128xf32>
    %c0_81 = arith.constant 0 : index
    %c0_82 = arith.constant 0 : index
    %81 = vector.load %arg5[%c0_81, %c0_82] : memref<1x128xf32, #tpu.memory_space<vmem>>, vector<1x128xf32>
    %82 = vector.broadcast %81 : vector<1x128xf32> to vector<24x128xf32>
    %83 = arith.addf %80, %82 : vector<24x128xf32>
    %84 = vector.broadcast %0 : vector<24x1xf32> to vector<24x128xf32>
    %85 = arith.mulf %83, %84 : vector<24x128xf32>
    %cst_83 = arith.constant 0.000000e+00 : f32
    %86 = vector.broadcast %cst_83 : f32 to vector<24x128xf32>
    %87 = arith.maximumf %85, %86 : vector<24x128xf32>
    %88 = arith.truncf %87 : vector<24x128xf32> to vector<24x128xbf16>
    %c7_84 = arith.constant 7 : index
    %c0_85 = arith.constant 0 : index
    %89 = vector.load %arg10[%c7_84, %c0_85] : memref<40x128xbf16, #tpu.memory_space<vmem>>, vector<24x128xbf16>
    tpu.vector_store %arg10[%c7_84, %c0_85], %88 {strides = array<i32>} : memref<40x128xbf16, #tpu.memory_space<vmem>>, vector<24x128xbf16>,
    %c0_86 = arith.constant 0 : index
    %c0_87 = arith.constant 0 : index
    %90 = vector.load %arg10[%c0_86, %c0_87] : memref<40x128xbf16, #tpu.memory_space<vmem>>, vector<24x128xbf16>
    %c0_88 = arith.constant 0 : index
    %c0_89 = arith.constant 0 : index
    %c0_90 = arith.constant 0 : index
    %91 = vector.load %arg6[%c0_88, %c0_89, %c0_90] : memref<18x128x128xbf16, #tpu.memory_space<vmem>>, vector<1x128x128xbf16>
    %92 = vector.shape_cast %91 : vector<1x128x128xbf16> to vector<128x128xbf16>
    %cst_91 = arith.constant dense<0.000000e+00> : vector<24x128xf32>
    %93 = tpu.matmul %90, %92, %cst_91 {dimension_numbers = #tpu.dot_dimension_numbers<[1], [0], [0], [1], [0, 0, 1, 1], [], []>} : vector<24x128xbf16>, vector<128x128xbf16>, vector<24x128xf32> -> vector<24x128xf32>
    %c1_92 = arith.constant 1 : index
    %c0_93 = arith.constant 0 : index
    %94 = vector.load %arg10[%c1_92, %c0_93] : memref<40x128xbf16, #tpu.memory_space<vmem>>, vector<24x128xbf16>
    %c1_94 = arith.constant 1 : index
    %c0_95 = arith.constant 0 : index
    %c0_96 = arith.constant 0 : index
    %95 = vector.load %arg6[%c1_94, %c0_95, %c0_96] : memref<18x128x128xbf16, #tpu.memory_space<vmem>>, vector<1x128x128xbf16>
    %96 = vector.shape_cast %95 : vector<1x128x128xbf16> to vector<128x128xbf16>
    %cst_97 = arith.constant dense<0.000000e+00> : vector<24x128xf32>
    %97 = tpu.matmul %94, %96, %cst_97 {dimension_numbers = #tpu.dot_dimension_numbers<[1], [0], [0], [1], [0, 0, 1, 1], [], []>} : vector<24x128xbf16>, vector<128x128xbf16>, vector<24x128xf32> -> vector<24x128xf32>
    %98 = arith.addf %93, %97 : vector<24x128xf32>
    %c2_98 = arith.constant 2 : index
    %c0_99 = arith.constant 0 : index
    %99 = vector.load %arg10[%c2_98, %c0_99] : memref<40x128xbf16, #tpu.memory_space<vmem>>, vector<24x128xbf16>
    %c2_100 = arith.constant 2 : index
    %c0_101 = arith.constant 0 : index
    %c0_102 = arith.constant 0 : index
    %100 = vector.load %arg6[%c2_100, %c0_101, %c0_102] : memref<18x128x128xbf16, #tpu.memory_space<vmem>>, vector<1x128x128xbf16>
    %101 = vector.shape_cast %100 : vector<1x128x128xbf16> to vector<128x128xbf16>
    %cst_103 = arith.constant dense<0.000000e+00> : vector<24x128xf32>
    %102 = tpu.matmul %99, %101, %cst_103 {dimension_numbers = #tpu.dot_dimension_numbers<[1], [0], [0], [1], [0, 0, 1, 1], [], []>} : vector<24x128xbf16>, vector<128x128xbf16>, vector<24x128xf32> -> vector<24x128xf32>
    %103 = arith.addf %98, %102 : vector<24x128xf32>
    %c6_104 = arith.constant 6 : index
    %c0_105 = arith.constant 0 : index
    %104 = vector.load %arg10[%c6_104, %c0_105] : memref<40x128xbf16, #tpu.memory_space<vmem>>, vector<24x128xbf16>
    %c3_106 = arith.constant 3 : index
    %c0_107 = arith.constant 0 : index
    %c0_108 = arith.constant 0 : index
    %105 = vector.load %arg6[%c3_106, %c0_107, %c0_108] : memref<18x128x128xbf16, #tpu.memory_space<vmem>>, vector<1x128x128xbf16>
    %106 = vector.shape_cast %105 : vector<1x128x128xbf16> to vector<128x128xbf16>
    %cst_109 = arith.constant dense<0.000000e+00> : vector<24x128xf32>
    %107 = tpu.matmul %104, %106, %cst_109 {dimension_numbers = #tpu.dot_dimension_numbers<[1], [0], [0], [1], [0, 0, 1, 1], [], []>} : vector<24x128xbf16>, vector<128x128xbf16>, vector<24x128xf32> -> vector<24x128xf32>
    %108 = arith.addf %103, %107 : vector<24x128xf32>
    %c7_110 = arith.constant 7 : index
    %c0_111 = arith.constant 0 : index
    %109 = vector.load %arg10[%c7_110, %c0_111] : memref<40x128xbf16, #tpu.memory_space<vmem>>, vector<24x128xbf16>
    %c4_112 = arith.constant 4 : index
    %c0_113 = arith.constant 0 : index
    %c0_114 = arith.constant 0 : index
    %110 = vector.load %arg6[%c4_112, %c0_113, %c0_114] : memref<18x128x128xbf16, #tpu.memory_space<vmem>>, vector<1x128x128xbf16>
    %111 = vector.shape_cast %110 : vector<1x128x128xbf16> to vector<128x128xbf16>
    %cst_115 = arith.constant dense<0.000000e+00> : vector<24x128xf32>
    %112 = tpu.matmul %109, %111, %cst_115 {dimension_numbers = #tpu.dot_dimension_numbers<[1], [0], [0], [1], [0, 0, 1, 1], [], []>} : vector<24x128xbf16>, vector<128x128xbf16>, vector<24x128xf32> -> vector<24x128xf32>
    %113 = arith.addf %108, %112 : vector<24x128xf32>
    %c8_116 = arith.constant 8 : index
    %c0_117 = arith.constant 0 : index
    %114 = vector.load %arg10[%c8_116, %c0_117] : memref<40x128xbf16, #tpu.memory_space<vmem>>, vector<24x128xbf16>
    %c5_118 = arith.constant 5 : index
    %c0_119 = arith.constant 0 : index
    %c0_120 = arith.constant 0 : index
    %115 = vector.load %arg6[%c5_118, %c0_119, %c0_120] : memref<18x128x128xbf16, #tpu.memory_space<vmem>>, vector<1x128x128xbf16>
    %116 = vector.shape_cast %115 : vector<1x128x128xbf16> to vector<128x128xbf16>
    %cst_121 = arith.constant dense<0.000000e+00> : vector<24x128xf32>
    %117 = tpu.matmul %114, %116, %cst_121 {dimension_numbers = #tpu.dot_dimension_numbers<[1], [0], [0], [1], [0, 0, 1, 1], [], []>} : vector<24x128xbf16>, vector<128x128xbf16>, vector<24x128xf32> -> vector<24x128xf32>
    %118 = arith.addf %113, %117 : vector<24x128xf32>
    %c12_122 = arith.constant 12 : index
    %c0_123 = arith.constant 0 : index
    %119 = vector.load %arg10[%c12_122, %c0_123] : memref<40x128xbf16, #tpu.memory_space<vmem>>, vector<24x128xbf16>
    %c6_124 = arith.constant 6 : index
    %c0_125 = arith.constant 0 : index
    %c0_126 = arith.constant 0 : index
    %120 = vector.load %arg6[%c6_124, %c0_125, %c0_126] : memref<18x128x128xbf16, #tpu.memory_space<vmem>>, vector<1x128x128xbf16>
    %121 = vector.shape_cast %120 : vector<1x128x128xbf16> to vector<128x128xbf16>
    %cst_127 = arith.constant dense<0.000000e+00> : vector<24x128xf32>
    %122 = tpu.matmul %119, %121, %cst_127 {dimension_numbers = #tpu.dot_dimension_numbers<[1], [0], [0], [1], [0, 0, 1, 1], [], []>} : vector<24x128xbf16>, vector<128x128xbf16>, vector<24x128xf32> -> vector<24x128xf32>
    %123 = arith.addf %118, %122 : vector<24x128xf32>
    %c13_128 = arith.constant 13 : index
    %c0_129 = arith.constant 0 : index
    %124 = vector.load %arg10[%c13_128, %c0_129] : memref<40x128xbf16, #tpu.memory_space<vmem>>, vector<24x128xbf16>
    %c7_130 = arith.constant 7 : index
    %c0_131 = arith.constant 0 : index
    %c0_132 = arith.constant 0 : index
    %125 = vector.load %arg6[%c7_130, %c0_131, %c0_132] : memref<18x128x128xbf16, #tpu.memory_space<vmem>>, vector<1x128x128xbf16>
    %126 = vector.shape_cast %125 : vector<1x128x128xbf16> to vector<128x128xbf16>
    %cst_133 = arith.constant dense<0.000000e+00> : vector<24x128xf32>
    %127 = tpu.matmul %124, %126, %cst_133 {dimension_numbers = #tpu.dot_dimension_numbers<[1], [0], [0], [1], [0, 0, 1, 1], [], []>} : vector<24x128xbf16>, vector<128x128xbf16>, vector<24x128xf32> -> vector<24x128xf32>
    %128 = arith.addf %123, %127 : vector<24x128xf32>
    %c14_134 = arith.constant 14 : index
    %c0_135 = arith.constant 0 : index
    %129 = vector.load %arg10[%c14_134, %c0_135] : memref<40x128xbf16, #tpu.memory_space<vmem>>, vector<24x128xbf16>
    %c8_136 = arith.constant 8 : index
    %c0_137 = arith.constant 0 : index
    %c0_138 = arith.constant 0 : index
    %130 = vector.load %arg6[%c8_136, %c0_137, %c0_138] : memref<18x128x128xbf16, #tpu.memory_space<vmem>>, vector<1x128x128xbf16>
    %131 = vector.shape_cast %130 : vector<1x128x128xbf16> to vector<128x128xbf16>
    %cst_139 = arith.constant dense<0.000000e+00> : vector<24x128xf32>
    %132 = tpu.matmul %129, %131, %cst_139 {dimension_numbers = #tpu.dot_dimension_numbers<[1], [0], [0], [1], [0, 0, 1, 1], [], []>} : vector<24x128xbf16>, vector<128x128xbf16>, vector<24x128xf32> -> vector<24x128xf32>
    %133 = arith.addf %128, %132 : vector<24x128xf32>
    %cst_140 = arith.constant 0.000000e+00 : f32
    %134 = vector.broadcast %cst_140 : f32 to vector<24x128xf32>
    %135 = arith.maximumf %133, %134 : vector<24x128xf32>
    %136 = arith.truncf %135 : vector<24x128xf32> to vector<24x128xbf16>
    %c0_141 = arith.constant 0 : index
    %c0_142 = arith.constant 0 : index
    %c0_143 = arith.constant 0 : index
    %137 = vector.load %arg7[%c0_141, %c0_142, %c0_143] : memref<2x128x128xbf16, #tpu.memory_space<vmem>>, vector<1x128x128xbf16>
    %138 = vector.shape_cast %137 : vector<1x128x128xbf16> to vector<128x128xbf16>
    %cst_144 = arith.constant dense<0.000000e+00> : vector<24x128xf32>
    %139 = tpu.matmul %136, %138, %cst_144 {dimension_numbers = #tpu.dot_dimension_numbers<[1], [0], [0], [1], [0, 0, 1, 1], [], []>} : vector<24x128xbf16>, vector<128x128xbf16>, vector<24x128xf32> -> vector<24x128xf32>
    %140 = vector.broadcast %0 : vector<24x1xf32> to vector<24x128xf32>
    %141 = arith.mulf %139, %140 : vector<24x128xf32>
    %142 = arith.addf %141, %85 : vector<24x128xf32>
    %cst_145 = arith.constant 0.000000e+00 : f32
    %143 = vector.broadcast %cst_145 : f32 to vector<24x128xf32>
    %144 = arith.maximumf %142, %143 : vector<24x128xf32>
    %145 = arith.truncf %144 : vector<24x128xf32> to vector<24x128xbf16>
    %c7_146 = arith.constant 7 : index
    %c0_147 = arith.constant 0 : index
    %146 = vector.load %arg10[%c7_146, %c0_147] : memref<40x128xbf16, #tpu.memory_space<vmem>>, vector<24x128xbf16>
    tpu.vector_store %arg10[%c7_146, %c0_147], %145 {strides = array<i32>} : memref<40x128xbf16, #tpu.memory_space<vmem>>, vector<24x128xbf16>,
    %c0_148 = arith.constant 0 : index
    %c0_149 = arith.constant 0 : index
    %147 = vector.load %arg10[%c0_148, %c0_149] : memref<40x128xbf16, #tpu.memory_space<vmem>>, vector<24x128xbf16>
    %c9 = arith.constant 9 : index
    %c0_150 = arith.constant 0 : index
    %c0_151 = arith.constant 0 : index
    %148 = vector.load %arg6[%c9, %c0_150, %c0_151] : memref<18x128x128xbf16, #tpu.memory_space<vmem>>, vector<1x128x128xbf16>
    %149 = vector.shape_cast %148 : vector<1x128x128xbf16> to vector<128x128xbf16>
    %cst_152 = arith.constant dense<0.000000e+00> : vector<24x128xf32>
    %150 = tpu.matmul %147, %149, %cst_152 {dimension_numbers = #tpu.dot_dimension_numbers<[1], [0], [0], [1], [0, 0, 1, 1], [], []>} : vector<24x128xbf16>, vector<128x128xbf16>, vector<24x128xf32> -> vector<24x128xf32>
    %c1_153 = arith.constant 1 : index
    %c0_154 = arith.constant 0 : index
    %151 = vector.load %arg10[%c1_153, %c0_154] : memref<40x128xbf16, #tpu.memory_space<vmem>>, vector<24x128xbf16>
    %c10 = arith.constant 10 : index
    %c0_155 = arith.constant 0 : index
    %c0_156 = arith.constant 0 : index
    %152 = vector.load %arg6[%c10, %c0_155, %c0_156] : memref<18x128x128xbf16, #tpu.memory_space<vmem>>, vector<1x128x128xbf16>
    %153 = vector.shape_cast %152 : vector<1x128x128xbf16> to vector<128x128xbf16>
    %cst_157 = arith.constant dense<0.000000e+00> : vector<24x128xf32>
    %154 = tpu.matmul %151, %153, %cst_157 {dimension_numbers = #tpu.dot_dimension_numbers<[1], [0], [0], [1], [0, 0, 1, 1], [], []>} : vector<24x128xbf16>, vector<128x128xbf16>, vector<24x128xf32> -> vector<24x128xf32>
    %155 = arith.addf %150, %154 : vector<24x128xf32>
    %c2_158 = arith.constant 2 : index
    %c0_159 = arith.constant 0 : index
    %156 = vector.load %arg10[%c2_158, %c0_159] : memref<40x128xbf16, #tpu.memory_space<vmem>>, vector<24x128xbf16>
    %c11 = arith.constant 11 : index
    %c0_160 = arith.constant 0 : index
    %c0_161 = arith.constant 0 : index
    %157 = vector.load %arg6[%c11, %c0_160, %c0_161] : memref<18x128x128xbf16, #tpu.memory_space<vmem>>, vector<1x128x128xbf16>
    %158 = vector.shape_cast %157 : vector<1x128x128xbf16> to vector<128x128xbf16>
    %cst_162 = arith.constant dense<0.000000e+00> : vector<24x128xf32>
    %159 = tpu.matmul %156, %158, %cst_162 {dimension_numbers = #tpu.dot_dimension_numbers<[1], [0], [0], [1], [0, 0, 1, 1], [], []>} : vector<24x128xbf16>, vector<128x128xbf16>, vector<24x128xf32> -> vector<24x128xf32>
    %160 = arith.addf %155, %159 : vector<24x128xf32>
    %c6_163 = arith.constant 6 : index
    %c0_164 = arith.constant 0 : index
    %161 = vector.load %arg10[%c6_163, %c0_164] : memref<40x128xbf16, #tpu.memory_space<vmem>>, vector<24x128xbf16>
    %c12_165 = arith.constant 12 : index
    %c0_166 = arith.constant 0 : index
    %c0_167 = arith.constant 0 : index
    %162 = vector.load %arg6[%c12_165, %c0_166, %c0_167] : memref<18x128x128xbf16, #tpu.memory_space<vmem>>, vector<1x128x128xbf16>
    %163 = vector.shape_cast %162 : vector<1x128x128xbf16> to vector<128x128xbf16>
    %cst_168 = arith.constant dense<0.000000e+00> : vector<24x128xf32>
    %164 = tpu.matmul %161, %163, %cst_168 {dimension_numbers = #tpu.dot_dimension_numbers<[1], [0], [0], [1], [0, 0, 1, 1], [], []>} : vector<24x128xbf16>, vector<128x128xbf16>, vector<24x128xf32> -> vector<24x128xf32>
    %165 = arith.addf %160, %164 : vector<24x128xf32>
    %c7_169 = arith.constant 7 : index
    %c0_170 = arith.constant 0 : index
    %166 = vector.load %arg10[%c7_169, %c0_170] : memref<40x128xbf16, #tpu.memory_space<vmem>>, vector<24x128xbf16>
    %c13_171 = arith.constant 13 : index
    %c0_172 = arith.constant 0 : index
    %c0_173 = arith.constant 0 : index
    %167 = vector.load %arg6[%c13_171, %c0_172, %c0_173] : memref<18x128x128xbf16, #tpu.memory_space<vmem>>, vector<1x128x128xbf16>
    %168 = vector.shape_cast %167 : vector<1x128x128xbf16> to vector<128x128xbf16>
    %cst_174 = arith.constant dense<0.000000e+00> : vector<24x128xf32>
    %169 = tpu.matmul %166, %168, %cst_174 {dimension_numbers = #tpu.dot_dimension_numbers<[1], [0], [0], [1], [0, 0, 1, 1], [], []>} : vector<24x128xbf16>, vector<128x128xbf16>, vector<24x128xf32> -> vector<24x128xf32>
    %170 = arith.addf %165, %169 : vector<24x128xf32>
    %c8_175 = arith.constant 8 : index
    %c0_176 = arith.constant 0 : index
    %171 = vector.load %arg10[%c8_175, %c0_176] : memref<40x128xbf16, #tpu.memory_space<vmem>>, vector<24x128xbf16>
    %c14_177 = arith.constant 14 : index
    %c0_178 = arith.constant 0 : index
    %c0_179 = arith.constant 0 : index
    %172 = vector.load %arg6[%c14_177, %c0_178, %c0_179] : memref<18x128x128xbf16, #tpu.memory_space<vmem>>, vector<1x128x128xbf16>
    %173 = vector.shape_cast %172 : vector<1x128x128xbf16> to vector<128x128xbf16>
    %cst_180 = arith.constant dense<0.000000e+00> : vector<24x128xf32>
    %174 = tpu.matmul %171, %173, %cst_180 {dimension_numbers = #tpu.dot_dimension_numbers<[1], [0], [0], [1], [0, 0, 1, 1], [], []>} : vector<24x128xbf16>, vector<128x128xbf16>, vector<24x128xf32> -> vector<24x128xf32>
    %175 = arith.addf %170, %174 : vector<24x128xf32>
    %c12_181 = arith.constant 12 : index
    %c0_182 = arith.constant 0 : index
    %176 = vector.load %arg10[%c12_181, %c0_182] : memref<40x128xbf16, #tpu.memory_space<vmem>>, vector<24x128xbf16>
    %c15 = arith.constant 15 : index
    %c0_183 = arith.constant 0 : index
    %c0_184 = arith.constant 0 : index
    %177 = vector.load %arg6[%c15, %c0_183, %c0_184] : memref<18x128x128xbf16, #tpu.memory_space<vmem>>, vector<1x128x128xbf16>
    %178 = vector.shape_cast %177 : vector<1x128x128xbf16> to vector<128x128xbf16>
    %cst_185 = arith.constant dense<0.000000e+00> : vector<24x128xf32>
    %179 = tpu.matmul %176, %178, %cst_185 {dimension_numbers = #tpu.dot_dimension_numbers<[1], [0], [0], [1], [0, 0, 1, 1], [], []>} : vector<24x128xbf16>, vector<128x128xbf16>, vector<24x128xf32> -> vector<24x128xf32>
    %180 = arith.addf %175, %179 : vector<24x128xf32>
    %c13_186 = arith.constant 13 : index
    %c0_187 = arith.constant 0 : index
    %181 = vector.load %arg10[%c13_186, %c0_187] : memref<40x128xbf16, #tpu.memory_space<vmem>>, vector<24x128xbf16>
    %c16 = arith.constant 16 : index
    %c0_188 = arith.constant 0 : index
    %c0_189 = arith.constant 0 : index
    %182 = vector.load %arg6[%c16, %c0_188, %c0_189] : memref<18x128x128xbf16, #tpu.memory_space<vmem>>, vector<1x128x128xbf16>
    %183 = vector.shape_cast %182 : vector<1x128x128xbf16> to vector<128x128xbf16>
    %cst_190 = arith.constant dense<0.000000e+00> : vector<24x128xf32>
    %184 = tpu.matmul %181, %183, %cst_190 {dimension_numbers = #tpu.dot_dimension_numbers<[1], [0], [0], [1], [0, 0, 1, 1], [], []>} : vector<24x128xbf16>, vector<128x128xbf16>, vector<24x128xf32> -> vector<24x128xf32>
    %185 = arith.addf %180, %184 : vector<24x128xf32>
    %c14_191 = arith.constant 14 : index
    %c0_192 = arith.constant 0 : index
    %186 = vector.load %arg10[%c14_191, %c0_192] : memref<40x128xbf16, #tpu.memory_space<vmem>>, vector<24x128xbf16>
    %c17 = arith.constant 17 : index
    %c0_193 = arith.constant 0 : index
    %c0_194 = arith.constant 0 : index
    %187 = vector.load %arg6[%c17, %c0_193, %c0_194] : memref<18x128x128xbf16, #tpu.memory_space<vmem>>, vector<1x128x128xbf16>
    %188 = vector.shape_cast %187 : vector<1x128x128xbf16> to vector<128x128xbf16>
    %cst_195 = arith.constant dense<0.000000e+00> : vector<24x128xf32>
    %189 = tpu.matmul %186, %188, %cst_195 {dimension_numbers = #tpu.dot_dimension_numbers<[1], [0], [0], [1], [0, 0, 1, 1], [], []>} : vector<24x128xbf16>, vector<128x128xbf16>, vector<24x128xf32> -> vector<24x128xf32>
    %190 = arith.addf %185, %189 : vector<24x128xf32>
    %cst_196 = arith.constant 0.000000e+00 : f32
    %191 = vector.broadcast %cst_196 : f32 to vector<24x128xf32>
    %192 = arith.maximumf %190, %191 : vector<24x128xf32>
    %193 = arith.truncf %192 : vector<24x128xf32> to vector<24x128xbf16>
    %c1_197 = arith.constant 1 : index
    %c0_198 = arith.constant 0 : index
    %c0_199 = arith.constant 0 : index
    %194 = vector.load %arg7[%c1_197, %c0_198, %c0_199] : memref<2x128x128xbf16, #tpu.memory_space<vmem>>, vector<1x128x128xbf16>
    %195 = vector.shape_cast %194 : vector<1x128x128xbf16> to vector<128x128xbf16>
    %cst_200 = arith.constant dense<0.000000e+00> : vector<24x128xf32>
    %196 = tpu.matmul %193, %195, %cst_200 {dimension_numbers = #tpu.dot_dimension_numbers<[1], [0], [0], [1], [0, 0, 1, 1], [], []>} : vector<24x128xbf16>, vector<128x128xbf16>, vector<24x128xf32> -> vector<24x128xf32>
    %197 = vector.broadcast %0 : vector<24x1xf32> to vector<24x128xf32>
    %198 = arith.mulf %196, %197 : vector<24x128xf32>
    %199 = arith.addf %198, %142 : vector<24x128xf32>
    %cst_201 = arith.constant 0.000000e+00 : f32
    %200 = vector.broadcast %cst_201 : f32 to vector<24x128xf32>
    %201 = arith.maximumf %199, %200 : vector<24x128xf32>
    %c0_202 = arith.constant 0 : index
    %c0_203 = arith.constant 0 : index
    %c0_204 = arith.constant 0 : index
    %202 = vector.load %arg9[%c0_202, %c0_203, %c0_204] : memref<1x24x128xf32, #tpu.memory_space<vmem>>, vector<1x24x128xf32>
    %203 = vector.shape_cast %202 : vector<1x24x128xf32> to vector<24x128xf32>
    %204 = vector.shape_cast %201 : vector<24x128xf32> to vector<1x24x128xf32>
    tpu.vector_store %arg9[%c0_202, %c0_203, %c0_204], %204 {strides = array<i32>} : memref<1x24x128xf32, #tpu.memory_space<vmem>>, vector<1x24x128xf32>,
    return
  }
  func.func @transform_0(%arg0: i32) -> (i32, i32, i32) {
    %c0_i32 = arith.constant 0 : i32
    %c0_i32_0 = arith.constant 0 : i32
    %c0_i32_1 = arith.constant 0 : i32
    return %arg0, %c0_i32, %c0_i32_0 : i32, i32, i32
  }
  func.func @transform_1(%arg0: i32) -> (i32, i32, i32) {
    %c0_i32 = arith.constant 0 : i32
    %c0_i32_0 = arith.constant 0 : i32
    %c0_i32_1 = arith.constant 0 : i32
    %c0_i32_2 = arith.constant 0 : i32
    return %c0_i32, %c0_i32_0, %c0_i32_1 : i32, i32, i32
  }
  func.func @transform_2(%arg0: i32) -> (i32, i32) {
    %c0_i32 = arith.constant 0 : i32
    %c0_i32_0 = arith.constant 0 : i32
    %c0_i32_1 = arith.constant 0 : i32
    return %c0_i32, %c0_i32_0 : i32, i32
  }
  func.func @transform_3(%arg0: i32) -> (i32, i32, i32) {
    %c0_i32 = arith.constant 0 : i32
    %c0_i32_0 = arith.constant 0 : i32
    %c0_i32_1 = arith.constant 0 : i32
    %c0_i32_2 = arith.constant 0 : i32
    return %c0_i32, %c0_i32_0, %c0_i32_1 : i32, i32, i32
  }
  func.func @transform_4(%arg0: i32) -> (i32, i32) {
    %c0_i32 = arith.constant 0 : i32
    %c0_i32_0 = arith.constant 0 : i32
    %c0_i32_1 = arith.constant 0 : i32
    return %c0_i32, %c0_i32_0 : i32, i32
  }
  func.func @transform_5(%arg0: i32) -> (i32, i32, i32) {
    %c0_i32 = arith.constant 0 : i32
    %c0_i32_0 = arith.constant 0 : i32
    %c0_i32_1 = arith.constant 0 : i32
    %c0_i32_2 = arith.constant 0 : i32
    return %c0_i32, %c0_i32_0, %c0_i32_1 : i32, i32, i32
  }
  func.func @transform_6(%arg0: i32) -> (i32, i32, i32) {
    %c0_i32 = arith.constant 0 : i32
    %c0_i32_0 = arith.constant 0 : i32
    %c0_i32_1 = arith.constant 0 : i32
    %c0_i32_2 = arith.constant 0 : i32
    return %c0_i32, %c0_i32_0, %c0_i32_1 : i32, i32, i32
  }
  func.func @transform_7(%arg0: i32) -> (i32, i32) {
    %c0_i32 = arith.constant 0 : i32
    %c0_i32_0 = arith.constant 0 : i32
    %c0_i32_1 = arith.constant 0 : i32
    return %c0_i32, %c0_i32_0 : i32, i32
  }
  func.func @transform_8(%arg0: i32) -> (i32, i32, i32) {
    %c0_i32 = arith.constant 0 : i32
    %c0_i32_0 = arith.constant 0 : i32
    %c0_i32_1 = arith.constant 0 : i32
    return %arg0, %c0_i32, %c0_i32_0 : i32, i32, i32
  }
}

</mosaic_0001>

<bundles_post_ra>
// kernel: encoder_forward.2
= control target key start
LH: loop header
LB: loop body
LE: loop exit
PB: predicated region body
PF: predicated region fallthrough
CT: control target
= control target key end

     0   :  { %s1123_s12 = smov 0   ;;  %s1295_s0 = inlined_call_operand.vmem [shape: bf16[2,88,16], index: 0, kind: input, shape index: {}]   ;;  %s1296_s1 = inlined_call_operand.vmem [shape: bf16[4,16,128], index: 1, kind: input, shape index: {}]   ;;  %s1297_s2 = inlined_call_operand.vmem [shape: f32[1,128], index: 2, kind: input, shape index: {}]   ;;  %s1298_s3 = inlined_call_operand.vmem [shape: bf16[2,72,128], index: 3, kind: output, shape index: {}]  }
   0x1 LB: > { %s860_s13 = sadd.s32 4294967295, %s1099_s12   ;;  %p864_p0 = scmp.ge.s32.totalorder %s1099_s12, 1  ;;  %s1099_s12 = sphi %s1123_s12, %s13_s12  }
   0x2   : > { %p137_p1 = scmp.lt.s32.totalorder %s1099_s12, 3 }
   0x4   : > { %p138_p2 = pnand %p864_p0, %p137_p1 }
   0x5   : > { %p161_p3 = scmp.lt.s32.totalorder (!%p138_p2), %s860_s13, 1 }
   0x6   : > { %141 = sbr.rel (%p138_p2) target bundleno = 299 (0x12b), region = 32 }
   0xb   : > { %v1077_v0 = vld [vmem:[%s1296_s1] sm:$0xff]   ;;  %v1101_v1 = vmov 0.0   ;;  %v1078_v2 = vld [vmem:[%s1296_s1 + $0x8] sm:$0xff]   ;;  %vm1102_vm0 = vmmov 0   ;;  %s1300_s13 = smov (!%p161_p3, %s860_s13), 1  ;;  %vm258_vm1 = vcmask 130048  }
   0xc   : > { %999 = vmatprep.subr.bf16.mxu1 %v1101_v1  ;;  %977 = vmatprep.subr.bf16.mxu0 %v1101_v1  ;;  %s1065_s18 = smul.u32 44, %s1300_s13  ;;  %v1082_v3 = vld [vmem:[%s1296_s1 + $0x18] sm:$0xff]   ;;  %vm212_vm2 = vsmask.f32 7424  ;;  %v1081_v13 = vld [vmem:[%s1296_s1 + $0x10] sm:$0xff]   ;;  %vm622_vm3 = vcmask 1046528  }
   0xd   : > { %1000 = vmatpush3.bf16.msra.mxu1 %v1077_v0  ;;  %1001 = vmatprep.mubr.msk.bf16.mxu1 %vm1102_vm0, %v1101_v1  ;;  %s1066_s28 = smul.u32 36, %s1300_s13 }
   0xe   : > { %978 = vmatpush3.bf16.msra.mxu0 %v1078_v2  ;;  %979 = vmatprep.mubr.msk.bf16.mxu0 %vm1102_vm0, %v1101_v1  ;;  %s1151_s21 = scalar_lea.vmem %s1295_s0, %s1065_s18 }
   0xf   : > { %1021 = vmatprep.subr.bf16.mxu0 %v1101_v1  ;;  %1043 = vmatprep.subr.bf16.mxu1 %v1101_v1  ;;  %v1079_v4 = vld [vmem:[%s1151_s21] sm:$0xff]   ;;  %v1080_v5 = vld [vmem:[%s1151_s21 + $0x8] sm:$0xff]   ;;  %v1083_v9 = vld [vmem:[%s1151_s21 + $0x10] sm:$0xff]   ;;  %s1269_s4 = scalar_lea.vmem %s1298_s3, %s1066_s28 }
  0x10   : > { %1002 = vmatmul.mubr.msk.bf16.vlgmr.msra.gmra.mxu1 %vm258_vm1, %v1079_v4  ;;  %v214_v6 = vshrl.u32 %v1079_v4, 16  ;;  %v216_v7 = vshll.u32 %v1079_v4, 16  ;;  %v221_v8 = vshll.u32 %v1080_v5, 16  ;;  %v225_v14 = vshrl.u32 %v1080_v5, 16  ;;  %v1084_v19 = vld [vmem:[%s1151_s21 + $0x18] sm:$0xff]   ;;  %v1088_v39 = vld [vmem:[%s1151_s21 + $0xc] sm:$0xff]  }
  0x11   : > { %1044 = vmatpush3.bf16.msra.mxu1 %v1082_v3  ;;  %1005 = vmatprep.mubr.msk.bf16.mxu1 %vm1102_vm0, %v1101_v1  ;;  %v229_v15 = vshll.u32 %v1083_v9, 16  ;;  %v233_v21 = vshrl.u32 %v1083_v9, 16  ;;  %v237_v22 = vshll.u32 %v1084_v19, 16  ;;  %v180_v23 = vld [vmem:[%s1151_s21 + $0x20] sm:$0xf]  ;;  %v241_v29 = vshrl.u32 %v1084_v19, 16 }
  0x12   : > { %v218_v10 = vrot.slane %v216_v7, 1  ;;  %v223_v11 = vrot.slane %v221_v8, 1  ;;  %v183_v24 = vld [vmem:[%s1151_s21 + $0x24] sm:$0x1]  ;;  %v437_v34 = vld [vmem:[%s1151_s21 + $0x8] sm:$0xf]  ;;  %v880_v37 = vcombine.low %v180_v23, %v180_v23 }
  0x13   : > { %v231_v18 = vrot.slane %v229_v15, 1  ;;  %v239_v26 = vrot.slane %v237_v22, 1  ;;  %v873_v27 = vcombine.low %v180_v23, %v183_v24  ;;  %v436_v33 = vld [vmem:[%s1151_s21 + $0x4] sm:$0xf]  ;;  %v624_v44 = vrot.slane %v1088_v39, 1  ;;  %v1090_v50 = vld [vmem:[%s1151_s21 + $0x14] sm:$0xff]  }
  0x14   : > { %v219_v12 = vor.u32 %v218_v10, %v214_v6  ;;  %v227_v17 = vor.u32 %v225_v14, %v223_v11  ;;  %v615_v35 = vld [vmem:[%s1151_s21 + $0x4] sm:$0xe]  ;;  %v889_v38 = vcombine.low %v436_v33, %v437_v34  ;;  %v482_v48 = vshll.u32 %v1088_v39, 16  ;;  %v1091_v58 = vld [vmem:[%s1151_s21 + $0x1c] sm:$0xff]  }
  0x15   : > { %v235_v25 = vor.u32 %v233_v21, %v231_v18  ;;  %v245_v30 = vshll.u32 %v873_v27, 16  ;;  %v243_v31 = vor.u32 %v241_v29, %v239_v26  ;;  %v902_v40 = vcombine.low %v615_v35, %v437_v34  ;;  %v1092_v3 = vld [vmem:[%s1151_s21 + $0x24] sm:$0x1f]  }
  0x16   : > { %v224_v16 = vsel %vm212_vm2, %v219_v12, %v223_v11  ;;  %v232_v20 = vsel %vm212_vm2, %v227_v17, %v231_v18  ;;  %v249_v41 = vshrl.u32 %v873_v27, 16  ;;  %v477_v42 = vshll.u32 %v889_v38, 16 }
  0x17   : > { %980 = vmatmul.mubr.msk.bf16.vlgmr.msra.gmra.mxu0 %vm258_vm1, %v224_v16  ;;  %v240_v28 = vsel %vm212_vm2, %v235_v25, %v239_v26  ;;  %v247_v32 = vrot.slane %v245_v30, 1  ;;  %v623_v43 = vrot.slane %v902_v40, 1  ;;  %v475_v46 = vshrl.u32 %v889_v38, 16 }
  0x18   : > { %1022 = vmatpush3.bf16.msra.mxu0 %v1081_v13  ;;  %1006 = vmatmul.mubr.msk.bf16.gmra.mxu1 %vm258_vm1, %v1080_v5  ;;  %v479_v47 = vrot.slane %v477_v42, 1  ;;  %v484_v52 = vrot.slane %v482_v48, 1  ;;  %v626_v53 = vrot.slane %v1090_v50, 1  ;;  %v486_v55 = vshrl.u32 %v1088_v39, 16 }
  0x19   : > { %983 = vmatprep.mubr.msk.bf16.mxu0 %vm1102_vm0, %v1101_v1  ;;  %1009 = vmatprep.mubr.msk.bf16.mxu1 %vm1102_vm0, %v1101_v1  ;;  %v248_v36 = vsel %vm212_vm2, %v243_v31, %v247_v32  ;;  %v251_v45 = vor.u32 %v249_v41, %v247_v32  ;;  %v625_v49 = vsel %vm622_vm3, %v623_v43, %v624_v44  ;;  %v490_v56 = vshll.u32 %v1090_v50, 16 }
  0x1a   : > { %v480_v51 = vor.u32 %v479_v47, %v475_v46  ;;  %v627_v57 = vsel %vm622_vm3, %v624_v44, %v626_v53  ;;  %v488_v59 = vor.u32 %v486_v55, %v484_v52  ;;  %v628_v61 = vrot.slane %v1091_v58, 1 }
  0x1b   : > { %v492_v60 = vrot.slane %v490_v56, 1  ;;  %v494_v63 = vshrl.u32 %v1090_v50, 16  ;;  %v498_v0 = vshll.u32 %v1091_v58, 16  ;;  %v630_v6 = vrot.slane %v1092_v3, 1 }
  0x1c   : > { %v485_v54 = vsel %vm212_vm2, %v480_v51, %v484_v52  ;;  %v629_v2 = vsel %vm622_vm3, %v626_v53, %v628_v61  ;;  %v502_v8 = vshrl.u32 %v1091_v58, 16  ;;  %v510_v14 = vshrl.u32 %v1092_v3, 16 }
  0x1d   : > { %v493_v62 = vsel %vm212_vm2, %v488_v59, %v492_v60  ;;  %v496_v4 = vor.u32 %v494_v63, %v492_v60  ;;  %v500_v5 = vrot.slane %v498_v0, 1  ;;  %v631_v10 = vsel %vm622_vm3, %v628_v61, %v630_v6 }
  0x1f   : > { %984 = vmatmul.mubr.msk.bf16.gmra.mxu0 %vm258_vm1, %v232_v20  ;;  %v501_v7 = vsel %vm212_vm2, %v496_v4, %v500_v5  ;;  %v504_v11 = vor.u32 %v502_v8, %v500_v5  ;;  %v1261_v4 = vld [vmem:[%s1297_s2] ss:$0 sm:$0xff] }
  0x20   : > { %1010 = vmatmul.mubr.msk.bf16.gmra.mxu1 %vm258_vm1, %v1083_v9  ;;  %987 = vmatprep.mubr.msk.bf16.mxu0 %vm1102_vm0, %v1101_v1  ;;  %v506_v9 = vshll.u32 %v1092_v3, 16 }
  0x21   : > { %1013 = vmatprep.mubr.msk.bf16.mxu1 %vm1102_vm0, %v1101_v1 }
  0x22   : > { %v508_v12 = vrot.slane %v506_v9, 1 }
  0x24   : > { %v509_v13 = vsel %vm212_vm2, %v504_v11, %v508_v12  ;;  %v512_v15 = vor.u32 %v510_v14, %v508_v12 }
  0x27   : > { %988 = vmatmul.mubr.msk.bf16.gmra.mxu0 %vm258_vm1, %v240_v28 }
  0x28   : > { %1014 = vmatmul.mubr.msk.bf16.gmra.mxu1 %vm258_vm1, %v1084_v19  ;;  %991 = vmatprep.mubr.msk.bf16.mxu0 %vm1102_vm0, %v1101_v1 }
  0x29   : > { %1017 = vmatprep.mubr.msk.bf16.mxu1 %vm1102_vm0, %v1101_v1 }
  0x2f   : > { %992 = vmatmul.mubr.msk.bf16.gmra.mxu0 %vm258_vm1, %v248_v36 }
  0x30   : > { %1018 = vmatmul.mubr.msk.bf16.gmra.mxu1 %vm258_vm1, %v880_v37  ;;  %995 = vmatprep.mubr.msk.bf16.mxu0 %vm1102_vm0, %v1101_v1 }
  0x31   : > { %1045 = vmatprep.mubr.msk.bf16.mxu1 %vm1102_vm0, %v1101_v1 }
  0x37   : > { %996 = vmatmul.mubr.msk.bf16.gmra.mxu0 %vm258_vm1, %v251_v45 }
  0x38   : > { %1046 = vmatmul.mubr.msk.bf16.vlgmr.msra.gmra.mxu1 %vm258_vm1, %v625_v49  ;;  %1023 = vmatprep.mubr.msk.bf16.mxu0 %vm1102_vm0, %v1101_v1 }
  0x39   : > { %1049 = vmatprep.mubr.msk.bf16.mxu1 %vm1102_vm0, %v1101_v1 }
  0x3f   : > { %1024 = vmatmul.mubr.msk.bf16.vlgmr.msra.gmra.mxu0 %vm258_vm1, %v485_v54 }
  0x40   : > { %1050 = vmatmul.mubr.msk.bf16.gmra.mxu1 %vm258_vm1, %v627_v57  ;;  %1027 = vmatprep.mubr.msk.bf16.mxu0 %vm1102_vm0, %v1101_v1 }
  0x41   : > { %1053 = vmatprep.mubr.msk.bf16.mxu1 %vm1102_vm0, %v1101_v1 }
  0x47   : > { %1028 = vmatmul.mubr.msk.bf16.gmra.mxu0 %vm258_vm1, %v493_v62 }
  0x48   : > { %1054 = vmatmul.mubr.msk.bf16.gmra.mxu1 %vm258_vm1, %v629_v2  ;;  %1031 = vmatprep.mubr.msk.bf16.mxu0 %vm1102_vm0, %v1101_v1 }
  0x49   : > { %1057 = vmatprep.mubr.msk.bf16.mxu1 %vm1102_vm0, %v1101_v1 }
  0x4f   : > { %1032 = vmatmul.mubr.msk.bf16.gmra.mxu0 %vm258_vm1, %v501_v7 }
  0x50   : > { %1058 = vmatmul.mubr.msk.bf16.gmra.mxu1 %vm258_vm1, %v631_v10  ;;  %1035 = vmatprep.mubr.msk.bf16.mxu0 %vm1102_vm0, %v1101_v1 }
  0x51   : > { %1061 = vmatprep.mubr.msk.bf16.mxu1 %vm1102_vm0, %v1101_v1 }
  0x57   : > { %1036 = vmatmul.mubr.msk.bf16.gmra.mxu0 %vm258_vm1, %v509_v13 }
  0x58   : > { %1062 = vmatmul.mubr.msk.bf16.gmra.mxu1 %vm258_vm1, %v630_v6  ;;  %1039 = vmatprep.mubr.msk.bf16.mxu0 %vm1102_vm0, %v1101_v1 }
  0x5f   : > { %1040 = vmatmul.mubr.msk.bf16.gmra.mxu0 %vm258_vm1, %v512_v15 }
  0xd0   : > { %v398_v16 = vpop.f32.mrf.mxu1 }
  0xd2   : > { %v1003_v17 = vpop.f32.mrf.mxu1 }
  0xd4   : > { %v401_v18 = vpop.f32.mrf.mxu1 }
  0xd6   : > { %v1004_v19 = vpop.f32.mrf.mxu1 }
  0xd7   : > { %v308_v20 = vpop.f32.mrf.mxu0 }
  0xd8   : > { %v406_v21 = vpop.f32.mrf.mxu1  ;;  %v399_v58 = vadd.f32 %v398_v16, %v308_v20 }
  0xd9   : > { %v981_v22 = vpop.f32.mrf.mxu0 }
  0xda   : > { %v1007_v23 = vpop.f32.mrf.mxu1 }
  0xdb   : > { %v311_v24 = vpop.f32.mrf.mxu0 }
  0xdc   : > { %v409_v25 = vpop.f32.mrf.mxu1  ;;  %v402_v0 = vadd.f32 %v401_v18, %v311_v24 }
  0xdd   : > { %v982_v26 = vpop.f32.mrf.mxu0 }
  0xde   : > { %v1008_v27 = vpop.f32.mrf.mxu1 }
  0xdf   : > { %v316_v28 = vpop.f32.mrf.mxu0 }
  0xe0   : > { %v1240_v29 = vpop.f32.mrf.mxu1  ;;  %v407_v9 = vadd.f32 %v406_v21, %v316_v28 }
  0xe1   : > { %v985_v30 = vpop.f32.mrf.mxu0 }
  0xe2   : > { %v1011_v1 = vpop.f32.mrf.mxu1 }
  0xe3   : > { %v319_v31 = vpop.f32.mrf.mxu0 }
  0xe4   : > { %v1242_v32 = vpop.f32.mrf.mxu1  ;;  %v410_v18 = vadd.f32 %v409_v25, %v319_v31 }
  0xe5   : > { %v986_v33 = vpop.f32.mrf.mxu0 }
  0xe6   : > { %v1012_v34 = vpop.f32.mrf.mxu1 }
  0xe7   : > { %v324_v35 = vpop.f32.mrf.mxu0 }
  0xe8   : > { %v1244_v36 = vpop.f32.mrf.mxu1  ;;  %v415_v30 = vadd.f32 %v1240_v29, %v324_v35 }
  0xe9   : > { %v989_v37 = vpop.f32.mrf.mxu0 }
  0xea   : > { %v1015_v38 = vpop.f32.mrf.mxu1 }
  0xeb   : > { %v1246_v39 = vpop.f32.mrf.mxu0 }
  0xec   : > { %v1248_v40 = vpop.f32.mrf.mxu1 }
  0xed   : > { %v990_v41 = vpop.f32.mrf.mxu0 }
  0xee   : > { %v1016_v42 = vpop.f32.mrf.mxu1 }
  0xef   : > { %v1250_v43 = vpop.f32.mrf.mxu0  ;;  %v418_v42 = vadd.f32 %v1242_v32, %v1246_v39 }
  0xf0   : > { %v1252_v44 = vpop.f32.mrf.mxu1 }
  0xf1   : > { %v993_v45 = vpop.f32.mrf.mxu0 }
  0xf2   : > { %v1019_v46 = vpop.f32.mrf.mxu1 }
  0xf3   : > { %v1254_v47 = vpop.f32.mrf.mxu0 }
  0xf4   : > { %v433_v48 = vpop.f32.mrf.mxu1 }
  0xf5   : > { %v994_v49 = vpop.f32.mrf.mxu0 }
  0xf6   : > { %v1020_v50 = vpop.f32.mrf.mxu1 }
  0xf7   : > { %v1256_v51 = vpop.f32.mrf.mxu0 }
  0xf8   : > { %v687_v52 = vpop.f32.mrf.mxu1 }
  0xf9   : > { %v997_v53 = vpop.f32.mrf.mxu0 }
  0xfa   : > { %v1047_v54 = vpop.f32.mrf.mxu1 }
  0xfb   : > { %v343_v55 = vpop.f32.mrf.mxu0  ;;  %v423_v54 = vadd.f32 %v1244_v36, %v1250_v43 }
  0xfc   : > { %v690_v56 = vpop.f32.mrf.mxu1 }
  0xfd   : > { %v998_v57 = vpop.f32.mrf.mxu0 }
  0xfe   : > { %v1048_v59 = vpop.f32.mrf.mxu1 }
  0xff   : > { %v568_v60 = vpop.f32.mrf.mxu0 }
 0x100   : > { %v606_v61 = vadd.f32 %v568_v60, %v399_v58  ;;  %v695_v62 = vpop.f32.mrf.mxu1 }
 0x101   : > { %v1025_v63 = vpop.f32.mrf.mxu0 }
 0x102   : > { %v725_v2 = vadd.f32 %v687_v52, %v606_v61  ;;  %v1051_v3 = vpop.f32.mrf.mxu1  ;;  %v426_v61 = vadd.f32 %v1248_v40, %v1254_v47 }
 0x103   : > { %v571_v5 = vpop.f32.mrf.mxu0 }
 0x104   : > { %v607_v6 = vadd.f32 %v571_v5, %v402_v0  ;;  %v698_v7 = vpop.f32.mrf.mxu1  ;;  %v741_v10 = vadd.f32 %v1261_v4, %v725_v2 }
 0x105   : > { %v1026_v8 = vpop.f32.mrf.mxu0 }
 0x106   : > { %v726_v11 = vadd.f32 %v690_v56, %v607_v6  ;;  %v1052_v12 = vpop.f32.mrf.mxu1  ;;  %v750_v19 = vmax.f32 %v741_v10, 0.0 }
 0x107   : > { %v576_v13 = vpop.f32.mrf.mxu0 }
 0x108   : > { %v742_v14 = vadd.f32 %v1261_v4, %v726_v11  ;;  %v608_v15 = vadd.f32 %v576_v13, %v407_v9  ;;  %v703_v16 = vpop.f32.mrf.mxu1 }
 0x109   : > { %v1029_v17 = vpop.f32.mrf.mxu0 }
 0x10a   : > { %v751_v20 = vmax.f32 %v742_v14, 0.0  ;;  %v727_v22 = vadd.f32 %v695_v62, %v608_v15  ;;  %v1055_v23 = vpop.f32.mrf.mxu1 }
 0x10b   : > { %v579_v21 = vpop.f32.mrf.mxu0 }
 0x10c   : > { %v933_v24 = vpack.c.bf16 %v751_v20, %v750_v19  ;;  %v609_v26 = vadd.f32 %v579_v21, %v410_v18  ;;  %v706_v27 = vpop.f32.mrf.mxu1  ;;  %v743_v25 = vadd.f32 %v1261_v4, %v727_v22 }
 0x10d   : > { %v1030_v28 = vpop.f32.mrf.mxu0 }
 0x10e   : > { %934 = vst [vmem:[%s1269_s4] sm:$0xff] %v933_v24   ;;  %v728_v1 = vadd.f32 %v698_v7, %v609_v26  ;;  %v1056_v31 = vpop.f32.mrf.mxu1  ;;  %v752_v45 = vmax.f32 %v743_v25, 0.0  ;;  %v431_v7 = vadd.f32 %v1252_v44, %v1256_v51 }
 0x10f   : > { %v584_v33 = vpop.f32.mrf.mxu0 }
 0x110   : > { %v744_v34 = vadd.f32 %v1261_v4, %v728_v1  ;;  %v610_v37 = vadd.f32 %v584_v33, %v415_v30  ;;  %v711_v38 = vpop.f32.mrf.mxu1 }
 0x111   : > { %v1033_v41 = vpop.f32.mrf.mxu0 }
 0x112   : > { %v753_v46 = vmax.f32 %v744_v34, 0.0  ;;  %v729_v48 = vadd.f32 %v703_v16, %v610_v37  ;;  %v1059_v49 = vpop.f32.mrf.mxu1 }
 0x113   : > { %v587_v29 = vpop.f32.mrf.mxu0 }
 0x114   : > { %v938_v35 = vpack.c.bf16 %v753_v46, %v752_v45  ;;  %v611_v50 = vadd.f32 %v587_v29, %v418_v42  ;;  %v714_v52 = vpop.f32.mrf.mxu1  ;;  %v745_v55 = vadd.f32 %v1261_v4, %v729_v48 }
 0x115   : > { %v1034_v53 = vpop.f32.mrf.mxu0 }
 0x116   : > { %950 = vst [vmem:[%s1269_s4 + $0x8] sm:$0xff] %v938_v35   ;;  %v730_v56 = vadd.f32 %v706_v27, %v611_v50  ;;  %v1060_v57 = vpop.f32.mrf.mxu1  ;;  %v754_v62 = vmax.f32 %v745_v55, 0.0 }
 0x117   : > { %v592_v58 = vpop.f32.mrf.mxu0 }
 0x118   : > { %v746_v32 = vadd.f32 %v1261_v4, %v730_v56  ;;  %v612_v39 = vadd.f32 %v592_v58, %v423_v54  ;;  %v719_v59 = vpop.f32.mrf.mxu1 }
 0x119   : > { %v1037_v60 = vpop.f32.mrf.mxu0 }
 0x11a   : > { %v755_v63 = vmax.f32 %v746_v32, 0.0  ;;  %v731_v0 = vadd.f32 %v711_v38, %v612_v39  ;;  %v1063_v2 = vpop.f32.mrf.mxu1 }
 0x11b   : > { %v595_v36 = vpop.f32.mrf.mxu0 }
 0x11c   : > { %v943_v43 = vpack.c.bf16 %v755_v63, %v754_v62  ;;  %v613_v3 = vadd.f32 %v595_v36, %v426_v61  ;;  %v722_v5 = vpop.f32.mrf.mxu1  ;;  %v747_v8 = vadd.f32 %v1261_v4, %v731_v0 }
 0x11d   : > { %v1038_v6 = vpop.f32.mrf.mxu0 }
 0x11e   : > { %951 = vst [vmem:[%s1269_s4 + $0x10] sm:$0xff] %v943_v43   ;;  %v732_v9 = vadd.f32 %v714_v52, %v613_v3  ;;  %v1064_v10 = vpop.f32.mrf.mxu1  ;;  %v756_v13 = vmax.f32 %v747_v8, 0.0 }
 0x11f   : > { %v600_v40 = vpop.f32.mrf.mxu0 }
 0x120   : > { %v748_v47 = vadd.f32 %v1261_v4, %v732_v9  ;;  %v614_v11 = vadd.f32 %v600_v40, %v431_v7 }
 0x121   : > { %v1041_v12 = vpop.f32.mrf.mxu0 }
 0x122   : > { %v757_v14 = vmax.f32 %v748_v47, 0.0  ;;  %v733_v15 = vadd.f32 %v719_v59, %v614_v11 }
 0x123   : > { %v603_v16 = vpop.f32.mrf.mxu0 }
 0x124   : > { %v948_v17 = vpack.c.bf16 %v757_v14, %v756_v13  ;;  %v749_v18 = vadd.f32 %v1261_v4, %v733_v15 }
 0x125   : > { %v1042_v44 = vpop.f32.mrf.mxu0 }
 0x126   : > { %952 = vst [vmem:[%s1269_s4 + $0x18] sm:$0xff] %v948_v17   ;;  %v758_v51 = vmax.f32 %v749_v18, 0.0 }
 0x128   : > { %v929_v19 = vpack.c.bf16 %v758_v51, %v758_v51 }
 0x12a   : > { %804 = vst [vmem:[%s1269_s4 + $0x20] sm:$0xf] %v929_v19 }
 0x12b PF: > { %s13_s12 = sadd.s32 1, %s1099_s12  }
 0x12c   : > { %p10_p4 = scmp.ge.s32.totalorder %s13_s12, 4  }
 0x12e   :  { %12 = sbr.rel (!%p10_p4) target bundleno = 1 (0x1), region = 65 }

// kernel: encoder_forward.3
= control target key start
LH: loop header
LB: loop body
LE: loop exit
PB: predicated region body
PF: predicated region fallthrough
CT: control target
= control target key end

     0   :  { %s8700_s27 = smov 0   ;;  %s10223_s0 = inlined_call_operand.vmem [shape: bf16[2,32,512], index: 0, kind: input, shape index: {}]   ;;  %s10224_s1 = inlined_call_operand.vmem [shape: bf16[4,512,128], index: 1, kind: input, shape index: {}]   ;;  %s10225_s2 = inlined_call_operand.vmem [shape: f32[1,128], index: 2, kind: input, shape index: {}]   ;;  %s10226_s3 = inlined_call_operand.vmem [shape: bf16[9,128,128], index: 3, kind: input, shape index: {}]   ;;  %s10227_s4 = inlined_call_operand.vmem [shape: f32[1,128], index: 4, kind: input, shape index: {}]   ;;  %s10228_s5 = inlined_call_operand.vmem [shape: bf16[18,128,128], index: 5, kind: input, shape index: {}]   ;;  %s10229_s6 = inlined_call_operand.vmem [shape: bf16[2,128,128], index: 6, kind: input, shape index: {}]   ;;  %s10230_s7 = inlined_call_operand.vmem [shape: f32[24,1], index: 7, kind: input, shape index: {}]   ;;  %s10231_s8 = inlined_call_operand.vmem [shape: f32[2,24,128], index: 8, kind: output, shape index: {}]  }
   0x1 LB: > { %s6051_s28 = sadd.s32 4294967295, %s8652_s27   ;;  %p6055_p0 = scmp.ge.s32.totalorder %s8652_s27, 1  ;;  %s8652_s27 = sphi %s8700_s27, %s18_s27  }
   0x2   : > { %p262_p1 = scmp.lt.s32.totalorder %s8652_s27, 3 }
   0x4   : > { %p263_p2 = pnand %p6055_p0, %p262_p1 }
   0x5   : > { %p296_p3 = scmp.lt.s32.totalorder (!%p263_p2), %s6051_s28, 1 }
   0x6   : > { %266 = sbr.rel (%p263_p2) target bundleno = 1857 (0x741), region = 52 }
   0xb   : > { %v8223_v0 = vld [vmem:[%s10224_s1 + $0x178] sm:$0xff]   ;;  %v8227_v4 = vld [vmem:[%s10224_s1 + $0x170] sm:$0xff]   ;;  %v8231_v8 = vld [vmem:[%s10224_s1 + $0x168] sm:$0xff]   ;;  %s10239_s28 = smov (!%p296_p3, %s6051_s28), 1  ;;  %v8654_v28 = vmov 0   ;;  %vm1266_vm1 = vcmask 1044480  }
   0xc   : > { %v8224_v1 = vld [vmem:[%s10224_s1 + $0x1f8] sm:$0xff]   ;;  %7117 = vmatprep.subr.bf16.mxu0 %v8223_v0  ;;  %v8228_v5 = vld [vmem:[%s10224_s1 + $0x1f0] sm:$0xff]   ;;  %v8232_v9 = vld [vmem:[%s10224_s1 + $0x1e8] sm:$0xff]   ;;  %s7107_s19 = sshll.u32 %s10239_s28, 6  ;;  %8221 = vset.pattern.permute.xlu0 %v8654_v28  ;;  %322 = vst [vmem:[#allocation2 + $0x10] sm:$0xf] %v8654_v28 }
   0xd   : > { %v8225_v2 = vld [vmem:[%s10224_s1 + $0x138] sm:$0xff]   ;;  %7145 = vmatprep.subr.bf16.mxu1 %v8224_v1  ;;  %v8229_v6 = vld [vmem:[%s10224_s1 + $0x130] sm:$0xff]   ;;  %v8233_v10 = vld [vmem:[%s10224_s1 + $0x128] sm:$0xff]   ;;  %8222 = vset.pattern.permute.xlu1 %v8654_v28  ;;  %s8808_s10 = scalar_lea.vmem %s10223_s0, %s7107_s19  ;;  %vm498_vm0 = vsmask.f32 7424  ;;  %vm310_vm3 = vcmask 1043456  }
   0xe   : > { %v8226_v3 = vld [vmem:[%s10224_s1 + $0x1b8] sm:$0xff]   ;;  %7118 = vmatpush3.bf16.msra.mxu0 %v8225_v2  ;;  %v8230_v7 = vld [vmem:[%s10224_s1 + $0x1b0] sm:$0xff]   ;;  %v8234_v11 = vld [vmem:[%s10224_s1 + $0x1a8] sm:$0xff]   ;;  %vm1655_vm2 = vsmask.f32 4352  ;;  %vm316_vm6 = vcmask 1043459  }
   0xf   : > { %7146 = vmatpush3.bf16.msra.mxu1 %v8226_v3  ;;  %7119 = vmatprep.subr.bf16.mxu0 %v8227_v4  ;;  %v8235_v12 = vld [vmem:[%s10224_s1 + $0x160] sm:$0xff]   ;;  %v8239_v16 = vld [vmem:[%s10224_s1 + $0x158] sm:$0xff]   ;;  %v8243_v20 = vld [vmem:[%s10224_s1 + $0x150] sm:$0xff]   ;;  %vm311_vm4 = vsmask.f32 3328  ;;  %vm2387_vm11 = vcmask 1046528  }
  0x10   : > { %7147 = vmatprep.subr.bf16.mxu1 %v8228_v5  ;;  %v8236_v13 = vld [vmem:[%s10224_s1 + $0x1e0] sm:$0xff]   ;;  %v8240_v17 = vld [vmem:[%s10224_s1 + $0x1d8] sm:$0xff]   ;;  %v8244_v21 = vld [vmem:[%s10224_s1 + $0x1d0] sm:$0xff]   ;;  %vm317_vm7 = vsmask.f32 7950  ;;  %vm2911_vm13 = vcmask 1045504  }
  0x11   : > { %v8237_v14 = vld [vmem:[%s10224_s1 + $0x120] sm:$0xff]   ;;  %v8241_v18 = vld [vmem:[%s10224_s1 + $0x118] sm:$0xff]   ;;  %v8245_v22 = vld [vmem:[%s10224_s1 + $0x110] sm:$0xff]   ;;  %vm2064_vm9 = vsmask.f32 7440  ;;  %s8211_s11 = smul.u32 24, %s10239_s28 }
  0x12   : > { %7120 = vmatpush3.bf16.msra.mxu0 %v8229_v6  ;;  %v8238_v15 = vld [vmem:[%s10224_s1 + $0x1a0] sm:$0xff]   ;;  %v8242_v19 = vld [vmem:[%s10224_s1 + $0x198] sm:$0xff]   ;;  %v8246_v23 = vld [vmem:[%s10224_s1 + $0x190] sm:$0xff]   ;;  %vm3037_vm12 = vsmask.f32 5376 }
  0x13   : > { %7148 = vmatpush3.bf16.msra.mxu1 %v8230_v7  ;;  %7121 = vmatprep.subr.bf16.mxu0 %v8231_v8  ;;  %v8247_v24 = vld [vmem:[%s10224_s1 + $0x148] sm:$0xff]   ;;  %v8251_v29 = vld [vmem:[%s10224_s1 + $0x140] sm:$0xff]   ;;  %v8818_v34 = vld [vmem:[%s8808_s10 + $0x10] sm:$0xff]  ;;  %s305_s14 = scalar_lea.vmem %s10231_s8, %s8211_s11 }
  0x14   : > { %7149 = vmatprep.subr.bf16.mxu1 %v8232_v9  ;;  %v8248_v25 = vld [vmem:[%s10224_s1 + $0x1c8] sm:$0xff]   ;;  %v8252_v30 = vld [vmem:[%s10224_s1 + $0x1c0] sm:$0xff]   ;;  %v399_v36 = vld [vmem:[%s8808_s10 + $0x30] sm:$0x11] }
  0x15   : > { %v8249_v26 = vld [vmem:[%s10224_s1 + $0x108] sm:$0xff]   ;;  %v8253_v31 = vld [vmem:[%s10224_s1 + $0x100] sm:$0xff]   ;;  %v8829_v39 = vld [vmem:[%s8808_s10 + $0x18] sm:$0xff] }
  0x16   : > { %7122 = vmatpush3.bf16.msra.mxu0 %v8233_v10  ;;  %v8250_v27 = vld [vmem:[%s10224_s1 + $0x188] sm:$0xff]   ;;  %v8254_v32 = vld [vmem:[%s10224_s1 + $0x180] sm:$0xff]   ;;  %v400_v43 = vld [vmem:[%s8808_s10 + $0x38] sm:$0x11] }
  0x17   : > { %7150 = vmatpush3.bf16.msra.mxu1 %v8234_v11  ;;  %7123 = vmatprep.subr.bf16.mxu0 %v8235_v12  ;;  %v393_v33 = vld [vmem:[%s8808_s10] sm:$0xff]  ;;  %v394_v38 = vld [vmem:[%s8808_s10 + $0x8] sm:$0xff]  ;;  %v8263_v51 = vld [vmem:[%s10224_s1 + $0x78] sm:$0xff]  }
  0x18   : > { %7151 = vmatprep.subr.bf16.mxu1 %v8236_v13  ;;  %v8821_v35 = vld [vmem:[%s8808_s10 + $0x20] sm:$0xff]  ;;  %v8825_v37 = vcombine.high %v393_v33, %v8818_v34  ;;  %v8832_v40 = vcombine.low %v393_v33, %v8818_v34  ;;  %v8836_v42 = vld [vmem:[%s8808_s10 + $0x28] sm:$0xff]  ;;  %v8840_v44 = vcombine.high %v394_v38, %v8829_v39  ;;  %v8844_v46 = vcombine.low %v394_v38, %v8829_v39  ;;  %v8264_v60 = vld [vmem:[%s10224_s1 + $0xf8] sm:$0xff]  }
  0x19   : > { %v6128_v41 = vcombine.high %v8821_v35, %v399_v36  ;;  %v6127_v45 = vcombine.low %v8821_v35, %v399_v36  ;;  %v6130_v49 = vcombine.high %v8836_v42, %v400_v43  ;;  %v6129_v59 = vcombine.low %v8836_v42, %v400_v43  ;;  %v8265_v8 = vld [vmem:[%s10224_s1 + $0x38] sm:$0xff]   ;;  %v8267_v11 = vld [vmem:[%s10224_s1 + $0x70] sm:$0xff]   ;;  %v8272_v28 = vld [vmem:[%s10224_s1 + $0xe8] sm:$0xff]  }
  0x1a   : > { %7124 = vmatpush3.bf16.msra.mxu0 %v8237_v14  ;;  %v512_v47 = vshrl.u32 %v8825_v37, 16  ;;  %v514_v48 = vshll.u32 %v8825_v37, 16  ;;  %v500_v50 = vshrl.u32 %v8832_v40, 16  ;;  %v536_v53 = vshrl.u32 %v8840_v44, 16  ;;  %v8276_v36 = vld [vmem:[%s10224_s1 + $0xe0] sm:$0xff]   ;;  %vm9234_vm5 = vmand %vm310_vm3, %vm311_vm4 }
  0x1b   : > { %7152 = vmatpush3.bf16.msra.mxu1 %v8238_v15  ;;  %7125 = vmatprep.subr.bf16.mxu0 %v8239_v16  ;;  %v519_v52 = vshll.u32 %v6128_v41, 16  ;;  %v538_v54 = vshll.u32 %v8840_v44, 16  ;;  %v502_v55 = vshll.u32 %v8832_v40, 16  ;;  %v543_v57 = vshll.u32 %v6130_v49, 16  ;;  %v8266_v15 = vld [vmem:[%s10224_s1 + $0xb8] sm:$0xff]   ;;  %v8277_v38 = vld [vmem:[%s10224_s1 + $0x20] sm:$0xff]   ;;  %vm9246_vm8 = vmand %vm316_vm6, %vm317_vm7 }
  0x1c   : > { %7153 = vmatprep.subr.bf16.mxu1 %v8240_v17  ;;  %v516_v56 = vrot.slane %v514_v48, 1  ;;  %v507_v58 = vshll.u32 %v6127_v45, 16  ;;  %v524_v0 = vshrl.u32 %v8844_v46, 16  ;;  %v526_v4 = vshll.u32 %v8844_v46, 16  ;;  %v8268_v17 = vld [vmem:[%s10224_s1 + $0xf0] sm:$0xff]   ;;  %v8278_v43 = vld [vmem:[%s10224_s1 + $0xa0] sm:$0xff]   ;;  %vm9314_vm10 = vmor %vm311_vm4, %vm2064_vm9 }
  0x1d   : > { %v521_v61 = vrot.slane %v519_v52, 1  ;;  %v540_v62 = vrot.slane %v538_v54, 1  ;;  %v504_v63 = vrot.slane %v502_v55, 1  ;;  %v545_v2 = vrot.slane %v543_v57, 1  ;;  %v8282_v48 = vld [vmem:[%s10224_s1 + $0x98] sm:$0xff]   ;;  %v8288_v52 = vld [vmem:[%s10224_s1 + $0xc8] sm:$0xff]  }
  0x1e   : > { %7126 = vmatpush3.bf16.msra.mxu0 %v8241_v18  ;;  %v517_v1 = vor.u32 %v516_v56, %v512_v47  ;;  %v509_v3 = vrot.slane %v507_v58, 1  ;;  %v531_v7 = vshll.u32 %v6129_v59, 16  ;;  %v528_v10 = vrot.slane %v526_v4, 1  ;;  %v8281_v47 = vld [vmem:[%s10224_s1 + $0x18] sm:$0xff]   ;;  %v8291_v54 = vld [vmem:[%s10224_s1 + $0x40] sm:$0xff]   ;;  %v8290_v55 = vld [vmem:[%s10224_s1 + $0x88] sm:$0xff]  }
  0x1f   : > { %7154 = vmatpush3.bf16.msra.mxu1 %v8242_v19  ;;  %7127 = vmatprep.subr.bf16.mxu0 %v8243_v20  ;;  %v541_v5 = vor.u32 %v540_v62, %v536_v53  ;;  %v505_v6 = vor.u32 %v504_v63, %v500_v50  ;;  %v550_v18 = vshrl.u32 %v6128_v41, 16  ;;  %v8269_v19 = vld [vmem:[%s10224_s1 + $0x30] sm:$0xff]   ;;  %v556_v20 = vshrl.u32 %v6130_v49, 16  ;;  %v8279_v41 = vld [vmem:[%s10224_s1 + $0x58] sm:$0xff]   ;;  %v8287_v50 = vld [vmem:[%s10224_s1 + $0x48] sm:$0xff]  }
  0x20   : > { %7155 = vmatprep.subr.bf16.mxu1 %v8244_v21  ;;  %v522_v9 = vsel %vm498_vm0, %v517_v1, %v521_v61  ;;  %v533_v14 = vrot.slane %v531_v7, 1  ;;  %v529_v16 = vor.u32 %v528_v10, %v524_v0  ;;  %v8285_v49 = vld [vmem:[%s10224_s1 + $0x10] sm:$0xff]   ;;  %v8289_v53 = vld [vmem:[%s10224_s1 + $0x8] sm:$0xff]   ;;  %v8292_v56 = vld [vmem:[%s10224_s1 + $0xc0] sm:$0xff]   ;;  %v6168_v63 = vcombine.high %v8821_v35, %v8821_v35 }
  0x21   : > { %791 = vmatprep.mubr.bf16.mxu0 %v522_v9  ;;  %v546_v12 = vsel %vm498_vm0, %v541_v5, %v545_v2  ;;  %v510_v13 = vsel %vm498_vm0, %v505_v6, %v509_v3  ;;  %v8293_v57 = vld [vmem:[%s10224_s1] sm:$0xff]   ;;  %v8295_v58 = vld [vmem:[%s10224_s1 + $0x278] sm:$0xff]   ;;  %v8299_v62 = vld [vmem:[%s10224_s1 + $0x270] sm:$0xff]   ;;  %v6167_v5 = vcombine.low %v8821_v35, %v8821_v35  ;;  %v6169_v9 = vcombine.low %v8836_v42, %v8836_v42 }
  0x22   : > { %7128 = vmatpush3.bf16.msra.mxu0 %v8245_v22  ;;  %839 = vmatprep.mubr.bf16.mxu1 %v546_v12  ;;  %v534_v21 = vsel %vm498_vm0, %v529_v16, %v533_v14  ;;  %v8271_v22 = vld [vmem:[%s10224_s1 + $0x68] sm:$0xff]   ;;  %v8298_v0 = vld [vmem:[%s10224_s1 + $0x2b8] sm:$0xff]   ;;  %v8300_v1 = vld [vmem:[%s10224_s1 + $0x2f0] sm:$0xff]  }
  0x23   : > { %7156 = vmatpush3.bf16.msra.mxu1 %v8246_v23  ;;  %7129 = vmatprep.subr.bf16.mxu0 %v8247_v24  ;;  %v552_v23 = vor.u32 %v550_v18, %v521_v61  ;;  %v547_v24 = vshrl.u32 %v6127_v45, 16  ;;  %v8280_v45 = vld [vmem:[%s10224_s1 + $0xd8] sm:$0xff]   ;;  %v8305_v4 = vld [vmem:[%s10224_s1 + $0x268] sm:$0xff]   ;;  %v8312_v10 = vld [vmem:[%s10224_s1 + $0x2e0] sm:$0xff]  }
  0x24   : > { %7157 = vmatprep.subr.bf16.mxu1 %v8248_v25  ;;  %v8270_v25 = vld [vmem:[%s10224_s1 + $0xb0] sm:$0xff]   ;;  %v8297_v61 = vld [vmem:[%s10224_s1 + $0x238] sm:$0xff]   ;;  %v8306_v6 = vld [vmem:[%s10224_s1 + $0x2e8] sm:$0xff]  }
  0x25   : > { %v8308_v7 = vld [vmem:[%s10224_s1 + $0x228] sm:$0xff]   ;;  %v8315_v12 = vld [vmem:[%s10224_s1 + $0x258] sm:$0xff]   ;;  %v8319_v16 = vld [vmem:[%s10224_s1 + $0x250] sm:$0xff]  }
  0x26   : > { %7130 = vmatpush3.bf16.msra.mxu0 %v8249_v26  ;;  %v558_v26 = vor.u32 %v556_v20, %v545_v2  ;;  %v6170_v2 = vcombine.high %v8836_v42, %v8836_v42  ;;  %v8320_v18 = vld [vmem:[%s10224_s1 + $0x2d0] sm:$0xff]   ;;  %v8323_v20 = vld [vmem:[%s10224_s1 + $0x248] sm:$0xff]  }
  0x27   : > { %7158 = vmatpush3.bf16.msra.mxu1 %v8250_v27  ;;  %7131 = vmatprep.subr.bf16.mxu0 %v8251_v29  ;;  %v553_v27 = vshrl.u32 %v6129_v59, 16  ;;  %v549_v29 = vor.u32 %v547_v24, %v509_v3  ;;  %v8294_v59 = vld [vmem:[%s10224_s1 + $0x80] sm:$0xff]   ;;  %v8301_v3 = vld [vmem:[%s10224_s1 + $0x230] sm:$0xff]  }
  0x28   : > { %7159 = vmatprep.subr.bf16.mxu1 %v8252_v30  ;;  %v8273_v30 = vld [vmem:[%s10224_s1 + $0x28] sm:$0xff]   ;;  %v8327_v24 = vld [vmem:[%s10224_s1 + $0x240] sm:$0xff]  }
  0x29   : > { %v555_v33 = vor.u32 %v553_v27, %v533_v14  ;;  %v8316_v14 = vld [vmem:[%s10224_s1 + $0x2d8] sm:$0xff]   ;;  %v8329_v27 = vld [vmem:[%s10224_s1 + $0x200] sm:$0xff]  }
  0x2a   : > { %7132 = vmatpush3.bf16.msra.mxu0 %v8253_v31  ;;  %v8275_v31 = vld [vmem:[%s10224_s1 + $0x60] sm:$0xff]  }
  0x2b   : > { %7160 = vmatpush3.bf16.msra.mxu1 %v8254_v32  ;;  %7173 = vmatprep.subr.bf16.mxu0 %v8263_v51  ;;  %v8274_v32 = vld [vmem:[%s10224_s1 + $0xa8] sm:$0xff]   ;;  %v8286_v51 = vld [vmem:[%s10224_s1 + $0x90] sm:$0xff]  }
  0x2c   : > { %7201 = vmatprep.subr.bf16.mxu1 %v8264_v60  ;;  %v8296_v60 = vld [vmem:[%s10224_s1 + $0x2f8] sm:$0xff]  }
  0x2d   : > { %792 = vmatmul.mubr.bf16.vlgmr.msra.gmra.mxu0 %v510_v13  ;;  %v8314_v13 = vld [vmem:[%s10224_s1 + $0x2a0] sm:$0xff]  }
  0x2e   : > { %7174 = vmatpush3.bf16.msra.mxu0 %v8265_v8  ;;  %840 = vmatmul.mubr.bf16.vlgmr.msra.gmra.mxu1 %v534_v21  ;;  %v8309_v8 = vld [vmem:[%s10224_s1 + $0x2a8] sm:$0xff]   ;;  %v8322_v21 = vld [vmem:[%s10224_s1 + $0x290] sm:$0xff]  }
  0x2f   : > { %7175 = vmatprep.subr.bf16.mxu0 %v8267_v11  ;;  %7202 = vmatpush3.bf16.msra.mxu1 %v8266_v15  ;;  %v8313_v11 = vld [vmem:[%s10224_s1 + $0x220] sm:$0xff]   ;;  %v8317_v15 = vld [vmem:[%s10224_s1 + $0x218] sm:$0xff]  }
  0x30   : > { %799 = vmatprep.mubr.bf16.mxu0 %v552_v23  ;;  %7203 = vmatprep.subr.bf16.mxu1 %v8268_v17  ;;  %v8318_v17 = vld [vmem:[%s10224_s1 + $0x298] sm:$0xff]   ;;  %v8325_v23 = vld [vmem:[%s10224_s1 + $0x208] sm:$0xff]  }
  0x31   : > { %847 = vmatprep.mubr.bf16.mxu1 %v558_v26  ;;  %v8328_v26 = vld [vmem:[%s10224_s1 + $0x2c0] sm:$0xff]  }
  0x32   : > { %7176 = vmatpush3.bf16.msra.mxu0 %v8269_v19  ;;  %v8321_v19 = vld [vmem:[%s10224_s1 + $0x210] sm:$0xff]  }
  0x33   : > { %7177 = vmatprep.subr.bf16.mxu0 %v8271_v22  ;;  %7204 = vmatpush3.bf16.msra.mxu1 %v8270_v25  ;;  %v8324_v22 = vld [vmem:[%s10224_s1 + $0x2c8] sm:$0xff]  }
  0x34   : > { %7205 = vmatprep.subr.bf16.mxu1 %v8272_v28  ;;  %v8326_v25 = vld [vmem:[%s10224_s1 + $0x288] sm:$0xff]   ;;  %v8330_v28 = vld [vmem:[%s10224_s1 + $0x280] sm:$0xff]  }
  0x35   : > { %800 = vmatmul.mubr.bf16.gmra.mxu0 %v549_v29  ;;  %v1177_v29 = vld [vmem:[%s8808_s10] sm:$0x88] }
  0x36   : > { %7178 = vmatpush3.bf16.msra.mxu0 %v8273_v30  ;;  %1113 = vmatprep.mubr.bf16.mxu0 %v8825_v37  ;;  %v8283_v37 = vld [vmem:[%s10224_s1 + $0x50] sm:$0xff]  }
  0x37   : > { %7179 = vmatprep.subr.bf16.mxu0 %v8275_v31  ;;  %848 = vmatmul.mubr.bf16.gmra.mxu1 %v555_v33  ;;  %v1179_v30 = vld [vmem:[%s8808_s10 + $0x30] sm:$0x77]  ;;  %v1178_v31 = vld [vmem:[%s8808_s10 + $0x8] sm:$0x88]  ;;  %v9071_v33 = vcombine.high %v1177_v29, %v8818_v34 }
  0x38   : > { %7206 = vmatpush3.bf16.msra.mxu1 %v8274_v32  ;;  %1161 = vmatprep.mubr.bf16.mxu1 %v8840_v44  ;;  %v8284_v44 = vld [vmem:[%s10224_s1 + $0xd0] sm:$0xff]   ;;  %v9068_v32 = vcombine.low %v1177_v29, %v8818_v34  ;;  %v8339_v34 = vld [vmem:[%s10224_s1 + $0x378] sm:$0xff]   ;;  %v8365_v29 = vld [vmem:[%s10224_s1 + $0x308] sm:$0xff]  }
  0x39   : > { %7207 = vmatprep.subr.bf16.mxu1 %v8276_v36  ;;  %v6271_v36 = vcombine.low %v8821_v35, %v1179_v30 }
  0x3a   : > { %7180 = vmatpush3.bf16.msra.mxu0 %v8277_v38  ;;  %v6272_v38 = vcombine.high %v8821_v35, %v1179_v30 }
  0x3b   : > { %7181 = vmatprep.subr.bf16.mxu0 %v8279_v41  ;;  %v1180_v41 = vld [vmem:[%s8808_s10 + $0x38] sm:$0x77] }
  0x3c   : > { %7208 = vmatpush3.bf16.msra.mxu1 %v8278_v43  ;;  %v9077_v43 = vcombine.low %v1178_v31, %v8829_v39 }
  0x3d   : > { %7209 = vmatprep.subr.bf16.mxu1 %v8280_v45  ;;  %v9080_v45 = vcombine.high %v1178_v31, %v8829_v39  ;;  %v8340_v39 = vld [vmem:[%s10224_s1 + $0x3f8] sm:$0xff]   ;;  %v8366_v31 = vld [vmem:[%s10224_s1 + $0x388] sm:$0xff]  }
  0x3e   : > { %7182 = vmatpush3.bf16.msra.mxu0 %v8281_v47  ;;  %v6273_v47 = vcombine.low %v8836_v42, %v1180_v41 }
  0x3f   : > { %7183 = vmatprep.subr.bf16.mxu0 %v8283_v37  ;;  %v6274_v37 = vcombine.high %v8836_v42, %v1180_v41 }
  0x40   : > { %7210 = vmatpush3.bf16.msra.mxu1 %v8282_v48  ;;  %v1268_v48 = vrot.slane %v6271_v36, 3 }
  0x41   : > { %7211 = vmatprep.subr.bf16.mxu1 %v8284_v44  ;;  %v1270_v44 = vrot.slane %v9071_v33, 3 }
  0x42   : > { %7184 = vmatpush3.bf16.msra.mxu0 %v8285_v49  ;;  %v1271_v49 = vrot.slane %v6272_v38, 3  ;;  %v8368_v38 = vld [vmem:[%s10224_s1 + $0x3c0] sm:$0xff]  }
  0x43   : > { %7185 = vmatprep.subr.bf16.mxu0 %v8287_v50  ;;  %v1267_v50 = vrot.slane %v9068_v32, 3 }
  0x44   : > { %7212 = vmatpush3.bf16.msra.mxu1 %v8286_v51  ;;  %v8341_v51 = vld [vmem:[%s10224_s1 + $0x338] sm:$0xff]  }
  0x45   : > { %7213 = vmatprep.subr.bf16.mxu1 %v8288_v52  ;;  %v1274_v52 = vrot.slane %v6273_v47, 3  ;;  %v1578_v47 = vld [vmem:[%s8808_s10 + $0x30] sm:$0xff] }
  0x46   : > { %7186 = vmatpush3.bf16.msra.mxu0 %v8289_v53  ;;  %v1276_v53 = vrot.slane %v9080_v45, 3 }
  0x47   : > { %7187 = vmatprep.subr.bf16.mxu0 %v8291_v54  ;;  %v1277_v54 = vrot.slane %v6274_v37, 3 }
  0x48   : > { %7214 = vmatpush3.bf16.msra.mxu1 %v8290_v55  ;;  %v1273_v55 = vrot.slane %v9077_v43, 3 }
  0x49   : > { %7215 = vmatprep.subr.bf16.mxu1 %v8292_v56  ;;  %v1272_v56 = vsel %vm1266_vm1, %v1270_v44, %v1271_v49  ;;  %v6372_v44 = vcombine.high %v8821_v35, %v1578_v47 }
  0x4a   : > { %7188 = vmatpush3.bf16.msra.mxu0 %v8293_v57  ;;  %v1269_v57 = vsel %vm1266_vm1, %v1267_v50, %v1268_v48 }
  0x4b   : > { %7229 = vmatprep.subr.bf16.mxu0 %v8295_v58  ;;  %v1278_v58 = vsel %vm1266_vm1, %v1276_v53, %v1277_v54 }
  0x4c   : > { %7216 = vmatpush3.bf16.msra.mxu1 %v8294_v59  ;;  %v1275_v59 = vsel %vm1266_vm1, %v1273_v55, %v1274_v52  ;;  %v1685_v55 = vshll.u32 %v6372_v44, 16 }
  0x4d   : > { %1114 = vmatmul.mubr.bf16.vlgmr.msra.gmra.mxu0 %v8832_v40  ;;  %7257 = vmatprep.subr.bf16.mxu1 %v8296_v60  ;;  %v8302_v40 = vld [vmem:[%s10224_s1 + $0x2b0] sm:$0xff]   ;;  %v8342_v60 = vld [vmem:[%s10224_s1 + $0x3b8] sm:$0xff]  }
  0x4e   : > { %7230 = vmatpush3.bf16.msra.mxu0 %v8297_v61  ;;  %1121 = vmatprep.mubr.bf16.mxu0 %v6168_v63  ;;  %v8343_v61 = vld [vmem:[%s10224_s1 + $0x370] sm:$0xff]  }
  0x4f   : > { %7231 = vmatprep.subr.bf16.mxu0 %v8299_v62  ;;  %1162 = vmatmul.mubr.bf16.vlgmr.msra.gmra.mxu1 %v8844_v46  ;;  %v8311_v46 = vld [vmem:[%s10224_s1 + $0x260] sm:$0xff]   ;;  %v8344_v62 = vld [vmem:[%s10224_s1 + $0x3f0] sm:$0xff]  }
  0x50   : > { %7258 = vmatpush3.bf16.msra.mxu1 %v8298_v0  ;;  %1169 = vmatprep.mubr.bf16.mxu1 %v6170_v2  ;;  %v8345_v63 = vld [vmem:[%s10224_s1 + $0x330] sm:$0xff]   ;;  %v8348_v2 = vld [vmem:[%s10224_s1 + $0x3e8] sm:$0xff]  }
  0x51   : > { %7259 = vmatprep.subr.bf16.mxu1 %v8300_v1  ;;  %v8346_v0 = vld [vmem:[%s10224_s1 + $0x3b0] sm:$0xff]   ;;  %v8347_v1 = vld [vmem:[%s10224_s1 + $0x368] sm:$0xff]  }
  0x52   : > { %7232 = vmatpush3.bf16.msra.mxu0 %v8301_v3  ;;  %v8349_v3 = vld [vmem:[%s10224_s1 + $0x328] sm:$0xff]  }
  0x53   : > { %7233 = vmatprep.subr.bf16.mxu0 %v8305_v4  ;;  %v8350_v4 = vld [vmem:[%s10224_s1 + $0x3a8] sm:$0xff]  }
  0x54   : > { %7260 = vmatpush3.bf16.msra.mxu1 %v8302_v40  ;;  %v8351_v40 = vld [vmem:[%s10224_s1 + $0x360] sm:$0xff]  }
  0x55   : > { %1122 = vmatmul.mubr.bf16.gmra.mxu0 %v6167_v5  ;;  %7261 = vmatprep.subr.bf16.mxu1 %v8306_v6  ;;  %v8352_v5 = vld [vmem:[%s10224_s1 + $0x3e0] sm:$0xff]  }
  0x56   : > { %7234 = vmatpush3.bf16.msra.mxu0 %v8308_v7  ;;  %1511 = vmatprep.mubr.bf16.mxu0 %v1272_v56  ;;  %v8353_v6 = vld [vmem:[%s10224_s1 + $0x320] sm:$0xff]   ;;  %v1674_v7 = vshrl.u32 %v9071_v33, 16 }
  0x57   : > { %7235 = vmatprep.subr.bf16.mxu0 %v8311_v46  ;;  %1170 = vmatmul.mubr.bf16.gmra.mxu1 %v6169_v9  ;;  %v8354_v46 = vld [vmem:[%s10224_s1 + $0x3a0] sm:$0xff]   ;;  %v8355_v9 = vld [vmem:[%s10224_s1 + $0x358] sm:$0xff]  }
  0x58   : > { %7262 = vmatpush3.bf16.msra.mxu1 %v8309_v8  ;;  %1559 = vmatprep.mubr.bf16.mxu1 %v1278_v58  ;;  %v1677_v8 = vshll.u32 %v9071_v33, 16  ;;  %v8367_v33 = vld [vmem:[%s10224_s1 + $0x340] sm:$0xff]  }
  0x59   : > { %7263 = vmatprep.subr.bf16.mxu1 %v8312_v10  ;;  %v1708_v10 = vshrl.u32 %v9080_v45, 16 }
  0x5a   : > { %7236 = vmatpush3.bf16.msra.mxu0 %v8313_v11  ;;  %v8356_v11 = vld [vmem:[%s10224_s1 + $0x3d8] sm:$0xff]  }
  0x5b   : > { %7237 = vmatprep.subr.bf16.mxu0 %v8315_v12  ;;  %v1711_v12 = vshll.u32 %v9080_v45, 16  ;;  %v8370_v45 = vld [vmem:[%s10224_s1 + $0x380] sm:$0xff]  }
  0x5c   : > { %7264 = vmatpush3.bf16.msra.mxu1 %v8314_v13  ;;  %v8357_v13 = vld [vmem:[%s10224_s1 + $0x318] sm:$0xff]  }
  0x5d   : > { %7265 = vmatprep.subr.bf16.mxu1 %v8316_v14  ;;  %v9153_v14 = vrot.slane %v1674_v7, 3 }
  0x5e   : > { %7238 = vmatpush3.bf16.msra.mxu0 %v8317_v15  ;;  %v8358_v15 = vld [vmem:[%s10224_s1 + $0x398] sm:$0xff]  }
  0x5f   : > { %7239 = vmatprep.subr.bf16.mxu0 %v8319_v16  ;;  %v9158_v16 = vrot.slane %v1677_v8, 4 }
  0x60   : > { %7266 = vmatpush3.bf16.msra.mxu1 %v8318_v17  ;;  %v8359_v17 = vld [vmem:[%s10224_s1 + $0x350] sm:$0xff]  }
  0x61   : > { %7267 = vmatprep.subr.bf16.mxu1 %v8320_v18  ;;  %v9163_v18 = vrot.slane %v1708_v10, 3  ;;  %v1680_v37 = vor.u32 %v9158_v16, %v9153_v14 }
  0x62   : > { %7240 = vmatpush3.bf16.msra.mxu0 %v8321_v19  ;;  %v8360_v19 = vld [vmem:[%s10224_s1 + $0x3d0] sm:$0xff]  }
  0x63   : > { %7241 = vmatprep.subr.bf16.mxu0 %v8323_v20  ;;  %v9168_v20 = vrot.slane %v1711_v12, 4  ;;  %v8375_v12 = vld [vmem:[%s10226_s3 + $0x38] sm:$0xff]  }
  0x64   : > { %7268 = vmatpush3.bf16.msra.mxu1 %v8322_v21  ;;  %v8361_v21 = vld [vmem:[%s10224_s1 + $0x310] sm:$0xff]  }
  0x65   : > { %7269 = vmatprep.subr.bf16.mxu1 %v8324_v22  ;;  %v1657_v22 = vshrl.u32 %v9068_v32, 16 }
  0x66   : > { %7242 = vmatpush3.bf16.msra.mxu0 %v8325_v23  ;;  %v8362_v23 = vld [vmem:[%s10224_s1 + $0x390] sm:$0xff]  }
  0x67   : > { %7243 = vmatprep.subr.bf16.mxu0 %v8327_v24  ;;  %v1660_v24 = vshll.u32 %v9068_v32, 16  ;;  %v1659_v30 = vrot.slane %v1657_v22, 3  ;;  %v8379_v22 = vld [vmem:[%s10226_s3 + $0x20] sm:$0xff]  }
  0x68   : > { %7270 = vmatpush3.bf16.msra.mxu1 %v8326_v25  ;;  %v8363_v25 = vld [vmem:[%s10224_s1 + $0x348] sm:$0xff]  }
  0x69   : > { %7271 = vmatprep.subr.bf16.mxu1 %v8328_v26  ;;  %v1691_v26 = vshrl.u32 %v9077_v43, 16  ;;  %v1662_v32 = vrot.slane %v1660_v24, 4  ;;  %v8381_v24 = vld [vmem:[%s10226_s3 + $0x18] sm:$0xff]  }
  0x6a   : > { %7244 = vmatpush3.bf16.msra.mxu0 %v8329_v27  ;;  %v8364_v27 = vld [vmem:[%s10224_s1 + $0x3c8] sm:$0xff]  }
  0x6b   : > { %7285 = vmatprep.subr.bf16.mxu0 %v8339_v34  ;;  %v1693_v36 = vrot.slane %v1691_v26, 3  ;;  %v1579_v34 = vld [vmem:[%s8808_s10 + $0x38] sm:$0xff]  ;;  %v1663_v53 = vor.u32 %v1662_v32, %v1659_v30 }
  0x6c   : > { %7272 = vmatpush3.bf16.msra.mxu1 %v8330_v28  ;;  %v1694_v28 = vshll.u32 %v9077_v43, 16  ;;  %v8369_v43 = vld [vmem:[%s10224_s1 + $0x300] sm:$0xff]   ;;  %v6374_v50 = vcombine.high %v8836_v42, %v1579_v34 }
  0x6d   : > { %1512 = vmatmul.mubr.bf16.vlgmr.msra.gmra.mxu0 %v1269_v57  ;;  %7313 = vmatprep.subr.bf16.mxu1 %v8340_v39  ;;  %v307_v39 = vld [vmem:[%s10230_s7] sm:$0xff] }
  0x6e   : > { %7286 = vmatpush3.bf16.msra.mxu0 %v8341_v51  ;;  %1519 = vmatprep.mubr.bf16.mxu0 %v1271_v49  ;;  %v1696_v41 = vrot.slane %v1694_v28, 4  ;;  %v6373_v49 = vcombine.low %v8836_v42, %v1579_v34  ;;  %v308_v51 = vld [vmem:[%s10230_s7 + $0x8] sm:$0xff]  ;;  %v1682_v42 = vshrl.u32 %v6372_v44, 16  ;;  %v1716_v56 = vshrl.u32 %v6374_v50, 16  ;;  %v8387_v44 = vld [vmem:[%s10226_s3] sm:$0xff]  }
  0x6f   : > { %1560 = vmatmul.mubr.bf16.vlgmr.msra.gmra.mxu1 %v1275_v59  ;;  %7287 = vmatprep.subr.bf16.mxu0 %v8343_v61  ;;  %v1719_v57 = vshll.u32 %v6374_v50, 16 }
  0x70   : > { %7314 = vmatpush3.bf16.msra.mxu1 %v8342_v60  ;;  %1567 = vmatprep.mubr.bf16.mxu1 %v1277_v54  ;;  %v1697_v54 = vor.u32 %v1696_v41, %v1693_v36  ;;  %v1699_v60 = vshrl.u32 %v6373_v49, 16  ;;  %v1702_v61 = vshll.u32 %v6373_v49, 16  ;;  %v8385_v36 = vld [vmem:[%s10226_s3 + $0x8] sm:$0xff]  }
  0x71   : > { %7315 = vmatprep.subr.bf16.mxu1 %v8344_v62  ;;  %2038 = vperm.xlu0 %8221, %v307_v39   ;;  %v1684_v62 = vrot.slane %v1682_v42, 3 }
  0x72   : > { %7288 = vmatpush3.bf16.msra.mxu0 %v8345_v63  ;;  %v1687_v63 = vrot.slane %v1685_v55, 4 }
  0x73   : > { %7289 = vmatprep.subr.bf16.mxu0 %v8347_v1  ;;  %v1721_v1 = vrot.slane %v1719_v57, 4 }
  0x74   : > { %7316 = vmatpush3.bf16.msra.mxu1 %v8346_v0  ;;  %v1718_v0 = vrot.slane %v1716_v56, 3 }
  0x75   : > { %1520 = vmatmul.mubr.bf16.gmra.mxu0 %v1268_v48  ;;  %7317 = vmatprep.subr.bf16.mxu1 %v8348_v2  ;;  %v6371_v48 = vcombine.low %v8821_v35, %v1578_v47  ;;  %v1714_v35 = vor.u32 %v9168_v20, %v9163_v18  ;;  %v319_v18 = vld [vmem:[#allocation2 + $0xc] sm:$0x8]  ;;  %v8386_v47 = vld [vmem:[%s10226_s3 + $0x58] sm:$0xff]  }
  0x76   : > { %7290 = vmatpush3.bf16.msra.mxu0 %v8349_v3  ;;  %2043 = vperm.xlu0 %8221, %v308_v51  }
  0x77   : > { %1568 = vmatmul.mubr.bf16.gmra.mxu1 %v1274_v52  ;;  %7291 = vmatprep.subr.bf16.mxu0 %v8351_v40  ;;  %v309_v52 = vld [vmem:[%s10230_s7 + $0x10] sm:$0xff]  ;;  %v1665_v58 = vshrl.u32 %v6371_v48, 16  ;;  %v1668_v59 = vshll.u32 %v6371_v48, 16  ;;  %v1704_v40 = vrot.slane %v1702_v61, 4  ;;  %v8394_v61 = vld [vmem:[%s10226_s3 + $0x40] sm:$0xff]  }
  0x78   : > { %7318 = vmatpush3.bf16.msra.mxu1 %v8350_v4  ;;  %2048 = vperm.xlu1 %8222, %v309_v52   ;;  %v1701_v4 = vrot.slane %v1699_v60, 3  ;;  %v8389_v52 = vld [vmem:[%s10226_s3 + $0x50] sm:$0xff]  }
  0x79   : > { %7319 = vmatprep.subr.bf16.mxu1 %v8352_v5  ;;  %v1667_v2 = vrot.slane %v1665_v58, 3  ;;  %v1670_v3 = vrot.slane %v1668_v59, 4  ;;  %v1688_v5 = vor.u32 %v1687_v63, %v1684_v62  ;;  %v8392_v59 = vld [vmem:[%s10226_s3 + $0x48] sm:$0xff]   ;;  %v9297_v62 = vld [vmem:[%s10226_s3 + $0xb8] sm:$0xff]  }
  0x7a   : > { %7292 = vmatpush3.bf16.msra.mxu0 %v8353_v6  ;;  %v1722_v6 = vor.u32 %v1721_v1, %v1718_v0 }
  0x7b   : > { %7293 = vmatprep.subr.bf16.mxu0 %v8355_v9  ;;  %v1671_v7 = vor.u32 %v1670_v3, %v1667_v2  ;;  %v1689_v8 = vsel %vm1655_vm2, %v1680_v37, %v1688_v5 }
  0x7c   : > { %7320 = vmatpush3.bf16.msra.mxu1 %v8354_v46  ;;  %v1705_v46 = vor.u32 %v1704_v40, %v1701_v4  ;;  %v1723_v9 = vsel %vm1655_vm2, %v1714_v35, %v1722_v6  ;;  %1956 = vmatprep.mubr.bf16.mxu0 %v1689_v8  ;;  %v9285_v35 = vld [vmem:[%s10226_s3 + $0xf8] sm:$0xff]  }
  0x7d   : > { %7321 = vmatprep.subr.bf16.mxu1 %v8356_v11  ;;  %2004 = vmatprep.mubr.bf16.mxu1 %v1723_v9  ;;  %v1672_v10 = vsel %vm1655_vm2, %v1663_v53, %v1671_v7 }
  0x7e   : > { %7294 = vmatpush3.bf16.msra.mxu0 %v8357_v13  ;;  %v1706_v11 = vsel %vm1655_vm2, %v1697_v54, %v1705_v46  ;;  %v8376_v13 = vld [vmem:[%s10226_s3 + $0x30] sm:$0xff]  }
  0x7f   : > { %7295 = vmatprep.subr.bf16.mxu0 %v8359_v17  ;;  %v8377_v17 = vld [vmem:[%s10226_s3 + $0x28] sm:$0xff]  }
  0x80   : > { %7322 = vmatpush3.bf16.msra.mxu1 %v8358_v15  ;;  %v313_v15 = vld [vmem:[#allocation2] sm:$0xf] }
  0x81   : > { %7323 = vmatprep.subr.bf16.mxu1 %v8360_v19  ;;  %v314_v16 = vsel %vm9234_vm5, 0, %v313_v15  ;;  %v8378_v19 = vld [vmem:[%s10226_s3 + $0x78] sm:$0xff]  }
  0x82   : > { %7296 = vmatpush3.bf16.msra.mxu0 %v8361_v21  ;;  %315 = vst [vmem:[#allocation2] sm:$0xf] %v314_v16  ;;  %v320_v21 = vsel %vm9246_vm8, 0, %v319_v18 }
  0x83   : > { %7297 = vmatprep.subr.bf16.mxu0 %v8363_v25  ;;  %321 = vst [vmem:[#allocation2 + $0xc] sm:$0x8] %v320_v21  ;;  %v8382_v25 = vld [vmem:[%s10226_s3 + $0x68] sm:$0xff]  }
  0x84   : > { %7324 = vmatpush3.bf16.msra.mxu1 %v8362_v23  ;;  %v8380_v23 = vld [vmem:[%s10226_s3 + $0x70] sm:$0xff]  }
  0x85   : > { %7325 = vmatprep.subr.bf16.mxu1 %v8364_v27  ;;  %v8383_v27 = vld [vmem:[%s10226_s3 + $0x10] sm:$0xff]  }
  0x86   : > { %7298 = vmatpush3.bf16.msra.mxu0 %v8365_v29 }
  0x87   : > { %7299 = vmatprep.subr.bf16.mxu0 %v8367_v33 }
  0x88   : > { %7326 = vmatpush3.bf16.msra.mxu1 %v8366_v31  ;;  %v8384_v31 = vld [vmem:[%s10226_s3 + $0x60] sm:$0xff]  }
  0x89   : > { %7327 = vmatprep.subr.bf16.mxu1 %v8368_v38 }
  0x8a   : > { %7300 = vmatpush3.bf16.msra.mxu0 %v8369_v43 }
  0x8b   : > { %7631 = vmatprep.subr.bf16.mxu0 %v8378_v19 }
  0x8c   : > { %7328 = vmatpush3.bf16.msra.mxu1 %v8370_v45 }
  0x8d   : > { %1957 = vmatmul.mubr.bf16.vlgmr.msra.gmra.mxu0 %v1672_v10  ;;  %7651 = vmatprep.subr.bf16.mxu1 %v8375_v12 }
  0x8e   : > { %1964 = vmatprep.mubr.bf16.mxu0 %v1688_v5  ;;  %7632 = vmatpush3.bf16.msra.mxu0 %v8378_v19 }
  0x8f   : > { %2005 = vmatmul.mubr.bf16.vlgmr.msra.gmra.mxu1 %v1706_v11  ;;  %7633 = vmatprep.subr.bf16.mxu0 %v8380_v23 }
  0x90   : > { %2012 = vmatprep.mubr.bf16.mxu1 %v1722_v6  ;;  %7652 = vmatpush3.bf16.msra.mxu1 %v8375_v12 }
  0x91   : > { %7653 = vmatprep.subr.bf16.mxu1 %v8376_v13 }
  0x92   : > { %7634 = vmatpush3.bf16.msra.mxu0 %v8380_v23 }
  0x93   : > { %7635 = vmatprep.subr.bf16.mxu0 %v8382_v25 }
  0x94   : > { %7654 = vmatpush3.bf16.msra.mxu1 %v8376_v13 }
  0x95   : > { %1965 = vmatmul.mubr.bf16.gmra.mxu0 %v1671_v7  ;;  %7655 = vmatprep.subr.bf16.mxu1 %v8377_v17 }
  0x96   : > { %7636 = vmatpush3.bf16.msra.mxu0 %v8382_v25 }
  0x97   : > { %2013 = vmatmul.mubr.bf16.gmra.mxu1 %v1705_v46  ;;  %7637 = vmatprep.subr.bf16.mxu0 %v8384_v31 }
  0x98   : > { %7656 = vmatpush3.bf16.msra.mxu1 %v8377_v17 }
  0x99   : > { %7657 = vmatprep.subr.bf16.mxu1 %v8379_v22 }
  0x9a   : > { %7638 = vmatpush3.bf16.msra.mxu0 %v8384_v31 }
  0x9b   : > { %7639 = vmatprep.subr.bf16.mxu0 %v8386_v47 }
  0x9c   : > { %7658 = vmatpush3.bf16.msra.mxu1 %v8379_v22 }
  0x9d   : > { %7659 = vmatprep.subr.bf16.mxu1 %v8381_v24 }
  0x9e   : > { %7640 = vmatpush3.bf16.msra.mxu0 %v8386_v47 }
  0x9f   : > { %7641 = vmatprep.subr.bf16.mxu0 %v8389_v52 }
  0xa0   : > { %7660 = vmatpush3.bf16.msra.mxu1 %v8381_v24 }
  0xa1   : > { %7661 = vmatprep.subr.bf16.mxu1 %v8383_v27 }
  0xa2   : > { %7642 = vmatpush3.bf16.msra.mxu0 %v8389_v52 }
  0xa3   : > { %7643 = vmatprep.subr.bf16.mxu0 %v8392_v59 }
  0xa4   : > { %7662 = vmatpush3.bf16.msra.mxu1 %v8383_v27 }
  0xa5   : > { %7663 = vmatprep.subr.bf16.mxu1 %v8385_v36 }
  0xa6   : > { %7644 = vmatpush3.bf16.msra.mxu0 %v8392_v59 }
  0xa7   : > { %7645 = vmatprep.subr.bf16.mxu0 %v8394_v61 }
  0xa8   : > { %7664 = vmatpush3.bf16.msra.mxu1 %v8385_v36 }
  0xa9   : > { %7665 = vmatprep.subr.bf16.mxu1 %v8387_v44 }
  0xaa   : > { %7646 = vmatpush3.bf16.msra.mxu0 %v8394_v61 }
  0xab   : > { %7671 = vmatprep.subr.bf16.mxu0 %v9297_v62 }
  0xac   : > { %7666 = vmatpush3.bf16.msra.mxu1 %v8387_v44 }
  0xad   : > { %7691 = vmatprep.subr.bf16.mxu1 %v9285_v35 }
  0xed   : > { %v7133_v26 = vpop.f32.mrf.mxu0 }
  0xee   : > { %v7161_v29 = vpop.f32.mrf.mxu1 }
  0xef   : > { %v7134_v28 = vpop.f32.mrf.mxu0 }
  0xf0   : > { %v7135_v30 = vadd.f32 %v7134_v28, %v7133_v26  ;;  %v7162_v33 = vpop.f32.mrf.mxu1 }
  0xf1   : > { %v7136_v32 = vpop.f32.mrf.mxu0  ;;  %v7163_v38 = vadd.f32 %v7162_v33, %v7161_v29 }
  0xf2   : > { %v7164_v43 = vpop.f32.mrf.mxu1 }
  0xf3   : > { %v7137_v41 = vpop.f32.mrf.mxu0  ;;  %v842_v37 = vadd.f32 %v7163_v38, %v7135_v30 }
  0xf4   : > { %v7138_v45 = vadd.f32 %v7137_v41, %v7136_v32  ;;  %v7165_v48 = vpop.f32.mrf.mxu1 }
  0xf5   : > { %v7139_v34 = vpop.f32.mrf.mxu0  ;;  %v7166_v49 = vadd.f32 %v7165_v48, %v7164_v43 }
  0xf7   : > { %v7140_v50 = vpop.f32.mrf.mxu0  ;;  %v7167_v39 = vpop.f32.mrf.mxu1  ;;  %v845_v53 = vadd.f32 %v7166_v49, %v7138_v45 }
  0xf8   : > { %v7141_v51 = vadd.f32 %v7140_v50, %v7139_v34 }
  0xf9   : > { %v7142_v54 = vpop.f32.mrf.mxu0  ;;  %v7168_v42 = vpop.f32.mrf.mxu1 }
  0xfa   : > { %v7169_v55 = vadd.f32 %v7168_v42, %v7167_v39 }
  0xfb   : > { %v7143_v56 = vpop.f32.mrf.mxu0  ;;  %v7170_v57 = vpop.f32.mrf.mxu1 }
  0xfc   : > { %v850_v58 = vadd.f32 %v7169_v55, %v7141_v51 }
  0xfd   : > { %v7171_v60 = vpop.f32.mrf.mxu1 }
 0x10d   : > { %v7189_v63 = vpop.f32.mrf.mxu0 }
 0x10f   : > { %v7190_v0 = vpop.f32.mrf.mxu0  ;;  %v7217_v1 = vpop.f32.mrf.mxu1 }
 0x110   : > { %v7191_v2 = vadd.f32 %v7190_v0, %v7189_v63 }
 0x111   : > { %v7192_v3 = vpop.f32.mrf.mxu0  ;;  %v7218_v40 = vpop.f32.mrf.mxu1 }
 0x112   : > { %v1116_v4 = vadd.f32 %v7191_v2, %v842_v37  ;;  %v7219_v5 = vadd.f32 %v7218_v40, %v7217_v1  ;;  %v6407_v1 = vld [vmem:[%s10225_s2] ss:$0 sm:$0xff] }
 0x113   : > { %v7193_v6 = vpop.f32.mrf.mxu0  ;;  %v7220_v7 = vpop.f32.mrf.mxu1 }
 0x114   : > { %v7194_v46 = vadd.f32 %v7193_v6, %v7192_v3  ;;  %v1164_v8 = vadd.f32 %v7219_v5, %v1116_v4  ;;  %v9303_v6 = vpop.permute.xlu0 %2038 }
 0x115   : > { %v7195_v9 = vpop.f32.mrf.mxu0  ;;  %v7221_v11 = vpop.f32.mrf.mxu1 }
 0x116   : > { %v1119_v10 = vadd.f32 %v7194_v46, %v845_v53  ;;  %v7222_v12 = vadd.f32 %v7221_v11, %v7220_v7 }
 0x117   : > { %v7196_v13 = vpop.f32.mrf.mxu0  ;;  %v7223_v16 = vpop.f32.mrf.mxu1 }
 0x118   : > { %v7197_v15 = vadd.f32 %v7196_v13, %v7195_v9  ;;  %v1167_v17 = vadd.f32 %v7222_v12, %v1119_v10 }
 0x119   : > { %v7198_v18 = vpop.f32.mrf.mxu0  ;;  %v7224_v21 = vpop.f32.mrf.mxu1 }
 0x11a   : > { %v1124_v19 = vadd.f32 %v7197_v15, %v850_v58  ;;  %v7225_v22 = vadd.f32 %v7224_v21, %v7223_v16 }
 0x11b   : > { %v7199_v23 = vpop.f32.mrf.mxu0  ;;  %v7226_v24 = vpop.f32.mrf.mxu1 }
 0x11c   : > { %v1172_v25 = vadd.f32 %v7225_v22, %v1124_v19 }
 0x11d   : > { %v7227_v26 = vpop.f32.mrf.mxu1 }
 0x12d   : > { %v7245_v27 = vpop.f32.mrf.mxu0 }
 0x12f   : > { %v7273_v28 = vpop.f32.mrf.mxu1  ;;  %v7246_v29 = vpop.f32.mrf.mxu0 }
 0x130   : > { %v7247_v44 = vadd.f32 %v7246_v29, %v7245_v27  ;;  %v9306_v27 = vpop.permute.xlu0 %2043 }
 0x131   : > { %v7274_v30 = vpop.f32.mrf.mxu1  ;;  %v7248_v31 = vpop.f32.mrf.mxu0 }
 0x132   : > { %v7275_v49 = vadd.f32 %v7274_v30, %v7273_v28 }
 0x133   : > { %v7276_v32 = vpop.f32.mrf.mxu1  ;;  %v7249_v33 = vpop.f32.mrf.mxu0 }
 0x134   : > { %v1562_v50 = vadd.f32 %v7275_v49, %v7247_v44  ;;  %v7250_v52 = vadd.f32 %v7249_v33, %v7248_v31 }
 0x135   : > { %v7277_v36 = vpop.f32.mrf.mxu1  ;;  %v7251_v38 = vpop.f32.mrf.mxu0 }
 0x136   : > { %v7278_v53 = vadd.f32 %v7277_v36, %v7276_v32  ;;  %v1575_v57 = vadd.f32 %v1562_v50, %v1164_v8 }
 0x137   : > { %v7279_v41 = vpop.f32.mrf.mxu1  ;;  %v7252_v43 = vpop.f32.mrf.mxu0 }
 0x138   : > { %v1565_v60 = vadd.f32 %v7278_v53, %v7250_v52  ;;  %v7253_v61 = vadd.f32 %v7252_v43, %v7251_v38  ;;  %v2099_v43 = vld [vmem:[#allocation2] sm:$0x8] }
 0x139   : > { %v7280_v45 = vpop.f32.mrf.mxu1  ;;  %v7254_v47 = vpop.f32.mrf.mxu0 }
 0x13a   : > { %v7281_v63 = vadd.f32 %v7280_v45, %v7279_v41  ;;  %v1576_v8 = vadd.f32 %v1565_v60, %v1167_v17 }
 0x13b   : > { %v7282_v37 = vpop.f32.mrf.mxu1  ;;  %v7255_v34 = vpop.f32.mrf.mxu0 }
 0x13c   : > { %v1570_v9 = vadd.f32 %v7281_v63, %v7253_v61  ;;  %v9309_v37 = vpop.permute.xlu1 %2048 }
 0x13d   : > { %v7283_v48 = vpop.f32.mrf.mxu1 }
 0x13e   : > { %v1577_v23 = vadd.f32 %v1570_v9, %v1172_v25  ;;  %v8393_v9 = vld [vmem:[%s10226_s3 + $0xf0] sm:$0xff]  }
 0x14d   : > { %v7301_v39 = vpop.f32.mrf.mxu0 }
 0x14f   : > { %v7329_v51 = vpop.f32.mrf.mxu1  ;;  %v7302_v54 = vpop.f32.mrf.mxu0 }
 0x150   : > { %v7303_v55 = vadd.f32 %v7302_v54, %v7301_v39 }
 0x151   : > { %v7330_v42 = vpop.f32.mrf.mxu1  ;;  %v7304_v58 = vpop.f32.mrf.mxu0 }
 0x152   : > { %v7331_v56 = vadd.f32 %v7330_v42, %v7329_v51 }
 0x153   : > { %v7332_v59 = vpop.f32.mrf.mxu1  ;;  %v7305_v2 = vpop.f32.mrf.mxu0 }
 0x154   : > { %v2007_v0 = vadd.f32 %v7331_v56, %v7303_v55  ;;  %v7306_v40 = vadd.f32 %v7305_v2, %v7304_v58 }
 0x155   : > { %v7333_v3 = vpop.f32.mrf.mxu1  ;;  %v7307_v7 = vpop.f32.mrf.mxu0 }
 0x156   : > { %v2020_v4 = vadd.f32 %v2007_v0, %v1575_v57  ;;  %v7334_v5 = vadd.f32 %v7333_v3, %v7332_v59 }
 0x157   : > { %v7335_v46 = vpop.f32.mrf.mxu1  ;;  %v7308_v12 = vpop.f32.mrf.mxu0 }
 0x158   : > { %v2030_v10 = vadd.f32 %v6407_v1, %v2020_v4  ;;  %v2010_v11 = vadd.f32 %v7334_v5, %v7306_v40  ;;  %v7309_v18 = vadd.f32 %v7308_v12, %v7307_v7 }
 0x159   : > { %v7336_v13 = vpop.f32.mrf.mxu1  ;;  %v7310_v21 = vpop.f32.mrf.mxu0 }
 0x15a   : > { %v2033_v15 = vmax.f32 %v2030_v10, 0.0  ;;  %v2021_v16 = vadd.f32 %v2010_v11, %v1576_v8  ;;  %v7337_v19 = vadd.f32 %v7336_v13, %v7335_v46 }
 0x15b   : > { %v7338_v22 = vpop.f32.mrf.mxu1  ;;  %v7311_v29 = vpop.f32.mrf.mxu0 }
 0x15c   : > { %v2015_v24 = vadd.f32 %v7337_v19, %v7309_v18  ;;  %v2051_v26 = vmul.f32 %v9303_v6, %v2033_v15  ;;  %v2031_v28 = vadd.f32 %v6407_v1, %v2021_v16  ;;  %v8395_v16 = vld [vmem:[%s10226_s3 + $0xe8] sm:$0xff]  }
 0x15d   : > { %v7339_v17 = vpop.f32.mrf.mxu1 }
 0x15e   : > { %v2022_v30 = vadd.f32 %v2015_v24, %v1577_v23  ;;  %v7108_v31 = vpack.c.bf16 %v2051_v26, %v2051_v26  ;;  %v2034_v32 = vmax.f32 %v2031_v28, 0.0 }
 0x160   : > { %v2067_v33 = vshll.u32 %v7108_v31, 16  ;;  %v2070_v36 = vshrl.u32 %v7108_v31, 16  ;;  %v2052_v38 = vmul.f32 %v9306_v27, %v2034_v32  ;;  %v2032_v41 = vadd.f32 %v6407_v1, %v2022_v30  ;;  %v2104_v1 = vld [vmem:[#allocation2 + $0xc] sm:$0xf]  ;;  %v8401_v32 = vld [vmem:[%s10226_s3 + $0xe0] sm:$0xff]  }
 0x162   : > { %v2069_v45 = vrot.slane %v2067_v33, 5  ;;  %v2072_v25 = vrot.slane %v2070_v36, 4  ;;  %v7109_v47 = vpack.c.bf16 %v2052_v38, %v2052_v38  ;;  %v2035_v34 = vmax.f32 %v2032_v41, 0.0  ;;  %v8402_v41 = vld [vmem:[%s10226_s3 + $0xb0] sm:$0xff]  }
 0x164   : > { %v2073_v48 = vor.u32 %v2072_v25, %v2069_v45  ;;  %v2100_v44 = vsel %vm9246_vm8, %v2069_v45, %v2099_v43  ;;  %v2076_v49 = vshll.u32 %v7109_v47, 16  ;;  %v2080_v50 = vshrl.u32 %v7109_v47, 16  ;;  %v8403_v45 = vld [vmem:[%s10226_s3 + $0xd8] sm:$0xff]   ;;  %v8404_v25 = vld [vmem:[%s10226_s3 + $0xa8] sm:$0xff]   ;;  %v8405_v47 = vld [vmem:[%s10226_s3 + $0xd0] sm:$0xff]  }
 0x165   : > { %2101 = vst [vmem:[#allocation2] sm:$0x8] %v2100_v44  ;;  %v2053_v51 = vmul.f32 %v9309_v37, %v2035_v34  ;;  %v8406_v34 = vld [vmem:[%s10226_s3 + $0xa0] sm:$0xff]  }
 0x166   : > { %v2074_v52 = vrot.slane %v2073_v48, 4  ;;  %v2078_v53 = vrot.slane %v2076_v49, 5  ;;  %v2082_v54 = vrot.slane %v2080_v50, 4  ;;  %v8408_v48 = vld [vmem:[%s10226_s3 + $0x98] sm:$0xff]   ;;  %v8409_v44 = vld [vmem:[%s10226_s3 + $0xc0] sm:$0xff]   ;;  %v8410_v50 = vld [vmem:[%s10226_s3 + $0x90] sm:$0xff]  }
 0x167   : > { %v7110_v42 = vpack.c.bf16 %v2053_v51, %v2053_v51  ;;  %v8411_v51 = vld [vmem:[%s10226_s3 + $0x178] sm:$0xff]  }
 0x168   : > { %v2079_v55 = vsel %vm9314_vm10, %v2074_v52, %v2078_v53  ;;  %v2083_v56 = vor.u32 %v2082_v54, %v2078_v53  ;;  %v8413_v53 = vld [vmem:[%s10226_s3 + $0x88] sm:$0xff]   ;;  %v8414_v54 = vld [vmem:[%s10226_s3 + $0x170] sm:$0xff]  }
 0x169   : > { %2102 = vst [vmem:[#allocation2 + $0x4] sm:$0xf] %v2079_v55  ;;  %v2086_v57 = vshll.u32 %v7110_v42, 16  ;;  %v2090_v58 = vshrl.u32 %v7110_v42, 16 }
 0x16a   : > { %v2084_v59 = vrot.slane %v2083_v56, 4 }
 0x16b   : > { %v2088_v60 = vrot.slane %v2086_v57, 5  ;;  %v2092_v61 = vrot.slane %v2090_v58, 4  ;;  %v8415_v57 = vld [vmem:[%s10226_s3 + $0x80] sm:$0xff]  }
 0x16c   : > { %v2107_v3 = vld [vmem:[#allocation2] sm:$0xf] }
 0x16d   : > { %v2089_v63 = vsel %vm9314_vm10, %v2084_v59, %v2088_v60  ;;  %v2093_v0 = vor.u32 %v2092_v61, %v2088_v60  ;;  %v9335_v10 = vld [vmem:[#allocation2] sm:$0x8]  ;;  %v8416_v60 = vld [vmem:[%s10226_s3 + $0x168] sm:$0xff]  }
 0x16e   : > { %2103 = vst [vmem:[#allocation2 + $0x8] sm:$0xf] %v2089_v63  ;;  %v2366_v22 = vld [vmem:[#allocation2] sm:$0xe] }
 0x16f   : > { %v2094_v2 = vrot.slane %v2093_v0, 4  ;;  %v8417_v0 = vld [vmem:[%s10226_s3 + $0x138] sm:$0xff]  }
 0x170   : > { %v9323_v4 = vld [vmem:[#allocation2 + $0x4] sm:$0xf] }
 0x171   : > { %v2105_v40 = vsel %vm9234_vm5, %v2094_v2, %v2104_v1  ;;  %v6427_v5 = vcombine.low %v2107_v3, %v9323_v4  ;;  %v9339_v11 = vcombine.low %v9335_v10, %v9323_v4  ;;  %v6462_v26 = vcombine.low %v2366_v22, %v9323_v4  ;;  %v8426_v22 = vld [vmem:[%s10226_s3 + $0x118] sm:$0xff]  }
 0x172   : > { %2106 = vst [vmem:[#allocation2 + $0xc] sm:$0xf] %v2105_v40 }
 0x173   : > { %7667 = vmatprep.mubr.bf16.mxu1 %v6427_v5  ;;  %v2157_v7 = vshll.u32 %v6427_v5, 16  ;;  %v2155_v21 = vshrl.u32 %v6427_v5, 16  ;;  %v2517_v23 = vrot.slane %v9339_v11, 3  ;;  %v2388_v38 = vrot.slane %v6462_v26, 1  ;;  %v8420_v5 = vld [vmem:[%s10226_s3 + $0x130] sm:$0xff]  }
 0x174   : > { %v2643_v58 = vshrl.u32 %v9339_v11, 16  ;;  %v2646_v59 = vshll.u32 %v9339_v11, 16  ;;  %v3016_v11 = vld [vmem:[#allocation2 + $0x10] sm:$0x7] }
 0x175   : > { %v9328_v46 = vld [vmem:[#allocation2 + $0x8] sm:$0xf]  ;;  %v2159_v15 = vrot.slane %v2157_v7, 1 }
 0x176   : > { %v6437_v8 = vcombine.low %v9328_v46, %v9328_v46  ;;  %v6538_v56 = vcombine.low %v9323_v4, %v9328_v46  ;;  %v2645_v1 = vrot.slane %v2643_v58, 3  ;;  %v2648_v2 = vrot.slane %v2646_v59, 4  ;;  %v8419_v4 = vld [vmem:[%s10226_s3 + $0x160] sm:$0xff]   ;;  %v8446_v58 = vld [vmem:[%s10226_s3 + $0x198] sm:$0xff]  }
 0x177   : > { %v2160_v28 = vor.u32 %v2159_v15, %v2155_v21  ;;  %v8424_v15 = vld [vmem:[%s10226_s3 + $0x120] sm:$0xff]  }
 0x178   : > { %7668 = vmatmul.mubr.bf16.vlgmr.msra.gmra.mxu1 %v6437_v8  ;;  %v2649_v40 = vor.u32 %v2648_v2, %v2645_v1  ;;  %v8422_v8 = vld [vmem:[%s10226_s3 + $0x128] sm:$0xff]   ;;  %v8447_v59 = vld [vmem:[%s10226_s3 + $0x1c0] sm:$0xff]   ;;  %v8451_v1 = vld [vmem:[%s10226_s3 + $0x238] sm:$0xff]  }
 0x179   : > { %7692 = vmatpush3.bf16.msra.mxu1 %v9285_v35  ;;  %v2493_v12 = vld [vmem:[#allocation2 + $0xc] sm:$0x7] }
 0x17a   : > { %v2126_v13 = vld [vmem:[#allocation2 + $0xc] sm:$0x1]  ;;  %7693 = vmatprep.subr.bf16.mxu1 %v8393_v9  ;;  %v6488_v18 = vcombine.low %v9328_v46, %v2493_v12  ;;  %v8423_v12 = vld [vmem:[%s10226_s3 + $0x150] sm:$0xff]  }
 0x17b   : > { %v9347_v19 = vcombine.low %v9328_v46, %v2126_v13  ;;  %v9387_v49 = vld [vmem:[#allocation2 + $0xc] sm:$0xf]  ;;  %v9437_v13 = vld [vmem:[#allocation2 + $0x8] sm:$0xf] }
 0x17c   : > { %v2518_v24 = vrot.slane %v6488_v18, 3  ;;  %v6513_v52 = vcombine.low %v9328_v46, %v9387_v49  ;;  %v8421_v46 = vld [vmem:[%s10226_s3 + $0x158] sm:$0xff]   ;;  %v2880_v18 = vld [vmem:[#allocation2 + $0x4] sm:$0xc] }
 0x17d   : > { %v2162_v35 = vshll.u32 %v9347_v19, 16  ;;  %7694 = vmatpush3.bf16.msra.mxu1 %v8393_v9  ;;  %v2166_v30 = vshrl.u32 %v9347_v19, 16  ;;  %v2389_v31 = vrot.slane %v9347_v19, 1  ;;  %v2882_v9 = vld [vmem:[#allocation2 + $0xc] sm:$0xf]  ;;  %v6564_v21 = vcombine.low %v2880_v18, %v9437_v13 }
 0x17e   : > { %7695 = vmatprep.subr.bf16.mxu1 %v8395_v16  ;;  %v2519_v29 = vsel %vm1266_vm1, %v2517_v23, %v2518_v24  ;;  %v2651_v42 = vshrl.u32 %v6513_v52, 16  ;;  %v2654_v55 = vshll.u32 %v6513_v52, 16  ;;  %v8425_v19 = vld [vmem:[%s10226_s3 + $0x148] sm:$0xff]   ;;  %v8440_v52 = vld [vmem:[%s10226_s3 + $0x1b0] sm:$0xff]  }
 0x17f   : > { %v2164_v17 = vrot.slane %v2162_v35, 1  ;;  %7707 = vmatprep.mubr.bf16.mxu1 %v2519_v29  ;;  %v2390_v43 = vsel %vm2387_vm11, %v2388_v38, %v2389_v31  ;;  %v8427_v35 = vld [vmem:[%s10226_s3 + $0x140] sm:$0xff]   ;;  %v3039_v26 = vshrl.u32 %v6564_v21, 16  ;;  %v8428_v29 = vld [vmem:[%s10226_s3 + $0x110] sm:$0xff]   ;;  %v8433_v38 = vld [vmem:[%s10226_s3 + $0x108] sm:$0xff]  }
 0x180   : > { %v2653_v61 = vrot.slane %v2651_v42, 3  ;;  %v2656_v63 = vrot.slane %v2654_v55, 4  ;;  %v8442_v42 = vld [vmem:[%s10226_s3 + $0x1a8] sm:$0xff]   ;;  %v8443_v55 = vld [vmem:[%s10226_s3 + $0x1d0] sm:$0xff]  }
 0x181   : > { %v2165_v33 = vsel %vm498_vm0, %v2160_v28, %v2164_v17  ;;  %v2168_v36 = vor.u32 %v2166_v30, %v2164_v17  ;;  %7696 = vmatpush3.bf16.msra.mxu1 %v8395_v16  ;;  %v9442_v16 = vcombine.low %v2882_v9, %v3016_v11  ;;  %v3042_v28 = vshll.u32 %v6564_v21, 16  ;;  %v8458_v11 = vld [vmem:[%s10226_s3 + $0x208] sm:$0xff]  }
 0x182   : > { %7647 = vmatprep.mubr.bf16.mxu0 %v2165_v33  ;;  %7697 = vmatprep.subr.bf16.mxu1 %v8401_v32  ;;  %v9416_v3 = vor.u32 %v2656_v63, %v2653_v61  ;;  %v8449_v61 = vld [vmem:[%s10226_s3 + $0x188] sm:$0xff]   ;;  %v8450_v63 = vld [vmem:[%s10226_s3 + $0x180] sm:$0xff]  }
 0x183   : > { %7648 = vmatmul.mubr.bf16.vlgmr.msra.gmra.mxu0 %v2168_v36  ;;  %v3047_v23 = vshrl.u32 %v9442_v16, 16  ;;  %v3044_v33 = vrot.slane %v3042_v28, 3  ;;  %v8460_v28 = vld [vmem:[%s10228_s5 + $0x38] sm:$0xff]  }
 0x184   : > { %7672 = vmatpush3.bf16.msra.mxu0 %v9297_v62  ;;  %7687 = vmatprep.mubr.bf16.mxu0 %v2390_v43  ;;  %v8407_v62 = vld [vmem:[%s10226_s3 + $0xc8] sm:$0xff]   ;;  %v2658_v7 = vsel %vm1655_vm2, %v2649_v40, %v9416_v3  ;;  %v8453_v40 = vld [vmem:[%s10226_s3 + $0x230] sm:$0xff]  }
 0x185   : > { %7673 = vmatprep.subr.bf16.mxu0 %v8402_v41  ;;  %7698 = vmatpush3.bf16.msra.mxu1 %v8401_v32  ;;  %v3049_v17 = vrot.slane %v3047_v23, 2  ;;  %v3041_v32 = vrot.slane %v3039_v26, 2 }
 0x186   : > { %7699 = vmatprep.subr.bf16.mxu1 %v8403_v45 }
 0x187   : > { %v3045_v43 = vor.u32 %v3044_v33, %v3041_v32  ;;  %v8465_v32 = vld [vmem:[%s10228_s5 + $0x20] sm:$0xff]  }
 0x188   : > { %7674 = vmatpush3.bf16.msra.mxu0 %v8402_v41  ;;  %v6539_v41 = vcombine.low %v9387_v49, %v9387_v49 }
 0x189   : > { %7675 = vmatprep.subr.bf16.mxu0 %v8404_v25  ;;  %7700 = vmatpush3.bf16.msra.mxu1 %v8403_v45  ;;  %v8434_v45 = vld [vmem:[%s10226_s3 + $0x1f0] sm:$0xff]  }
 0x18a   : > { %7701 = vmatprep.subr.bf16.mxu1 %v8405_v47 }
 0x18c   : > { %7676 = vmatpush3.bf16.msra.mxu0 %v8404_v25  ;;  %v2883_v25 = vld [vmem:[#allocation2 + $0x10] sm:$0x3] }
 0x18d   : > { %7677 = vmatprep.subr.bf16.mxu0 %v8406_v34  ;;  %7702 = vmatpush3.bf16.msra.mxu1 %v8405_v47 }
 0x18e   : > { %7703 = vmatprep.subr.bf16.mxu1 %v8407_v62 }
 0x190   : > { %7678 = vmatpush3.bf16.msra.mxu0 %v8406_v34  ;;  %v8435_v34 = vld [vmem:[%s10226_s3 + $0x100] sm:$0xff]  }
 0x191   : > { %7679 = vmatprep.subr.bf16.mxu0 %v8408_v48  ;;  %7704 = vmatpush3.bf16.msra.mxu1 %v8407_v62  ;;  %v8436_v62 = vld [vmem:[%s10226_s3 + $0x1e8] sm:$0xff]  }
 0x192   : > { %7705 = vmatprep.subr.bf16.mxu1 %v8409_v44 }
 0x194   : > { %7680 = vmatpush3.bf16.msra.mxu0 %v8408_v48  ;;  %v6565_v48 = vcombine.low %v2882_v9, %v2883_v25  ;;  %v8457_v9 = vld [vmem:[%s10226_s3 + $0x210] sm:$0xff]  }
 0x195   : > { %7681 = vmatprep.subr.bf16.mxu0 %v8410_v50  ;;  %7706 = vmatpush3.bf16.msra.mxu1 %v8409_v44  ;;  %v8437_v44 = vld [vmem:[%s10226_s3 + $0x1b8] sm:$0xff]   ;;  %v8469_v25 = vld [vmem:[%s10228_s5 + $0x10] sm:$0xff]  }
 0x196   : > { %7731 = vmatprep.subr.bf16.mxu1 %v8411_v51  ;;  %v2913_v49 = vrot.slane %v6565_v48, 2 }
 0x198   : > { %7682 = vmatpush3.bf16.msra.mxu0 %v8410_v50  ;;  %7708 = vmatmul.mubr.bf16.vlgmr.msra.gmra.mxu1 %v2518_v24  ;;  %v3050_v24 = vshll.u32 %v9442_v16, 16  ;;  %v8439_v50 = vld [vmem:[%s10226_s3 + $0x1e0] sm:$0xff]  }
 0x199   : > { %7683 = vmatprep.subr.bf16.mxu0 %v8413_v53  ;;  %7732 = vmatpush3.bf16.msra.mxu1 %v8411_v51  ;;  %v2912_v51 = vrot.slane %v6564_v21, 2 }
 0x19a   : > { %7747 = vmatprep.mubr.bf16.mxu1 %v6538_v56  ;;  %7733 = vmatprep.subr.bf16.mxu1 %v8414_v54  ;;  %v3052_v30 = vrot.slane %v3050_v24, 3  ;;  %v8444_v56 = vld [vmem:[%s10226_s3 + $0x1a0] sm:$0xff]  }
 0x19c   : > { %7684 = vmatpush3.bf16.msra.mxu0 %v8413_v53  ;;  %v9462_v36 = vor.u32 %v3052_v30, %v3049_v17  ;;  %v2914_v53 = vsel %vm2911_vm13, %v2912_v51, %v2913_v49  ;;  %v8462_v17 = vld [vmem:[%s10228_s5 + $0x78] sm:$0xff]   ;;  %v8463_v30 = vld [vmem:[%s10228_s5 + $0x28] sm:$0xff]  }
 0x19d   : > { %7685 = vmatprep.subr.bf16.mxu0 %v8415_v57  ;;  %7734 = vmatpush3.bf16.msra.mxu1 %v8414_v54  ;;  %v8441_v54 = vld [vmem:[%s10226_s3 + $0x1d8] sm:$0xff]  }
 0x19e   : > { %7735 = vmatprep.subr.bf16.mxu1 %v8416_v60  ;;  %v3054_v47 = vsel %vm3037_vm12, %v3045_v43, %v9462_v36 }
 0x1a0   : > { %7686 = vmatpush3.bf16.msra.mxu0 %v8415_v57  ;;  %v8445_v57 = vld [vmem:[%s10226_s3 + $0x1c8] sm:$0xff]  }
 0x1a1   : > { %7711 = vmatprep.subr.bf16.mxu0 %v8417_v0  ;;  %7736 = vmatpush3.bf16.msra.mxu1 %v8416_v60  ;;  %v8448_v60 = vld [vmem:[%s10226_s3 + $0x190] sm:$0xff]  }
 0x1a2   : > { %7737 = vmatprep.subr.bf16.mxu1 %v8419_v4 }
 0x1a3   : > { %7688 = vmatmul.mubr.bf16.vlgmr.msra.gmra.mxu0 %v2389_v31  ;;  %v8430_v31 = vld [vmem:[%s10226_s3 + $0x1f8] sm:$0xff]  }
 0x1a4   : > { %7712 = vmatpush3.bf16.msra.mxu0 %v8417_v0  ;;  %7727 = vmatprep.mubr.bf16.mxu0 %v2658_v7  ;;  %v3156_v0 = vld [vmem:[#allocation2 + $0x4] sm:$0x8]  ;;  %v8454_v7 = vld [vmem:[%s10226_s3 + $0x228] sm:$0xff]  }
 0x1a5   : > { %7713 = vmatprep.subr.bf16.mxu0 %v8420_v5  ;;  %7738 = vmatpush3.bf16.msra.mxu1 %v8419_v4  ;;  %v6615_v2 = vcombine.low %v3156_v0, %v9437_v13 }
 0x1a6   : > { %7739 = vmatprep.subr.bf16.mxu1 %v8421_v46 }
 0x1a7   : > { %v3177_v4 = vrot.slane %v6615_v2, 3 }
 0x1a8   : > { %7714 = vmatpush3.bf16.msra.mxu0 %v8420_v5 }
 0x1a9   : > { %7715 = vmatprep.subr.bf16.mxu0 %v8422_v8  ;;  %7740 = vmatpush3.bf16.msra.mxu1 %v8421_v46  ;;  %v8455_v46 = vld [vmem:[%s10226_s3 + $0x220] sm:$0xff]  }
 0x1aa   : > { %7741 = vmatprep.subr.bf16.mxu1 %v8423_v12 }
 0x1ac   : > { %7716 = vmatpush3.bf16.msra.mxu0 %v8422_v8  ;;  %v8456_v8 = vld [vmem:[%s10226_s3 + $0x218] sm:$0xff]  }
 0x1ad   : > { %7717 = vmatprep.subr.bf16.mxu0 %v8424_v15  ;;  %7742 = vmatpush3.bf16.msra.mxu1 %v8423_v12  ;;  %v8459_v12 = vld [vmem:[%s10226_s3 + $0x200] sm:$0xff]  }
 0x1ae   : > { %7743 = vmatprep.subr.bf16.mxu1 %v8425_v19 }
 0x1b0   : > { %7718 = vmatpush3.bf16.msra.mxu0 %v8424_v15 }
 0x1b1   : > { %7719 = vmatprep.subr.bf16.mxu0 %v8426_v22  ;;  %7744 = vmatpush3.bf16.msra.mxu1 %v8425_v19 }
 0x1b2   : > { %7745 = vmatprep.subr.bf16.mxu1 %v8427_v35 }
 0x1b4   : > { %7720 = vmatpush3.bf16.msra.mxu0 %v8426_v22 }
 0x1b5   : > { %7721 = vmatprep.subr.bf16.mxu0 %v8428_v29  ;;  %7746 = vmatpush3.bf16.msra.mxu1 %v8427_v35 }
 0x1b6   : > { %7771 = vmatprep.subr.bf16.mxu1 %v8430_v31 }
 0x1b8   : > { %7722 = vmatpush3.bf16.msra.mxu0 %v8428_v29  ;;  %7748 = vmatmul.mubr.bf16.vlgmr.msra.gmra.mxu1 %v6539_v41  ;;  %v8461_v29 = vld [vmem:[%s10228_s5 + $0x30] sm:$0xff]   ;;  %v8467_v41 = vld [vmem:[%s10228_s5 + $0x18] sm:$0xff]  }
 0x1b9   : > { %7723 = vmatprep.subr.bf16.mxu0 %v8433_v38  ;;  %7772 = vmatpush3.bf16.msra.mxu1 %v8430_v31  ;;  %v8464_v31 = vld [vmem:[%s10228_s5 + $0x70] sm:$0xff]  }
 0x1ba   : > { %7787 = vmatprep.mubr.bf16.mxu1 %v3054_v47  ;;  %7773 = vmatprep.subr.bf16.mxu1 %v8434_v45  ;;  %v8470_v47 = vld [vmem:[%s10228_s5 + $0x58] sm:$0xff]  }
 0x1bc   : > { %7724 = vmatpush3.bf16.msra.mxu0 %v8433_v38 }
 0x1bd   : > { %7725 = vmatprep.subr.bf16.mxu0 %v8435_v34  ;;  %7774 = vmatpush3.bf16.msra.mxu1 %v8434_v45  ;;  %v8468_v45 = vld [vmem:[%s10228_s5 + $0x60] sm:$0xff]  }
 0x1be   : > { %7775 = vmatprep.subr.bf16.mxu1 %v8436_v62 }
 0x1c0   : > { %7726 = vmatpush3.bf16.msra.mxu0 %v8435_v34  ;;  %v8471_v34 = vld [vmem:[%s10228_s5 + $0x8] sm:$0xff]  }
 0x1c1   : > { %7751 = vmatprep.subr.bf16.mxu0 %v8437_v44  ;;  %7776 = vmatpush3.bf16.msra.mxu1 %v8436_v62  ;;  %v8472_v62 = vld [vmem:[%s10228_s5 + $0x50] sm:$0xff]  }
 0x1c2   : > { %7777 = vmatprep.subr.bf16.mxu1 %v8439_v50 }
 0x1c3   : > { %7728 = vmatmul.mubr.bf16.vlgmr.msra.gmra.mxu0 %v9416_v3  ;;  %v3178_v3 = vrot.slane %v9442_v16, 3 }
 0x1c4   : > { %7752 = vmatpush3.bf16.msra.mxu0 %v8437_v44  ;;  %7767 = vmatprep.mubr.bf16.mxu0 %v2914_v53  ;;  %v8475_v53 = vld [vmem:[%s10228_s5 + $0x48] sm:$0xff]  }
 0x1c5   : > { %7753 = vmatprep.subr.bf16.mxu0 %v8440_v52  ;;  %7778 = vmatpush3.bf16.msra.mxu1 %v8439_v50  ;;  %v3179_v5 = vsel %vm1266_vm1, %v3177_v4, %v3178_v3 }
 0x1c6   : > { %7779 = vmatprep.subr.bf16.mxu1 %v8441_v54 }
 0x1c8   : > { %7754 = vmatpush3.bf16.msra.mxu0 %v8440_v52 }
 0x1c9   : > { %7755 = vmatprep.subr.bf16.mxu0 %v8442_v42  ;;  %7780 = vmatpush3.bf16.msra.mxu1 %v8441_v54 }
 0x1ca   : > { %7781 = vmatprep.subr.bf16.mxu1 %v8443_v55 }
 0x1cc   : > { %7756 = vmatpush3.bf16.msra.mxu0 %v8442_v42 }
 0x1cd   : > { %7757 = vmatprep.subr.bf16.mxu0 %v8444_v56  ;;  %7782 = vmatpush3.bf16.msra.mxu1 %v8443_v55  ;;  %v9597_v55 = vld [vmem:[%s10228_s5 + $0xf8] sm:$0xff]  }
 0x1ce   : > { %7783 = vmatprep.subr.bf16.mxu1 %v8445_v57 }
 0x1d0   : > { %7758 = vmatpush3.bf16.msra.mxu0 %v8444_v56 }
 0x1d1   : > { %7759 = vmatprep.subr.bf16.mxu0 %v8446_v58  ;;  %7784 = vmatpush3.bf16.msra.mxu1 %v8445_v57 }
 0x1d2   : > { %7785 = vmatprep.subr.bf16.mxu1 %v8447_v59 }
 0x1d4   : > { %7760 = vmatpush3.bf16.msra.mxu0 %v8446_v58  ;;  %v8478_v58 = vld [vmem:[%s10228_s5 + $0x40] sm:$0xff]  }
 0x1d5   : > { %7761 = vmatprep.subr.bf16.mxu0 %v8448_v60  ;;  %7786 = vmatpush3.bf16.msra.mxu1 %v8447_v59 }
 0x1d6   : > { %7811 = vmatprep.subr.bf16.mxu1 %v8462_v17 }
 0x1d8   : > { %7762 = vmatpush3.bf16.msra.mxu0 %v8448_v60  ;;  %7788 = vmatmul.mubr.bf16.vlgmr.msra.gmra.mxu1 %v9462_v36  ;;  %v8466_v36 = vld [vmem:[%s10228_s5 + $0x68] sm:$0xff]  }
 0x1d9   : > { %7763 = vmatprep.subr.bf16.mxu0 %v8449_v61  ;;  %7812 = vmatpush3.bf16.msra.mxu1 %v8462_v17 }
 0x1da   : > { %7813 = vmatprep.subr.bf16.mxu1 %v8464_v31 }
 0x1dc   : > { %7764 = vmatpush3.bf16.msra.mxu0 %v8449_v61  ;;  %v9606_v61 = vld [vmem:[%s10228_s5 + $0xb8] sm:$0xff]  }
 0x1dd   : > { %7765 = vmatprep.subr.bf16.mxu0 %v8450_v63  ;;  %7814 = vmatpush3.bf16.msra.mxu1 %v8464_v31 }
 0x1de   : > { %7815 = vmatprep.subr.bf16.mxu1 %v8466_v36 }
 0x1e0   : > { %7766 = vmatpush3.bf16.msra.mxu0 %v8450_v63 }
 0x1e1   : > { %7791 = vmatprep.subr.bf16.mxu0 %v8451_v1  ;;  %7816 = vmatpush3.bf16.msra.mxu1 %v8466_v36 }
 0x1e2   : > { %7817 = vmatprep.subr.bf16.mxu1 %v8468_v45 }
 0x1e3   : > { %7768 = vmatmul.mubr.bf16.vlgmr.msra.gmra.mxu0 %v2913_v49  ;;  %v8473_v49 = vld [vmem:[%s10228_s5] sm:$0xff]  }
 0x1e4   : > { %7792 = vmatpush3.bf16.msra.mxu0 %v8451_v1  ;;  %7807 = vmatprep.mubr.bf16.mxu0 %v3179_v5 }
 0x1e5   : > { %7793 = vmatprep.subr.bf16.mxu0 %v8453_v40  ;;  %7818 = vmatpush3.bf16.msra.mxu1 %v8468_v45 }
 0x1e6   : > { %7819 = vmatprep.subr.bf16.mxu1 %v8470_v47 }
 0x1e8   : > { %7794 = vmatpush3.bf16.msra.mxu0 %v8453_v40 }
 0x1e9   : > { %7795 = vmatprep.subr.bf16.mxu0 %v8454_v7  ;;  %7820 = vmatpush3.bf16.msra.mxu1 %v8470_v47 }
 0x1ea   : > { %7821 = vmatprep.subr.bf16.mxu1 %v8472_v62 }
 0x1ec   : > { %7796 = vmatpush3.bf16.msra.mxu0 %v8454_v7 }
 0x1ed   : > { %7797 = vmatprep.subr.bf16.mxu0 %v8455_v46  ;;  %7822 = vmatpush3.bf16.msra.mxu1 %v8472_v62 }
 0x1ee   : > { %7823 = vmatprep.subr.bf16.mxu1 %v8475_v53 }
 0x1f0   : > { %7798 = vmatpush3.bf16.msra.mxu0 %v8455_v46 }
 0x1f1   : > { %7799 = vmatprep.subr.bf16.mxu0 %v8456_v8  ;;  %7824 = vmatpush3.bf16.msra.mxu1 %v8475_v53 }
 0x1f2   : > { %7825 = vmatprep.subr.bf16.mxu1 %v8478_v58 }
 0x1f4   : > { %7800 = vmatpush3.bf16.msra.mxu0 %v8456_v8 }
 0x1f5   : > { %7801 = vmatprep.subr.bf16.mxu0 %v8457_v9  ;;  %7826 = vmatpush3.bf16.msra.mxu1 %v8478_v58 }
 0x1f6   : > { %7851 = vmatprep.subr.bf16.mxu1 %v9606_v61 }
 0x1f8   : > { %7802 = vmatpush3.bf16.msra.mxu0 %v8457_v9 }
 0x1f9   : > { %7803 = vmatprep.subr.bf16.mxu0 %v8458_v11 }
 0x1fc   : > { %7804 = vmatpush3.bf16.msra.mxu0 %v8458_v11 }
 0x1fd   : > { %7805 = vmatprep.subr.bf16.mxu0 %v8459_v12 }
 0x200   : > { %7806 = vmatpush3.bf16.msra.mxu0 %v8459_v12 }
 0x201   : > { %7831 = vmatprep.subr.bf16.mxu0 %v8460_v28 }
 0x203   : > { %7808 = vmatmul.mubr.bf16.vlgmr.msra.gmra.mxu0 %v3178_v3 }
 0x204   : > { %7832 = vmatpush3.bf16.msra.mxu0 %v8460_v28  ;;  %v6624_v28 = vld [vmem:[%s10227_s4] ss:$0 sm:$0xff] }
 0x205   : > { %7833 = vmatprep.subr.bf16.mxu0 %v8461_v29 }
 0x208   : > { %7834 = vmatpush3.bf16.msra.mxu0 %v8461_v29 }
 0x209   : > { %7835 = vmatprep.subr.bf16.mxu0 %v8463_v30 }
 0x20c   : > { %7836 = vmatpush3.bf16.msra.mxu0 %v8463_v30 }
 0x20d   : > { %7837 = vmatprep.subr.bf16.mxu0 %v8465_v32 }
 0x210   : > { %7838 = vmatpush3.bf16.msra.mxu0 %v8465_v32 }
 0x211   : > { %7839 = vmatprep.subr.bf16.mxu0 %v8467_v41 }
 0x214   : > { %7840 = vmatpush3.bf16.msra.mxu0 %v8467_v41 }
 0x215   : > { %7841 = vmatprep.subr.bf16.mxu0 %v8469_v25 }
 0x218   : > { %7842 = vmatpush3.bf16.msra.mxu0 %v8469_v25 }
 0x219   : > { %7843 = vmatprep.subr.bf16.mxu0 %v8471_v34 }
 0x21c   : > { %7844 = vmatpush3.bf16.msra.mxu0 %v8471_v34 }
 0x21d   : > { %7845 = vmatprep.subr.bf16.mxu0 %v8473_v49 }
 0x220   : > { %7846 = vmatpush3.bf16.msra.mxu0 %v8473_v49 }
 0x221   : > { %7871 = vmatprep.subr.bf16.mxu0 %v9597_v55 }
 0x238   : > { %v7669_v13 = vpop.f32.mrf.mxu1 }
 0x23a   : > { %v2352_v15 = vpop.f32.mrf.mxu1 }
 0x23c   : > { %v7670_v16 = vpop.f32.mrf.mxu1 }
 0x23e   : > { %v2355_v24 = vpop.f32.mrf.mxu1 }
 0x243   : > { %v7649_v18 = vpop.f32.mrf.mxu0 }
 0x244   : > { %v2361_v19 = vadd.f32 %v7669_v13, %v7649_v18 }
 0x245   : > { %v2253_v21 = vpop.f32.mrf.mxu0 }
 0x246   : > { %v2353_v22 = vadd.f32 %v2352_v15, %v2253_v21 }
 0x247   : > { %v7650_v23 = vpop.f32.mrf.mxu0 }
 0x249   : > { %v2256_v35 = vpop.f32.mrf.mxu0 }
 0x24a   : > { %v2356_v26 = vadd.f32 %v2355_v24, %v2256_v35 }
 0x258   : > { %v7709_v33 = vpop.f32.mrf.mxu1 }
 0x25a   : > { %v2604_v38 = vpop.f32.mrf.mxu1 }
 0x25c   : > { %v7710_v43 = vpop.f32.mrf.mxu1 }
 0x25e   : > { %v2607_v59 = vpop.f32.mrf.mxu1 }
 0x263   : > { %v7689_v48 = vpop.f32.mrf.mxu0 }
 0x264   : > { %v2491_v44 = vadd.f32 %v7689_v48, %v2361_v19 }
 0x265   : > { %v2475_v50 = vpop.f32.mrf.mxu0 }
 0x266   : > { %v2489_v51 = vadd.f32 %v2475_v50, %v2353_v22  ;;  %v2620_v52 = vadd.f32 %v7709_v33, %v2491_v44 }
 0x267   : > { %v7690_v54 = vpop.f32.mrf.mxu0 }
 0x268   : > { %v2618_v42 = vadd.f32 %v2604_v38, %v2489_v51 }
 0x269   : > { %v2478_v56 = vpop.f32.mrf.mxu0 }
 0x26a   : > { %v2490_v57 = vadd.f32 %v2478_v56, %v2356_v26 }
 0x26c   : > { %v2619_v60 = vadd.f32 %v2607_v59, %v2490_v57 }
 0x278   : > { %v7749_v63 = vpop.f32.mrf.mxu1 }
 0x27a   : > { %v2863_v0 = vpop.f32.mrf.mxu1 }
 0x27c   : > { %v7750_v1 = vpop.f32.mrf.mxu1 }
 0x27e   : > { %v2866_v8 = vpop.f32.mrf.mxu1 }
 0x283   : > { %v7729_v2 = vpop.f32.mrf.mxu0 }
 0x284   : > { %v2759_v3 = vadd.f32 %v7729_v2, %v2620_v52 }
 0x285   : > { %v2743_v4 = vpop.f32.mrf.mxu0 }
 0x286   : > { %v2757_v40 = vadd.f32 %v2743_v4, %v2618_v42  ;;  %v2879_v5 = vadd.f32 %v7749_v63, %v2759_v3  ;;  %v3344_v4 = vld [vmem:[#allocation2 + $0xc] sm:$0xf] }
 0x287   : > { %v7730_v7 = vpop.f32.mrf.mxu0 }
 0x288   : > { %v2877_v46 = vadd.f32 %v2863_v0, %v2757_v40 }
 0x289   : > { %v2746_v13 = vpop.f32.mrf.mxu0 }
 0x28a   : > { %v2758_v19 = vadd.f32 %v2746_v13, %v2619_v60 }
 0x28c   : > { %v2878_v24 = vadd.f32 %v2866_v8, %v2758_v19 }
 0x298   : > { %v7789_v9 = vpop.f32.mrf.mxu1 }
 0x29a   : > { %v3139_v11 = vpop.f32.mrf.mxu1 }
 0x29c   : > { %v7790_v12 = vpop.f32.mrf.mxu1 }
 0x29e   : > { %v3142_v36 = vpop.f32.mrf.mxu1 }
 0x2a3   : > { %v7769_v15 = vpop.f32.mrf.mxu0 }
 0x2a4   : > { %v3015_v21 = vadd.f32 %v7769_v15, %v2879_v5 }
 0x2a5   : > { %v2999_v16 = vpop.f32.mrf.mxu0 }
 0x2a6   : > { %v3013_v22 = vadd.f32 %v2999_v16, %v2877_v46  ;;  %v3155_v35 = vadd.f32 %v7789_v9, %v3015_v21 }
 0x2a7   : > { %v7770_v18 = vpop.f32.mrf.mxu0 }
 0x2a8   : > { %v3153_v30 = vadd.f32 %v3139_v11, %v3013_v22 }
 0x2a9   : > { %v3002_v23 = vpop.f32.mrf.mxu0 }
 0x2aa   : > { %v3014_v29 = vadd.f32 %v3002_v23, %v2878_v24 }
 0x2ac   : > { %v3154_v45 = vadd.f32 %v3142_v36, %v3014_v29 }
 0x2c3   : > { %v7809_v26 = vpop.f32.mrf.mxu0 }
 0x2c4   : > { %v3280_v17 = vadd.f32 %v7809_v26, %v3155_v35 }
 0x2c5   : > { %v3264_v31 = vpop.f32.mrf.mxu0 }
 0x2c6   : > { %v3290_v32 = vadd.f32 %v6624_v28, %v3280_v17  ;;  %v3278_v33 = vadd.f32 %v3264_v31, %v3153_v30 }
 0x2c7   : > { %v7810_v38 = vpop.f32.mrf.mxu0 }
 0x2c8   : > { %v9613_v41 = vmul.f32 %v3290_v32, %v9309_v37  ;;  %v3288_v43 = vadd.f32 %v6624_v28, %v3278_v33 }
 0x2c9   : > { %v3267_v25 = vpop.f32.mrf.mxu0 }
 0x2ca   : > { %v3296_v47 = vmax.f32 %v9613_v41, 0.0  ;;  %v9617_v34 = vmul.f32 %v3288_v43, %v9303_v6  ;;  %v3279_v62 = vadd.f32 %v3267_v25, %v3154_v45 }
 0x2cc   : > { %v7113_v48 = vpack.c.bf16 %v3296_v47, %v3296_v47  ;;  %v3294_v44 = vmax.f32 %v9617_v34, 0.0  ;;  %v3289_v49 = vadd.f32 %v6624_v28, %v3279_v62  ;;  %v8479_v28 = vld [vmem:[%s10228_s5 + $0xf0] sm:$0xff]  }
 0x2ce   : > { %v3327_v50 = vshll.u32 %v7113_v48, 16  ;;  %v3331_v51 = vshrl.u32 %v7113_v48, 16  ;;  %v7111_v52 = vpack.c.bf16 %v3294_v44, %v3294_v44  ;;  %v9621_v53 = vmul.f32 %v3289_v49, %v9306_v27  ;;  %v8485_v44 = vld [vmem:[%s10228_s5 + $0xe8] sm:$0xff]  }
 0x2d0   : > { %v3329_v54 = vrot.slane %v3327_v50, 5  ;;  %v3333_v42 = vrot.slane %v3331_v51, 4  ;;  %v3308_v56 = vshll.u32 %v7111_v52, 16  ;;  %v3311_v57 = vshrl.u32 %v7111_v52, 16 }
 0x2d1   : > { %v3295_v58 = vmax.f32 %v9621_v53, 0.0 }
 0x2d2   : > { %v3334_v59 = vor.u32 %v3333_v42, %v3329_v54  ;;  %v3310_v60 = vrot.slane %v3308_v56, 5  ;;  %v3313_v63 = vrot.slane %v3311_v57, 4  ;;  %v8488_v42 = vld [vmem:[%s10228_s5 + $0xa8] sm:$0xff]   ;;  %v8489_v56 = vld [vmem:[%s10228_s5 + $0xd8] sm:$0xff]   ;;  %v8490_v57 = vld [vmem:[%s10228_s5 + $0xa0] sm:$0xff]  }
 0x2d3   : > { %v7112_v0 = vpack.c.bf16 %v3295_v58, %v3295_v58  ;;  %v8492_v58 = vld [vmem:[%s10228_s5 + $0x98] sm:$0xff]  }
 0x2d4   : > { %v3335_v1 = vrot.slane %v3334_v59, 4  ;;  %v3314_v2 = vor.u32 %v3313_v63, %v3310_v60  ;;  %v3340_v3 = vsel %vm9246_vm8, %v3310_v60, %v9335_v10  ;;  %v8493_v59 = vld [vmem:[%s10228_s5 + $0xc8] sm:$0xff]   ;;  %v8494_v60 = vld [vmem:[%s10228_s5 + $0x90] sm:$0xff]  }
 0x2d5   : > { %3341 = vst [vmem:[#allocation2] sm:$0x8] %v3340_v3  ;;  %v3317_v40 = vshll.u32 %v7112_v0, 16  ;;  %v3321_v5 = vshrl.u32 %v7112_v0, 16  ;;  %v8495_v0 = vld [vmem:[%s10228_s5 + $0xc0] sm:$0xff]   ;;  %v8497_v3 = vld [vmem:[%s10228_s5 + $0x178] sm:$0xff]  }
 0x2d6   : > { %v3345_v7 = vsel %vm9234_vm5, %v3335_v1, %v3344_v4  ;;  %v3315_v46 = vrot.slane %v3314_v2, 4  ;;  %v8496_v2 = vld [vmem:[%s10228_s5 + $0x88] sm:$0xff]  }
 0x2d7   : > { %3346 = vst [vmem:[#allocation2 + $0xc] sm:$0xf] %v3345_v7  ;;  %v3319_v8 = vrot.slane %v3317_v40, 5  ;;  %v3323_v9 = vrot.slane %v3321_v5, 4  ;;  %v8499_v5 = vld [vmem:[%s10228_s5 + $0x80] sm:$0xff]  }
 0x2d9   : > { %v3320_v11 = vsel %vm9314_vm10, %v3315_v46, %v3319_v8  ;;  %v3324_v12 = vor.u32 %v3323_v9, %v3319_v8  ;;  %v8500_v8 = vld [vmem:[%s10228_s5 + $0x170] sm:$0xff]  }
 0x2da   : > { %3342 = vst [vmem:[#allocation2 + $0x4] sm:$0xf] %v3320_v11 }
 0x2db   : > { %v3325_v13 = vrot.slane %v3324_v12, 4 }
 0x2dc   : > { %v3347_v15 = vld [vmem:[#allocation2] sm:$0xf] }
 0x2dd   : > { %v3330_v10 = vsel %vm9314_vm10, %v3325_v13, %v3329_v54  ;;  %v9636_v19 = vld [vmem:[#allocation2] sm:$0x8]  ;;  %v8501_v13 = vld [vmem:[%s10228_s5 + $0x138] sm:$0xff]  }
 0x2de   : > { %3343 = vst [vmem:[#allocation2 + $0x8] sm:$0xf] %v3330_v10  ;;  %v3732_v24 = vld [vmem:[#allocation2 + $0xc] sm:$0x7]  ;;  %v3606_v32 = vld [vmem:[#allocation2] sm:$0xe] }
 0x2df   : > { %v3366_v35 = vld [vmem:[#allocation2 + $0xc] sm:$0x1]  ;;  %v8487_v54 = vld [vmem:[%s10228_s5 + $0xe0] sm:$0xff]  }
 0x2e0   : > { %v9698_v63 = vld [vmem:[#allocation2 + $0xc] sm:$0xf] }
 0x2e1   : > { %v9633_v16 = vld [vmem:[#allocation2 + $0x4] sm:$0xf] }
 0x2e2   : > { %v6644_v18 = vcombine.low %v3347_v15, %v9633_v16  ;;  %v9640_v22 = vcombine.low %v9636_v19, %v9633_v16  ;;  %v6679_v43 = vcombine.low %v3606_v32, %v9633_v16  ;;  %v4254_v32 = vld [vmem:[#allocation2 + $0x10] sm:$0x7] }
 0x2e4   : > { %v3397_v21 = vshll.u32 %v6644_v18, 16  ;;  %7847 = vmatprep.mubr.bf16.mxu0 %v6644_v18  ;;  %v3395_v31 = vshrl.u32 %v6644_v18, 16  ;;  %v3756_v33 = vrot.slane %v9640_v22, 3  ;;  %v3627_v51 = vrot.slane %v6679_v43, 1 }
 0x2e5   : > { %v9642_v23 = vld [vmem:[#allocation2 + $0x8] sm:$0xf]  ;;  %v3882_v7 = vshrl.u32 %v9640_v22, 16  ;;  %v3885_v46 = vshll.u32 %v9640_v22, 16  ;;  %v8504_v22 = vld [vmem:[%s10228_s5 + $0x130] sm:$0xff]  }
 0x2e6   : > { %v6654_v26 = vcombine.low %v9642_v23, %v9642_v23  ;;  %v6705_v29 = vcombine.low %v9642_v23, %v3732_v24  ;;  %v9651_v17 = vcombine.low %v9642_v23, %v3366_v35  ;;  %v3399_v30 = vrot.slane %v3397_v21, 1  ;;  %v8503_v21 = vld [vmem:[%s10228_s5 + $0x168] sm:$0xff]   ;;  %v8505_v24 = vld [vmem:[%s10228_s5 + $0x160] sm:$0xff]  }
 0x2e7   : > { %v6730_v1 = vcombine.low %v9642_v23, %v9698_v63  ;;  %v6755_v12 = vcombine.low %v9633_v16, %v9642_v23  ;;  %v3884_v10 = vrot.slane %v3882_v7, 3  ;;  %v3887_v15 = vrot.slane %v3885_v46, 4  ;;  %v8506_v35 = vld [vmem:[%s10228_s5 + $0x128] sm:$0xff]   ;;  %v8527_v46 = vld [vmem:[%s10228_s5 + $0x1d8] sm:$0xff]  }
 0x2e8   : > { %7848 = vmatmul.mubr.bf16.vlgmr.msra.gmra.mxu0 %v6654_v26  ;;  %v9654_v36 = vrot.slane %v6705_v29, 3  ;;  %v3402_v38 = vshll.u32 %v9651_v17, 16  ;;  %v3400_v45 = vor.u32 %v3399_v30, %v3395_v31  ;;  %v3406_v62 = vshrl.u32 %v9651_v17, 16  ;;  %v8507_v26 = vld [vmem:[%s10228_s5 + $0x158] sm:$0xff]   ;;  %v9749_v29 = vld [vmem:[#allocation2 + $0x8] sm:$0xf] }
 0x2e9   : > { %7872 = vmatpush3.bf16.msra.mxu0 %v9597_v55  ;;  %v3628_v48 = vrot.slane %v9651_v17, 1  ;;  %v8486_v55 = vld [vmem:[%s10228_s5 + $0xb0] sm:$0xff]   ;;  %v3890_v4 = vshrl.u32 %v6730_v1, 16  ;;  %v3893_v40 = vshll.u32 %v6730_v1, 16  ;;  %v3888_v16 = vor.u32 %v3887_v15, %v3884_v10  ;;  %v4119_v30 = vld [vmem:[#allocation2 + $0x4] sm:$0xc] }
 0x2ea   : > { %7873 = vmatprep.subr.bf16.mxu0 %v8479_v28  ;;  %v3758_v25 = vsel %vm1266_vm1, %v3756_v33, %v9654_v36  ;;  %v3404_v47 = vrot.slane %v3402_v38, 1  ;;  %v8509_v17 = vld [vmem:[%s10228_s5 + $0x150] sm:$0xff]   ;;  %v4121_v31 = vld [vmem:[#allocation2 + $0xc] sm:$0xf]  ;;  %v8510_v33 = vld [vmem:[%s10228_s5 + $0x118] sm:$0xff]  }
 0x2eb   : > { %7887 = vmatprep.mubr.bf16.mxu0 %v3758_v25  ;;  %v3629_v52 = vsel %vm2387_vm11, %v3627_v51, %v3628_v48  ;;  %v3892_v9 = vrot.slane %v3890_v4, 3  ;;  %v3895_v11 = vrot.slane %v3893_v40, 4  ;;  %v8511_v38 = vld [vmem:[%s10228_s5 + $0x148] sm:$0xff]   ;;  %v9761_v43 = vcombine.low %v4121_v31, %v4254_v32  ;;  %v8524_v4 = vld [vmem:[%s10228_s5 + $0x1b0] sm:$0xff]   ;;  %v8533_v10 = vld [vmem:[%s10228_s5 + $0x1c0] sm:$0xff]  }
 0x2ec   : > { %v3405_v49 = vsel %vm498_vm0, %v3400_v45, %v3404_v47  ;;  %v3408_v50 = vor.u32 %v3406_v62, %v3404_v47  ;;  %v8512_v45 = vld [vmem:[%s10228_s5 + $0x110] sm:$0xff]   ;;  %v8513_v62 = vld [vmem:[%s10228_s5 + $0x140] sm:$0xff]   ;;  %v8526_v7 = vld [vmem:[%s10228_s5 + $0x1a8] sm:$0xff]  }
 0x2ed   : > { %7874 = vmatpush3.bf16.msra.mxu0 %v8479_v28  ;;  %7827 = vmatprep.mubr.bf16.mxu1 %v3405_v49  ;;  %v9725_v18 = vor.u32 %v3895_v11, %v3892_v9  ;;  %v8508_v28 = vld [vmem:[%s10228_s5 + $0x120] sm:$0xff]   ;;  %v8514_v49 = vld [vmem:[%s10228_s5 + $0x108] sm:$0xff]   ;;  %v8529_v9 = vld [vmem:[%s10228_s5 + $0x1d0] sm:$0xff]  }
 0x2ee   : > { %7828 = vmatmul.mubr.bf16.vlgmr.msra.gmra.mxu1 %v3408_v50  ;;  %7875 = vmatprep.subr.bf16.mxu0 %v8485_v44  ;;  %v8530_v11 = vld [vmem:[%s10228_s5 + $0x198] sm:$0xff]   ;;  %v8534_v15 = vld [vmem:[%s10228_s5 + $0x188] sm:$0xff]   ;;  %v8544_v32 = vld [vmem:[%s10228_s5 + $0x200] sm:$0xff]  }
 0x2ef   : > { %7852 = vmatpush3.bf16.msra.mxu1 %v9606_v61  ;;  %7867 = vmatprep.mubr.bf16.mxu1 %v3629_v52  ;;  %v8491_v61 = vld [vmem:[%s10228_s5 + $0xd0] sm:$0xff]   ;;  %v3897_v23 = vsel %vm1655_vm2, %v3888_v16, %v9725_v18 }
 0x2f0   : > { %7853 = vmatprep.subr.bf16.mxu1 %v8486_v55 }
 0x2f1   : > { %7876 = vmatpush3.bf16.msra.mxu0 %v8485_v44  ;;  %v4287_v44 = vshll.u32 %v9761_v43, 16 }
 0x2f2   : > { %7877 = vmatprep.subr.bf16.mxu0 %v8487_v54 }
 0x2f3   : > { %7854 = vmatpush3.bf16.msra.mxu1 %v8486_v55  ;;  %v8516_v55 = vld [vmem:[%s10228_s5 + $0x1f8] sm:$0xff]  }
 0x2f4   : > { %7855 = vmatprep.subr.bf16.mxu1 %v8488_v42 }
 0x2f5   : > { %7878 = vmatpush3.bf16.msra.mxu0 %v8487_v54  ;;  %v4289_v54 = vrot.slane %v4287_v44, 3 }
 0x2f6   : > { %7879 = vmatprep.subr.bf16.mxu0 %v8489_v56 }
 0x2f7   : > { %7856 = vmatpush3.bf16.msra.mxu1 %v8488_v42 }
 0x2f8   : > { %7857 = vmatprep.subr.bf16.mxu1 %v8490_v57 }
 0x2f9   : > { %7880 = vmatpush3.bf16.msra.mxu0 %v8489_v56  ;;  %v8519_v56 = vld [vmem:[%s10228_s5 + $0x100] sm:$0xff]  }
 0x2fa   : > { %7881 = vmatprep.subr.bf16.mxu0 %v8491_v61 }
 0x2fb   : > { %7858 = vmatpush3.bf16.msra.mxu1 %v8490_v57  ;;  %v4122_v57 = vld [vmem:[#allocation2 + $0x10] sm:$0x3] }
 0x2fc   : > { %7859 = vmatprep.subr.bf16.mxu1 %v8492_v58  ;;  %v6782_v1 = vcombine.low %v4121_v31, %v4122_v57  ;;  %v8543_v31 = vld [vmem:[%s10228_s5 + $0x208] sm:$0xff]   ;;  %v8552_v57 = vld [vmem:[%s10229_s6] sm:$0xff]  }
 0x2fd   : > { %7882 = vmatpush3.bf16.msra.mxu0 %v8491_v61  ;;  %v6756_v61 = vcombine.low %v9698_v63, %v9698_v63 }
 0x2fe   : > { %7883 = vmatprep.subr.bf16.mxu0 %v8493_v59 }
 0x2ff   : > { %7860 = vmatpush3.bf16.msra.mxu1 %v8492_v58 }
 0x300   : > { %7861 = vmatprep.subr.bf16.mxu1 %v8494_v60 }
 0x301   : > { %7884 = vmatpush3.bf16.msra.mxu0 %v8493_v59  ;;  %v8520_v59 = vld [vmem:[%s10228_s5 + $0x1f0] sm:$0xff]  }
 0x302   : > { %7885 = vmatprep.subr.bf16.mxu0 %v8495_v0 }
 0x303   : > { %7862 = vmatpush3.bf16.msra.mxu1 %v8494_v60 }
 0x304   : > { %7863 = vmatprep.subr.bf16.mxu1 %v8496_v2 }
 0x305   : > { %7886 = vmatpush3.bf16.msra.mxu0 %v8495_v0  ;;  %v8521_v0 = vld [vmem:[%s10228_s5 + $0x1b8] sm:$0xff]  }
 0x306   : > { %7911 = vmatprep.subr.bf16.mxu0 %v8497_v3 }
 0x307   : > { %7864 = vmatpush3.bf16.msra.mxu1 %v8496_v2  ;;  %v8523_v2 = vld [vmem:[%s10228_s5 + $0x1e8] sm:$0xff]  }
 0x308   : > { %7888 = vmatmul.mubr.bf16.vlgmr.msra.gmra.mxu0 %v9654_v36  ;;  %7865 = vmatprep.subr.bf16.mxu1 %v8499_v5  ;;  %v6781_v36 = vcombine.low %v4119_v30, %v9749_v29  ;;  %v8542_v30 = vld [vmem:[%s10228_s5 + $0x210] sm:$0xff]  }
 0x309   : > { %7912 = vmatpush3.bf16.msra.mxu0 %v8497_v3  ;;  %7927 = vmatprep.mubr.bf16.mxu0 %v6755_v12  ;;  %v4151_v3 = vrot.slane %v6782_v1, 2  ;;  %v8531_v12 = vld [vmem:[%s10228_s5 + $0x1c8] sm:$0xff]  }
 0x30a   : > { %7913 = vmatprep.subr.bf16.mxu0 %v8500_v8  ;;  %v4276_v25 = vshrl.u32 %v6781_v36, 16  ;;  %v4279_v47 = vshll.u32 %v6781_v36, 16  ;;  %v4150_v63 = vrot.slane %v6781_v36, 2  ;;  %v8546_v36 = vld [vmem:[%s10229_s6 + $0x30] sm:$0xff]  }
 0x30b   : > { %7866 = vmatpush3.bf16.msra.mxu1 %v8499_v5  ;;  %v8525_v5 = vld [vmem:[%s10228_s5 + $0x1e0] sm:$0xff]  }
 0x30c   : > { %7891 = vmatprep.subr.bf16.mxu1 %v8501_v13  ;;  %v4278_v50 = vrot.slane %v4276_v25, 2  ;;  %v4281_v51 = vrot.slane %v4279_v47, 3  ;;  %v4152_v40 = vsel %vm2911_vm13, %v4150_v63, %v4151_v3 }
 0x30d   : > { %7914 = vmatpush3.bf16.msra.mxu0 %v8500_v8  ;;  %v8528_v8 = vld [vmem:[%s10228_s5 + $0x1a0] sm:$0xff]  }
 0x30e   : > { %7868 = vmatmul.mubr.bf16.vlgmr.msra.gmra.mxu1 %v3628_v48  ;;  %7915 = vmatprep.subr.bf16.mxu0 %v8503_v21  ;;  %v4284_v48 = vshrl.u32 %v9761_v43, 16  ;;  %v4282_v42 = vor.u32 %v4281_v51, %v4278_v50 }
 0x30f   : > { %7892 = vmatpush3.bf16.msra.mxu1 %v8501_v13  ;;  %7907 = vmatprep.mubr.bf16.mxu1 %v3897_v23  ;;  %v8532_v13 = vld [vmem:[%s10228_s5 + $0x190] sm:$0xff]  }
 0x310   : > { %7893 = vmatprep.subr.bf16.mxu1 %v8504_v22  ;;  %v4286_v52 = vrot.slane %v4284_v48, 2 }
 0x311   : > { %7916 = vmatpush3.bf16.msra.mxu0 %v8503_v21  ;;  %v4393_v21 = vld [vmem:[#allocation2 + $0x4] sm:$0x8] }
 0x312   : > { %7917 = vmatprep.subr.bf16.mxu0 %v8505_v24  ;;  %v4290_v58 = vor.u32 %v4289_v54, %v4286_v52  ;;  %v6832_v16 = vcombine.low %v4393_v21, %v9749_v29  ;;  %v8540_v29 = vld [vmem:[%s10228_s5 + $0x220] sm:$0xff]  }
 0x313   : > { %7894 = vmatpush3.bf16.msra.mxu1 %v8504_v22  ;;  %v8536_v22 = vld [vmem:[%s10228_s5 + $0x238] sm:$0xff]  }
 0x314   : > { %7895 = vmatprep.subr.bf16.mxu1 %v8506_v35  ;;  %v4291_v60 = vsel %vm3037_vm12, %v4282_v42, %v4290_v58  ;;  %v4414_v23 = vrot.slane %v6832_v16, 3 }
 0x315   : > { %7918 = vmatpush3.bf16.msra.mxu0 %v8505_v24  ;;  %v4415_v24 = vrot.slane %v9761_v43, 3  ;;  %v8548_v43 = vld [vmem:[%s10229_s6 + $0x20] sm:$0xff]  }
 0x316   : > { %7919 = vmatprep.subr.bf16.mxu0 %v8507_v26 }
 0x317   : > { %7896 = vmatpush3.bf16.msra.mxu1 %v8506_v35  ;;  %v8538_v35 = vld [vmem:[%s10228_s5 + $0x230] sm:$0xff]  }
 0x318   : > { %7897 = vmatprep.subr.bf16.mxu1 %v8508_v28 }
 0x319   : > { %7920 = vmatpush3.bf16.msra.mxu0 %v8507_v26  ;;  %v4416_v26 = vsel %vm1266_vm1, %v4414_v23, %v4415_v24 }
 0x31a   : > { %7921 = vmatprep.subr.bf16.mxu0 %v8509_v17 }
 0x31b   : > { %7898 = vmatpush3.bf16.msra.mxu1 %v8508_v28  ;;  %v8539_v28 = vld [vmem:[%s10228_s5 + $0x228] sm:$0xff]  }
 0x31c   : > { %7899 = vmatprep.subr.bf16.mxu1 %v8510_v33 }
 0x31d   : > { %7922 = vmatpush3.bf16.msra.mxu0 %v8509_v17  ;;  %v8541_v17 = vld [vmem:[%s10228_s5 + $0x218] sm:$0xff]  }
 0x31e   : > { %7923 = vmatprep.subr.bf16.mxu0 %v8511_v38 }
 0x31f   : > { %7900 = vmatpush3.bf16.msra.mxu1 %v8510_v33  ;;  %v8545_v33 = vld [vmem:[%s10229_s6 + $0x38] sm:$0xff]  }
 0x320   : > { %7901 = vmatprep.subr.bf16.mxu1 %v8512_v45 }
 0x321   : > { %7924 = vmatpush3.bf16.msra.mxu0 %v8511_v38  ;;  %v8547_v38 = vld [vmem:[%s10229_s6 + $0x28] sm:$0xff]  }
 0x322   : > { %7925 = vmatprep.subr.bf16.mxu0 %v8513_v62 }
 0x323   : > { %7902 = vmatpush3.bf16.msra.mxu1 %v8512_v45  ;;  %v8549_v45 = vld [vmem:[%s10229_s6 + $0x18] sm:$0xff]  }
 0x324   : > { %7903 = vmatprep.subr.bf16.mxu1 %v8514_v49 }
 0x325   : > { %7926 = vmatpush3.bf16.msra.mxu0 %v8513_v62 }
 0x326   : > { %7951 = vmatprep.subr.bf16.mxu0 %v8516_v55 }
 0x327   : > { %7904 = vmatpush3.bf16.msra.mxu1 %v8514_v49 }
 0x328   : > { %7928 = vmatmul.mubr.bf16.vlgmr.msra.gmra.mxu0 %v6756_v61  ;;  %7905 = vmatprep.subr.bf16.mxu1 %v8519_v56 }
 0x329   : > { %7952 = vmatpush3.bf16.msra.mxu0 %v8516_v55  ;;  %7967 = vmatprep.mubr.bf16.mxu0 %v4291_v60  ;;  %v8550_v55 = vld [vmem:[%s10229_s6 + $0x10] sm:$0xff]  }
 0x32a   : > { %7953 = vmatprep.subr.bf16.mxu0 %v8520_v59 }
 0x32b   : > { %7906 = vmatpush3.bf16.msra.mxu1 %v8519_v56  ;;  %v8551_v56 = vld [vmem:[%s10229_s6 + $0x8] sm:$0xff]  }
 0x32c   : > { %7931 = vmatprep.subr.bf16.mxu1 %v8521_v0 }
 0x32d   : > { %7954 = vmatpush3.bf16.msra.mxu0 %v8520_v59 }
 0x32e   : > { %7908 = vmatmul.mubr.bf16.vlgmr.msra.gmra.mxu1 %v9725_v18  ;;  %7955 = vmatprep.subr.bf16.mxu0 %v8523_v2  ;;  %v8535_v18 = vld [vmem:[%s10228_s5 + $0x180] sm:$0xff]  }
 0x32f   : > { %7932 = vmatpush3.bf16.msra.mxu1 %v8521_v0  ;;  %7947 = vmatprep.mubr.bf16.mxu1 %v4152_v40 }
 0x330   : > { %7933 = vmatprep.subr.bf16.mxu1 %v8524_v4 }
 0x331   : > { %7956 = vmatpush3.bf16.msra.mxu0 %v8523_v2 }
 0x332   : > { %7957 = vmatprep.subr.bf16.mxu0 %v8525_v5 }
 0x333   : > { %7934 = vmatpush3.bf16.msra.mxu1 %v8524_v4 }
 0x334   : > { %7935 = vmatprep.subr.bf16.mxu1 %v8526_v7 }
 0x335   : > { %7958 = vmatpush3.bf16.msra.mxu0 %v8525_v5 }
 0x336   : > { %7959 = vmatprep.subr.bf16.mxu0 %v8527_v46 }
 0x337   : > { %7936 = vmatpush3.bf16.msra.mxu1 %v8526_v7 }
 0x338   : > { %7937 = vmatprep.subr.bf16.mxu1 %v8528_v8 }
 0x339   : > { %7960 = vmatpush3.bf16.msra.mxu0 %v8527_v46 }
 0x33a   : > { %7961 = vmatprep.subr.bf16.mxu0 %v8529_v9 }
 0x33b   : > { %7938 = vmatpush3.bf16.msra.mxu1 %v8528_v8 }
 0x33c   : > { %7939 = vmatprep.subr.bf16.mxu1 %v8530_v11 }
 0x33d   : > { %7962 = vmatpush3.bf16.msra.mxu0 %v8529_v9 }
 0x33e   : > { %7963 = vmatprep.subr.bf16.mxu0 %v8531_v12 }
 0x33f   : > { %7940 = vmatpush3.bf16.msra.mxu1 %v8530_v11 }
 0x340   : > { %7941 = vmatprep.subr.bf16.mxu1 %v8532_v13 }
 0x341   : > { %7964 = vmatpush3.bf16.msra.mxu0 %v8531_v12 }
 0x342   : > { %7965 = vmatprep.subr.bf16.mxu0 %v8533_v10 }
 0x343   : > { %7942 = vmatpush3.bf16.msra.mxu1 %v8532_v13 }
 0x344   : > { %7943 = vmatprep.subr.bf16.mxu1 %v8534_v15 }
 0x345   : > { %7966 = vmatpush3.bf16.msra.mxu0 %v8533_v10 }
 0x346   : > { %7991 = vmatprep.subr.bf16.mxu0 %v8545_v33 }
 0x347   : > { %7944 = vmatpush3.bf16.msra.mxu1 %v8534_v15 }
 0x348   : > { %7968 = vmatmul.mubr.bf16.vlgmr.msra.gmra.mxu0 %v4290_v58  ;;  %7945 = vmatprep.subr.bf16.mxu1 %v8535_v18 }
 0x349   : > { %7992 = vmatpush3.bf16.msra.mxu0 %v8545_v33 }
 0x34a   : > { %7993 = vmatprep.subr.bf16.mxu0 %v8546_v36 }
 0x34b   : > { %7946 = vmatpush3.bf16.msra.mxu1 %v8535_v18 }
 0x34c   : > { %7971 = vmatprep.subr.bf16.mxu1 %v8536_v22 }
 0x34d   : > { %7994 = vmatpush3.bf16.msra.mxu0 %v8546_v36 }
 0x34e   : > { %7948 = vmatmul.mubr.bf16.vlgmr.msra.gmra.mxu1 %v4151_v3  ;;  %7995 = vmatprep.subr.bf16.mxu0 %v8547_v38 }
 0x34f   : > { %7972 = vmatpush3.bf16.msra.mxu1 %v8536_v22  ;;  %7987 = vmatprep.mubr.bf16.mxu1 %v4416_v26 }
 0x350   : > { %7973 = vmatprep.subr.bf16.mxu1 %v8538_v35 }
 0x351   : > { %7996 = vmatpush3.bf16.msra.mxu0 %v8547_v38 }
 0x352   : > { %7997 = vmatprep.subr.bf16.mxu0 %v8548_v43 }
 0x353   : > { %7974 = vmatpush3.bf16.msra.mxu1 %v8538_v35 }
 0x354   : > { %7975 = vmatprep.subr.bf16.mxu1 %v8539_v28 }
 0x355   : > { %7998 = vmatpush3.bf16.msra.mxu0 %v8548_v43 }
 0x356   : > { %7999 = vmatprep.subr.bf16.mxu0 %v8549_v45 }
 0x357   : > { %7976 = vmatpush3.bf16.msra.mxu1 %v8539_v28 }
 0x358   : > { %7977 = vmatprep.subr.bf16.mxu1 %v8540_v29 }
 0x359   : > { %8000 = vmatpush3.bf16.msra.mxu0 %v8549_v45 }
 0x35a   : > { %8001 = vmatprep.subr.bf16.mxu0 %v8550_v55 }
 0x35b   : > { %7978 = vmatpush3.bf16.msra.mxu1 %v8540_v29 }
 0x35c   : > { %7979 = vmatprep.subr.bf16.mxu1 %v8541_v17 }
 0x35d   : > { %8002 = vmatpush3.bf16.msra.mxu0 %v8550_v55 }
 0x35e   : > { %8003 = vmatprep.subr.bf16.mxu0 %v8551_v56 }
 0x35f   : > { %7980 = vmatpush3.bf16.msra.mxu1 %v8541_v17 }
 0x360   : > { %7981 = vmatprep.subr.bf16.mxu1 %v8542_v30 }
 0x361   : > { %8004 = vmatpush3.bf16.msra.mxu0 %v8551_v56 }
 0x362   : > { %8005 = vmatprep.subr.bf16.mxu0 %v8552_v57 }
 0x363   : > { %7982 = vmatpush3.bf16.msra.mxu1 %v8542_v30 }
 0x364   : > { %7983 = vmatprep.subr.bf16.mxu1 %v8543_v31 }
 0x365   : > { %8006 = vmatpush3.bf16.msra.mxu0 %v8552_v57 }
 0x367   : > { %7984 = vmatpush3.bf16.msra.mxu1 %v8543_v31 }
 0x368   : > { %7985 = vmatprep.subr.bf16.mxu1 %v8544_v32 }
 0x36b   : > { %7986 = vmatpush3.bf16.msra.mxu1 %v8544_v32 }
 0x36e   : > { %7988 = vmatmul.mubr.bf16.vlgmr.msra.gmra.mxu1 %v4415_v24 }
 0x3a8   : > { %v7849_v25 = vpop.f32.mrf.mxu0 }
 0x3aa   : > { %v3592_v47 = vpop.f32.mrf.mxu0 }
 0x3ac   : > { %v7850_v62 = vpop.f32.mrf.mxu0 }
 0x3ae   : > { %v7829_v48 = vpop.f32.mrf.mxu1  ;;  %v3595_v52 = vpop.f32.mrf.mxu0 }
 0x3af   : > { %v3601_v44 = vadd.f32 %v7849_v25, %v7829_v48 }
 0x3b0   : > { %v3493_v49 = vpop.f32.mrf.mxu1 }
 0x3b1   : > { %v3593_v50 = vadd.f32 %v3592_v47, %v3493_v49 }
 0x3b2   : > { %v7830_v51 = vpop.f32.mrf.mxu1 }
 0x3b4   : > { %v3496_v54 = vpop.f32.mrf.mxu1 }
 0x3b5   : > { %v3596_v42 = vadd.f32 %v3595_v52, %v3496_v54 }
 0x3c8   : > { %v7889_v61 = vpop.f32.mrf.mxu0 }
 0x3ca   : > { %v3843_v58 = vpop.f32.mrf.mxu0 }
 0x3cc   : > { %v7890_v59 = vpop.f32.mrf.mxu0 }
 0x3cd   : > { %v8555_v59 = vld [vmem:[%s10228_s5 + $0x2b8] sm:$0xff]  }
 0x3ce   : > { %v7869_v60 = vpop.f32.mrf.mxu1  ;;  %v3846_v7 = vpop.f32.mrf.mxu0  ;;  %8011 = vmatprep.subr.bf16.mxu1 %v8555_v59 }
 0x3cf   : > { %v3730_v0 = vadd.f32 %v7869_v60, %v3601_v44  ;;  %v8556_v60 = vld [vmem:[%s10228_s5 + $0x268] sm:$0xff]   ;;  %8012 = vmatpush3.bf16.msra.mxu1 %v8555_v59 }
 0x3d0   : > { %v3714_v1 = vpop.f32.mrf.mxu1 }
 0x3d1   : > { %v3728_v63 = vadd.f32 %v3714_v1, %v3593_v50  ;;  %v3859_v2 = vadd.f32 %v7889_v61, %v3730_v0  ;;  %v8553_v61 = vld [vmem:[%s10228_s5 + $0x278] sm:$0xff]   ;;  %v8557_v0 = vld [vmem:[%s10228_s5 + $0x2b0] sm:$0xff]   ;;  %v8558_v1 = vld [vmem:[%s10228_s5 + $0x260] sm:$0xff]  }
 0x3d2   : > { %v7870_v3 = vpop.f32.mrf.mxu1  ;;  %8031 = vmatprep.subr.bf16.mxu0 %v8553_v61  ;;  %8013 = vmatprep.subr.bf16.mxu1 %v8557_v0 }
 0x3d3   : > { %v3857_v4 = vadd.f32 %v3843_v58, %v3728_v63  ;;  %v8554_v58 = vld [vmem:[%s10228_s5 + $0x270] sm:$0xff]   ;;  %8014 = vmatpush3.bf16.msra.mxu1 %v8557_v0  ;;  %v8559_v63 = vld [vmem:[%s10228_s5 + $0x2a8] sm:$0xff]   ;;  %v8561_v3 = vld [vmem:[%s10228_s5 + $0x2a0] sm:$0xff]  }
 0x3d4   : > { %v3717_v40 = vpop.f32.mrf.mxu1  ;;  %8015 = vmatprep.subr.bf16.mxu1 %v8559_v63 }
 0x3d5   : > { %v3729_v5 = vadd.f32 %v3717_v40, %v3596_v42  ;;  %v8563_v40 = vld [vmem:[%s10228_s5 + $0x298] sm:$0xff]  }
 0x3d7   : > { %v3858_v46 = vadd.f32 %v3846_v7, %v3729_v5  ;;  %8016 = vmatpush3.bf16.msra.mxu1 %v8559_v63  ;;  %v8564_v5 = vld [vmem:[%s10228_s5 + $0x248] sm:$0xff]   ;;  %v8565_v7 = vld [vmem:[%s10228_s5 + $0x290] sm:$0xff]  }
 0x3d8   : > { %8017 = vmatprep.subr.bf16.mxu1 %v8561_v3  ;;  %v8572_v63 = vld [vmem:[%s10228_s5 + $0x330] sm:$0xff]  }
 0x3db   : > { %8018 = vmatpush3.bf16.msra.mxu1 %v8561_v3 }
 0x3dc   : > { %8019 = vmatprep.subr.bf16.mxu1 %v8563_v40 }
 0x3df   : > { %8020 = vmatpush3.bf16.msra.mxu1 %v8563_v40 }
 0x3e0   : > { %8021 = vmatprep.subr.bf16.mxu1 %v8565_v7 }
 0x3e3   : > { %8022 = vmatpush3.bf16.msra.mxu1 %v8565_v7 }
 0x3e8   : > { %v7929_v8 = vpop.f32.mrf.mxu0 }
 0x3ea   : > { %v4102_v9 = vpop.f32.mrf.mxu0 }
 0x3ec   : > { %v7930_v11 = vpop.f32.mrf.mxu0 }
 0x3ed   : > { %v8571_v11 = vld [vmem:[%s10228_s5 + $0x280] sm:$0xff]  }
 0x3ee   : > { %v7909_v12 = vpop.f32.mrf.mxu1  ;;  %v4105_v22 = vpop.f32.mrf.mxu0 }
 0x3ef   : > { %v3998_v13 = vadd.f32 %v7909_v12, %v3859_v2  ;;  %v8560_v2 = vld [vmem:[%s10228_s5 + $0x258] sm:$0xff]  }
 0x3f0   : > { %v3982_v10 = vpop.f32.mrf.mxu1  ;;  %v9938_v12 = vld [vmem:[%s10228_s5 + $0x2f8] sm:$0xff]  }
 0x3f1   : > { %v3996_v15 = vadd.f32 %v3982_v10, %v3857_v4  ;;  %v4118_v18 = vadd.f32 %v7929_v8, %v3998_v13  ;;  %v8562_v4 = vld [vmem:[%s10228_s5 + $0x250] sm:$0xff]   ;;  %v8568_v8 = vld [vmem:[%s10228_s5 + $0x288] sm:$0xff]  }
 0x3f2   : > { %v7910_v21 = vpop.f32.mrf.mxu1  ;;  %8023 = vmatprep.subr.bf16.mxu1 %v8568_v8 }
 0x3f3   : > { %v4116_v16 = vadd.f32 %v4102_v9, %v3996_v15  ;;  %v9929_v9 = vld [vmem:[%s10228_s5 + $0x338] sm:$0xff]   ;;  %8024 = vmatpush3.bf16.msra.mxu1 %v8568_v8 }
 0x3f4   : > { %v3985_v35 = vpop.f32.mrf.mxu1  ;;  %8025 = vmatprep.subr.bf16.mxu1 %v8571_v11 }
 0x3f5   : > { %v3997_v30 = vadd.f32 %v3985_v35, %v3858_v46  ;;  %v8566_v46 = vld [vmem:[%s10228_s5 + $0x240] sm:$0xff]  }
 0x3f7   : > { %v4117_v36 = vadd.f32 %v4105_v22, %v3997_v30  ;;  %8026 = vmatpush3.bf16.msra.mxu1 %v8571_v11 }
 0x3f8   : > { %8051 = vmatprep.subr.bf16.mxu1 %v9938_v12 }
 0x408   : > { %v7969_v23 = vpop.f32.mrf.mxu0 }
 0x40a   : > { %v4376_v24 = vpop.f32.mrf.mxu0 }
 0x40c   : > { %v7970_v26 = vpop.f32.mrf.mxu0 }
 0x40e   : > { %v7949_v28 = vpop.f32.mrf.mxu1  ;;  %v4379_v62 = vpop.f32.mrf.mxu0 }
 0x40f   : > { %v4253_v31 = vadd.f32 %v7949_v28, %v4118_v18 }
 0x410   : > { %v4237_v29 = vpop.f32.mrf.mxu1 }
 0x411   : > { %v4251_v33 = vadd.f32 %v4237_v29, %v4116_v16  ;;  %v4392_v45 = vadd.f32 %v7969_v23, %v4253_v31 }
 0x412   : > { %v7950_v17 = vpop.f32.mrf.mxu1 }
 0x413   : > { %v4390_v47 = vadd.f32 %v4376_v24, %v4251_v33 }
 0x414   : > { %v4240_v32 = vpop.f32.mrf.mxu1 }
 0x415   : > { %v4252_v43 = vadd.f32 %v4240_v32, %v4117_v36 }
 0x417   : > { %v4391_v50 = vadd.f32 %v4379_v62, %v4252_v43 }
 0x42e   : > { %v7989_v38 = vpop.f32.mrf.mxu1 }
 0x42f   : > { %v4517_v48 = vadd.f32 %v7989_v38, %v4392_v45 }
 0x430   : > { %v4501_v25 = vpop.f32.mrf.mxu1 }
 0x431   : > { %v4515_v49 = vadd.f32 %v4501_v25, %v4390_v47  ;;  %v4520_v52 = vmax.f32 %v4517_v48, 0.0 }
 0x432   : > { %v7990_v44 = vpop.f32.mrf.mxu1 }
 0x433   : > { %v4518_v54 = vmax.f32 %v4515_v49, 0.0  ;;  %v4522_v57 = vpack.c.bf16 %v4520_v52, %v4520_v52  ;;  %v4691_v44 = vld [vmem:[#allocation2 + $0xc] sm:$0xf] }
 0x434   : > { %v4504_v51 = vpop.f32.mrf.mxu1 }
 0x435   : > { %v4516_v55 = vadd.f32 %v4504_v51, %v4391_v50 }
 0x437   : > { %v4519_v42 = vmax.f32 %v4516_v55, 0.0 }
 0x439   : > { %v4521_v56 = vpack.c.bf16 %v4519_v42, %v4518_v54 }
 0x43b   : > { %8007 = vmatprep.mubr.bf16.mxu0 %v4521_v56 }
 0x43c   : > { %8008 = vmatmul.mubr.bf16.vlgmr.msra.gmra.mxu0 %v4522_v57 }
 0x43d   : > { %8032 = vmatpush3.bf16.msra.mxu0 %v8553_v61 }
 0x43e   : > { %8033 = vmatprep.subr.bf16.mxu0 %v8554_v58 }
 0x441   : > { %8034 = vmatpush3.bf16.msra.mxu0 %v8554_v58 }
 0x442   : > { %8035 = vmatprep.subr.bf16.mxu0 %v8556_v60 }
 0x445   : > { %8036 = vmatpush3.bf16.msra.mxu0 %v8556_v60 }
 0x446   : > { %8037 = vmatprep.subr.bf16.mxu0 %v8558_v1 }
 0x449   : > { %8038 = vmatpush3.bf16.msra.mxu0 %v8558_v1 }
 0x44a   : > { %8039 = vmatprep.subr.bf16.mxu0 %v8560_v2 }
 0x44d   : > { %8040 = vmatpush3.bf16.msra.mxu0 %v8560_v2 }
 0x44e   : > { %8041 = vmatprep.subr.bf16.mxu0 %v8562_v4 }
 0x451   : > { %8042 = vmatpush3.bf16.msra.mxu0 %v8562_v4 }
 0x452   : > { %8043 = vmatprep.subr.bf16.mxu0 %v8564_v5 }
 0x455   : > { %8044 = vmatpush3.bf16.msra.mxu0 %v8564_v5 }
 0x456   : > { %8045 = vmatprep.subr.bf16.mxu0 %v8566_v46 }
 0x459   : > { %8046 = vmatpush3.bf16.msra.mxu0 %v8566_v46 }
 0x45a   : > { %8071 = vmatprep.subr.bf16.mxu0 %v9929_v9 }
 0x4fc   : > { %v8009_v13 = vpop.f32.mrf.mxu0 }
 0x4fd   : > { %v4637_v10 = vmul.f32 %v8009_v13, %v9309_v37 }
 0x4fe   : > { %v4621_v15 = vpop.f32.mrf.mxu0 }
 0x4ff   : > { %v9943_v18 = vadd.f32 %v4637_v10, %v9613_v41  ;;  %v4635_v21 = vmul.f32 %v4621_v15, %v9303_v6 }
 0x500   : > { %v8010_v16 = vpop.f32.mrf.mxu0 }
 0x501   : > { %v4643_v22 = vmax.f32 %v9943_v18, 0.0  ;;  %v9948_v23 = vadd.f32 %v4635_v21, %v9617_v34 }
 0x502   : > { %v4624_v24 = vpop.f32.mrf.mxu0 }
 0x503   : > { %v7116_v35 = vpack.c.bf16 %v4643_v22, %v4643_v22  ;;  %v4641_v26 = vmax.f32 %v9948_v23, 0.0  ;;  %v4636_v28 = vmul.f32 %v4624_v24, %v9306_v27  ;;  %v8578_v22 = vld [vmem:[%s10228_s5 + $0x328] sm:$0xff]  }
 0x505   : > { %v4674_v29 = vshll.u32 %v7116_v35, 16  ;;  %v4678_v17 = vshrl.u32 %v7116_v35, 16  ;;  %v7114_v30 = vpack.c.bf16 %v4641_v26, %v4641_v26  ;;  %v9953_v41 = vadd.f32 %v4636_v28, %v9621_v53 }
 0x507   : > { %v4676_v31 = vrot.slane %v4674_v29, 5  ;;  %v4680_v32 = vrot.slane %v4678_v17, 4  ;;  %v4655_v33 = vshll.u32 %v7114_v30, 16  ;;  %v4658_v36 = vshrl.u32 %v7114_v30, 16  ;;  %v8580_v29 = vld [vmem:[%s10228_s5 + $0x320] sm:$0xff]   ;;  %v8581_v17 = vld [vmem:[%s10228_s5 + $0x2e8] sm:$0xff]  }
 0x508   : > { %v4642_v38 = vmax.f32 %v9953_v41, 0.0  ;;  %v8582_v30 = vld [vmem:[%s10228_s5 + $0x318] sm:$0xff]  }
 0x509   : > { %v4681_v34 = vor.u32 %v4680_v32, %v4676_v31  ;;  %v4657_v43 = vrot.slane %v4655_v33, 5  ;;  %v4660_v45 = vrot.slane %v4658_v36, 4  ;;  %v8585_v32 = vld [vmem:[%s10228_s5 + $0x2d8] sm:$0xff]   ;;  %v8586_v33 = vld [vmem:[%s10228_s5 + $0x308] sm:$0xff]   ;;  %v8587_v36 = vld [vmem:[%s10228_s5 + $0x2d0] sm:$0xff]  }
 0x50a   : > { %v7115_v25 = vpack.c.bf16 %v4642_v38, %v4642_v38 }
 0x50b   : > { %v4682_v47 = vrot.slane %v4681_v34, 4  ;;  %v4661_v62 = vor.u32 %v4660_v45, %v4657_v43  ;;  %v4687_v48 = vsel %vm9246_vm8, %v4657_v43, %v9636_v19  ;;  %v8588_v34 = vld [vmem:[%s10228_s5 + $0x300] sm:$0xff]   ;;  %v8589_v45 = vld [vmem:[%s10228_s5 + $0x2c8] sm:$0xff]  }
 0x50c   : > { %4688 = vst [vmem:[#allocation2] sm:$0x8] %v4687_v48  ;;  %v4664_v53 = vshll.u32 %v7115_v25, 16  ;;  %v4668_v49 = vshrl.u32 %v7115_v25, 16  ;;  %v8590_v25 = vld [vmem:[%s10228_s5 + $0x3b8] sm:$0xff]   ;;  %v8592_v48 = vld [vmem:[%s10228_s5 + $0x2c0] sm:$0xff]  }
 0x50d   : > { %v4692_v50 = vsel %vm9234_vm5, %v4682_v47, %v4691_v44  ;;  %v4662_v51 = vrot.slane %v4661_v62, 4 }
 0x50e   : > { %4693 = vst [vmem:[#allocation2 + $0xc] sm:$0xf] %v4692_v50  ;;  %v4666_v55 = vrot.slane %v4664_v53, 5  ;;  %v4670_v52 = vrot.slane %v4668_v49, 4  ;;  %v8593_v49 = vld [vmem:[%s10228_s5 + $0x3b0] sm:$0xff]  }
 0x510   : > { %v4667_v54 = vsel %vm9314_vm10, %v4662_v51, %v4666_v55  ;;  %v4671_v42 = vor.u32 %v4670_v52, %v4666_v55  ;;  %v8594_v52 = vld [vmem:[%s10228_s5 + $0x378] sm:$0xff]  }
 0x511   : > { %4689 = vst [vmem:[#allocation2 + $0x4] sm:$0xf] %v4667_v54 }
 0x512   : > { %v4672_v56 = vrot.slane %v4671_v42, 4 }
 0x513   : > { %v4694_v19 = vld [vmem:[#allocation2] sm:$0xf] }
 0x514   : > { %v4677_v20 = vsel %vm9314_vm10, %v4672_v56, %v4676_v31  ;;  %v5079_v61 = vld [vmem:[#allocation2] sm:$0x8] }
 0x515   : > { %4690 = vst [vmem:[#allocation2 + $0x8] sm:$0xf] %v4677_v20  ;;  %v5080_v0 = vld [vmem:[#allocation2 + $0xc] sm:$0x7]  ;;  %v4954_v5 = vld [vmem:[#allocation2] sm:$0xe] }
 0x516   : > { %v4714_v1 = vld [vmem:[#allocation2 + $0xc] sm:$0x1]  ;;  %v8583_v31 = vld [vmem:[%s10228_s5 + $0x2e0] sm:$0xff]  }
 0x517   : > { %v10027_v38 = vld [vmem:[#allocation2 + $0xc] sm:$0xf] }
 0x518   : > { %v9965_v57 = vld [vmem:[#allocation2 + $0x4] sm:$0xf]  ;;  %v8596_v20 = vld [vmem:[%s10228_s5 + $0x3a8] sm:$0xff]  }
 0x519   : > { %v6884_v14 = vcombine.low %v4694_v19, %v9965_v57  ;;  %v9969_v59 = vcombine.low %v5079_v61, %v9965_v57  ;;  %v6919_v11 = vcombine.low %v4954_v5, %v9965_v57  ;;  %v8598_v61 = vld [vmem:[%s10228_s5 + $0x3a0] sm:$0xff]  }
 0x51b   : > { %v4745_v58 = vshll.u32 %v6884_v14, 16  ;;  %8047 = vmatprep.mubr.bf16.mxu0 %v6884_v14  ;;  %v4743_v40 = vshrl.u32 %v6884_v14, 16  ;;  %v5104_v7 = vrot.slane %v9969_v59, 3  ;;  %v4975_v26 = vrot.slane %v6919_v11, 1  ;;  %v8606_v11 = vld [vmem:[%s10228_s5 + $0x380] sm:$0xff]  }
 0x51c   : > { %v9971_v60 = vld [vmem:[#allocation2 + $0x8] sm:$0xf]  ;;  %v5230_v44 = vshrl.u32 %v9969_v59, 16  ;;  %v5233_v53 = vshll.u32 %v9969_v59, 16  ;;  %v8600_v59 = vld [vmem:[%s10228_s5 + $0x398] sm:$0xff]  }
 0x51d   : > { %v6894_v39 = vcombine.low %v9971_v60, %v9971_v60  ;;  %v6945_v2 = vcombine.low %v9971_v60, %v5080_v0  ;;  %v9980_v3 = vcombine.low %v9971_v60, %v4714_v1  ;;  %v4747_v4 = vrot.slane %v4745_v58, 1  ;;  %v8599_v58 = vld [vmem:[%s10228_s5 + $0x368] sm:$0xff]   ;;  %v8602_v1 = vld [vmem:[%s10228_s5 + $0x390] sm:$0xff]  }
 0x51e   : > { %v6970_v43 = vcombine.low %v9971_v60, %v10027_v38  ;;  %v6995_v55 = vcombine.low %v9965_v57, %v9971_v60  ;;  %v5232_v54 = vrot.slane %v5230_v44, 3  ;;  %v5235_v42 = vrot.slane %v5233_v53, 4  ;;  %v8597_v57 = vld [vmem:[%s10228_s5 + $0x370] sm:$0xff]   ;;  %v8601_v60 = vld [vmem:[%s10228_s5 + $0x360] sm:$0xff]   ;;  %v10078_v0 = vld [vmem:[#allocation2 + $0x8] sm:$0xf] }
 0x51f   : > { %8048 = vmatmul.mubr.bf16.vlgmr.msra.gmra.mxu0 %v6894_v39  ;;  %v9983_v46 = vrot.slane %v6945_v2, 3  ;;  %v4750_v8 = vshll.u32 %v9980_v3, 16  ;;  %v4748_v13 = vor.u32 %v4747_v4, %v4743_v40  ;;  %v4754_v21 = vshrl.u32 %v9980_v3, 16  ;;  %v5467_v39 = vld [vmem:[#allocation2 + $0x4] sm:$0xc]  ;;  %v8604_v40 = vld [vmem:[%s10228_s5 + $0x388] sm:$0xff]  }
 0x520   : > { %8072 = vmatpush3.bf16.msra.mxu0 %v9929_v9  ;;  %v4976_v16 = vrot.slane %v9980_v3, 1  ;;  %v8579_v9 = vld [vmem:[%s10228_s5 + $0x2f0] sm:$0xff]   ;;  %v5238_v47 = vshrl.u32 %v6970_v43, 16  ;;  %v5241_v62 = vshll.u32 %v6970_v43, 16  ;;  %v5236_v19 = vor.u32 %v5235_v42, %v5232_v54  ;;  %v8603_v3 = vld [vmem:[%s10228_s5 + $0x358] sm:$0xff]   ;;  %v8624_v53 = vld [vmem:[%s10228_s5 + $0x408] sm:$0xff]  }
 0x521   : > { %8073 = vmatprep.subr.bf16.mxu0 %v8572_v63  ;;  %v5106_v10 = vsel %vm1266_vm1, %v5104_v7, %v9983_v46  ;;  %v4752_v15 = vrot.slane %v4750_v8, 1  ;;  %v5602_v2 = vld [vmem:[#allocation2 + $0x10] sm:$0x7]  ;;  %v7021_v4 = vcombine.low %v5467_v39, %v10078_v0  ;;  %v8623_v44 = vld [vmem:[%s10228_s5 + $0x3d8] sm:$0xff]  }
 0x522   : > { %8087 = vmatprep.mubr.bf16.mxu0 %v5106_v10  ;;  %v4977_v28 = vsel %vm2387_vm11, %v4975_v26, %v4976_v16  ;;  %v5240_v50 = vrot.slane %v5238_v47, 3  ;;  %v5243_v51 = vrot.slane %v5241_v62, 4  ;;  %v8605_v7 = vld [vmem:[%s10228_s5 + $0x350] sm:$0xff]   ;;  %v8620_v47 = vld [vmem:[%s10228_s5 + $0x418] sm:$0xff]   ;;  %v8621_v62 = vld [vmem:[%s10228_s5 + $0x3e0] sm:$0xff]  }
 0x523   : > { %v4753_v24 = vsel %vm498_vm0, %v4748_v13, %v4752_v15  ;;  %v4756_v35 = vor.u32 %v4754_v21, %v4752_v15  ;;  %v5627_v8 = vshll.u32 %v7021_v4, 16  ;;  %v8607_v15 = vld [vmem:[%s10228_s5 + $0x348] sm:$0xff]   ;;  %v8629_v42 = vld [vmem:[%s10228_s5 + $0x478] sm:$0xff]   ;;  %v8639_v39 = vld [vmem:[%s10229_s6 + $0x70] sm:$0xff]  }
 0x524   : > { %8074 = vmatpush3.bf16.msra.mxu0 %v8572_v63  ;;  %8027 = vmatprep.mubr.bf16.mxu1 %v4753_v24  ;;  %v10054_v56 = vor.u32 %v5243_v51, %v5240_v50  ;;  %v5469_v63 = vld [vmem:[#allocation2 + $0xc] sm:$0xf]  ;;  %v8626_v50 = vld [vmem:[%s10228_s5 + $0x400] sm:$0xff]  }
 0x525   : > { %8028 = vmatmul.mubr.bf16.vlgmr.msra.gmra.mxu1 %v4756_v35  ;;  %8075 = vmatprep.subr.bf16.mxu0 %v8578_v22  ;;  %v10090_v5 = vcombine.low %v5469_v63, %v5602_v2  ;;  %v8627_v51 = vld [vmem:[%s10228_s5 + $0x3c8] sm:$0xff]   ;;  %v8641_v2 = vld [vmem:[%s10229_s6 + $0x60] sm:$0xff]  }
 0x526   : > { %8052 = vmatpush3.bf16.msra.mxu1 %v9938_v12  ;;  %8067 = vmatprep.mubr.bf16.mxu1 %v4977_v28  ;;  %v8584_v12 = vld [vmem:[%s10228_s5 + $0x310] sm:$0xff]   ;;  %v5245_v14 = vsel %vm1655_vm2, %v5236_v19, %v10054_v56 }
 0x527   : > { %8053 = vmatprep.subr.bf16.mxu1 %v8579_v9  ;;  %v5632_v13 = vshrl.u32 %v10090_v5, 16  ;;  %v5635_v10 = vshll.u32 %v10090_v5, 16  ;;  %v5470_v28 = vld [vmem:[#allocation2 + $0x10] sm:$0x3] }
 0x528   : > { %8076 = vmatpush3.bf16.msra.mxu0 %v8578_v22  ;;  %v8609_v22 = vld [vmem:[%s10228_s5 + $0x438] sm:$0xff]   ;;  %v8631_v19 = vld [vmem:[%s10228_s5 + $0x470] sm:$0xff]  }
 0x529   : > { %8077 = vmatprep.subr.bf16.mxu0 %v8580_v29  ;;  %v5634_v24 = vrot.slane %v5632_v13, 2  ;;  %v5637_v35 = vrot.slane %v5635_v10, 3  ;;  %v8643_v10 = vld [vmem:[%s10229_s6 + $0x50] sm:$0xff]  }
 0x52a   : > { %8054 = vmatpush3.bf16.msra.mxu1 %v8579_v9  ;;  %v8612_v9 = vld [vmem:[%s10228_s5 + $0x340] sm:$0xff]  }
 0x52b   : > { %8055 = vmatprep.subr.bf16.mxu1 %v8581_v17 }
 0x52c   : > { %8078 = vmatpush3.bf16.msra.mxu0 %v8580_v29  ;;  %v6996_v29 = vcombine.low %v10027_v38, %v10027_v38 }
 0x52d   : > { %8079 = vmatprep.subr.bf16.mxu0 %v8582_v30 }
 0x52e   : > { %8056 = vmatpush3.bf16.msra.mxu1 %v8581_v17  ;;  %v5638_v17 = vor.u32 %v5637_v35, %v5634_v24  ;;  %v8645_v24 = vld [vmem:[%s10229_s6 + $0x40] sm:$0xff]  }
 0x52f   : > { %8057 = vmatprep.subr.bf16.mxu1 %v8583_v31 }
 0x530   : > { %8080 = vmatpush3.bf16.msra.mxu0 %v8582_v30  ;;  %v8613_v30 = vld [vmem:[%s10228_s5 + $0x430] sm:$0xff]  }
 0x531   : > { %8081 = vmatprep.subr.bf16.mxu0 %v8584_v12 }
 0x532   : > { %8058 = vmatpush3.bf16.msra.mxu1 %v8583_v31 }
 0x533   : > { %8059 = vmatprep.subr.bf16.mxu1 %v8585_v32 }
 0x534   : > { %8082 = vmatpush3.bf16.msra.mxu0 %v8584_v12  ;;  %v8614_v12 = vld [vmem:[%s10228_s5 + $0x3f8] sm:$0xff]  }
 0x535   : > { %8083 = vmatprep.subr.bf16.mxu0 %v8586_v33 }
 0x536   : > { %8060 = vmatpush3.bf16.msra.mxu1 %v8585_v32  ;;  %v7022_v32 = vcombine.low %v5469_v63, %v5470_v28  ;;  %v8640_v63 = vld [vmem:[%s10229_s6 + $0x68] sm:$0xff]  }
 0x537   : > { %8061 = vmatprep.subr.bf16.mxu1 %v8587_v36 }
 0x538   : > { %8084 = vmatpush3.bf16.msra.mxu0 %v8586_v33  ;;  %v5498_v33 = vrot.slane %v7021_v4, 2  ;;  %v5499_v38 = vrot.slane %v7022_v32, 2 }
 0x539   : > { %8085 = vmatprep.subr.bf16.mxu0 %v8588_v34 }
 0x53a   : > { %8062 = vmatpush3.bf16.msra.mxu1 %v8587_v36  ;;  %v8616_v36 = vld [vmem:[%s10228_s5 + $0x428] sm:$0xff]   ;;  %v5500_v43 = vsel %vm2911_vm13, %v5498_v33, %v5499_v38 }
 0x53b   : > { %8063 = vmatprep.subr.bf16.mxu1 %v8589_v45 }
 0x53c   : > { %8086 = vmatpush3.bf16.msra.mxu0 %v8588_v34  ;;  %v8617_v34 = vld [vmem:[%s10228_s5 + $0x3f0] sm:$0xff]  }
 0x53d   : > { %8111 = vmatprep.subr.bf16.mxu0 %v8590_v25 }
 0x53e   : > { %8064 = vmatpush3.bf16.msra.mxu1 %v8589_v45  ;;  %v8618_v45 = vld [vmem:[%s10228_s5 + $0x420] sm:$0xff]  }
 0x53f   : > { %8088 = vmatmul.mubr.bf16.vlgmr.msra.gmra.mxu0 %v9983_v46  ;;  %8065 = vmatprep.subr.bf16.mxu1 %v8592_v48  ;;  %v5624_v46 = vshrl.u32 %v7021_v4, 16 }
 0x540   : > { %8112 = vmatpush3.bf16.msra.mxu0 %v8590_v25  ;;  %8127 = vmatprep.mubr.bf16.mxu0 %v6995_v55  ;;  %v8619_v25 = vld [vmem:[%s10228_s5 + $0x3e8] sm:$0xff]   ;;  %v8628_v55 = vld [vmem:[%s10228_s5 + $0x3c0] sm:$0xff]  }
 0x541   : > { %8113 = vmatprep.subr.bf16.mxu0 %v8593_v49  ;;  %v5626_v21 = vrot.slane %v5624_v46, 2 }
 0x542   : > { %8066 = vmatpush3.bf16.msra.mxu1 %v8592_v48  ;;  %v8622_v48 = vld [vmem:[%s10228_s5 + $0x410] sm:$0xff]  }
 0x543   : > { %8091 = vmatprep.subr.bf16.mxu1 %v8594_v52 }
 0x544   : > { %8114 = vmatpush3.bf16.msra.mxu0 %v8593_v49  ;;  %v8625_v49 = vld [vmem:[%s10228_s5 + $0x3d0] sm:$0xff]  }
 0x545   : > { %8068 = vmatmul.mubr.bf16.vlgmr.msra.gmra.mxu1 %v4976_v16  ;;  %8115 = vmatprep.subr.bf16.mxu0 %v8596_v20  ;;  %v5629_v16 = vrot.slane %v5627_v8, 3 }
 0x546   : > { %8092 = vmatpush3.bf16.msra.mxu1 %v8594_v52  ;;  %8107 = vmatprep.mubr.bf16.mxu1 %v5245_v14  ;;  %v5741_v52 = vld [vmem:[#allocation2 + $0x4] sm:$0x8]  ;;  %v8632_v14 = vld [vmem:[%s10228_s5 + $0x468] sm:$0xff]  }
 0x547   : > { %8093 = vmatprep.subr.bf16.mxu1 %v8597_v57  ;;  %v5630_v26 = vor.u32 %v5629_v16, %v5626_v21  ;;  %v7072_v54 = vcombine.low %v5741_v52, %v10078_v0  ;;  %v8637_v0 = vld [vmem:[%s10228_s5 + $0x440] sm:$0xff]  }
 0x548   : > { %8116 = vmatpush3.bf16.msra.mxu0 %v8596_v20  ;;  %v5763_v20 = vrot.slane %v10090_v5, 3 }
 0x549   : > { %8117 = vmatprep.subr.bf16.mxu0 %v8598_v61  ;;  %v5639_v31 = vsel %vm3037_vm12, %v5630_v26, %v5638_v17 }
 0x54a   : > { %8094 = vmatpush3.bf16.msra.mxu1 %v8597_v57 }
 0x54b   : > { %8095 = vmatprep.subr.bf16.mxu1 %v8599_v58 }
 0x54c   : > { %8118 = vmatpush3.bf16.msra.mxu0 %v8598_v61  ;;  %v8633_v61 = vld [vmem:[%s10228_s5 + $0x460] sm:$0xff]  }
 0x54d   : > { %8119 = vmatprep.subr.bf16.mxu0 %v8600_v59 }
 0x54e   : > { %8096 = vmatpush3.bf16.msra.mxu1 %v8599_v58  ;;  %v8634_v58 = vld [vmem:[%s10228_s5 + $0x458] sm:$0xff]  }
 0x54f   : > { %8097 = vmatprep.subr.bf16.mxu1 %v8601_v60 }
 0x550   : > { %8120 = vmatpush3.bf16.msra.mxu0 %v8600_v59  ;;  %v8635_v59 = vld [vmem:[%s10228_s5 + $0x450] sm:$0xff]  }
 0x551   : > { %8121 = vmatprep.subr.bf16.mxu0 %v8602_v1 }
 0x552   : > { %8098 = vmatpush3.bf16.msra.mxu1 %v8601_v60  ;;  %v8636_v60 = vld [vmem:[%s10228_s5 + $0x448] sm:$0xff]  }
 0x553   : > { %8099 = vmatprep.subr.bf16.mxu1 %v8603_v3 }
 0x554   : > { %8122 = vmatpush3.bf16.msra.mxu0 %v8602_v1  ;;  %v8638_v1 = vld [vmem:[%s10229_s6 + $0x78] sm:$0xff]  }
 0x555   : > { %8123 = vmatprep.subr.bf16.mxu0 %v8604_v40 }
 0x556   : > { %8100 = vmatpush3.bf16.msra.mxu1 %v8603_v3  ;;  %v8642_v3 = vld [vmem:[%s10229_s6 + $0x58] sm:$0xff]  }
 0x557   : > { %8101 = vmatprep.subr.bf16.mxu1 %v8605_v7 }
 0x558   : > { %8124 = vmatpush3.bf16.msra.mxu0 %v8604_v40 }
 0x559   : > { %8125 = vmatprep.subr.bf16.mxu0 %v8606_v11 }
 0x55a   : > { %8102 = vmatpush3.bf16.msra.mxu1 %v8605_v7 }
 0x55b   : > { %8103 = vmatprep.subr.bf16.mxu1 %v8607_v15 }
 0x55c   : > { %8126 = vmatpush3.bf16.msra.mxu0 %v8606_v11 }
 0x55d   : > { %8151 = vmatprep.subr.bf16.mxu0 %v8609_v22 }
 0x55e   : > { %8104 = vmatpush3.bf16.msra.mxu1 %v8607_v15 }
 0x55f   : > { %8128 = vmatmul.mubr.bf16.vlgmr.msra.gmra.mxu0 %v6996_v29  ;;  %8105 = vmatprep.subr.bf16.mxu1 %v8612_v9 }
 0x560   : > { %8152 = vmatpush3.bf16.msra.mxu0 %v8609_v22  ;;  %8167 = vmatprep.mubr.bf16.mxu0 %v5639_v31  ;;  %v8644_v22 = vld [vmem:[%s10229_s6 + $0x48] sm:$0xff]  }
 0x561   : > { %8153 = vmatprep.subr.bf16.mxu0 %v8613_v30 }
 0x562   : > { %8106 = vmatpush3.bf16.msra.mxu1 %v8612_v9 }
 0x563   : > { %8131 = vmatprep.subr.bf16.mxu1 %v8614_v12 }
 0x564   : > { %8154 = vmatpush3.bf16.msra.mxu0 %v8613_v30 }
 0x565   : > { %8108 = vmatmul.mubr.bf16.vlgmr.msra.gmra.mxu1 %v10054_v56  ;;  %8155 = vmatprep.subr.bf16.mxu0 %v8616_v36  ;;  %v5762_v56 = vrot.slane %v7072_v54, 3 }
 0x566   : > { %8132 = vmatpush3.bf16.msra.mxu1 %v8614_v12  ;;  %8147 = vmatprep.mubr.bf16.mxu1 %v5500_v43 }
 0x567   : > { %8133 = vmatprep.subr.bf16.mxu1 %v8617_v34  ;;  %v5764_v57 = vsel %vm1266_vm1, %v5762_v56, %v5763_v20 }
 0x568   : > { %8156 = vmatpush3.bf16.msra.mxu0 %v8616_v36 }
 0x569   : > { %8157 = vmatprep.subr.bf16.mxu0 %v8618_v45 }
 0x56a   : > { %8134 = vmatpush3.bf16.msra.mxu1 %v8617_v34 }
 0x56b   : > { %8135 = vmatprep.subr.bf16.mxu1 %v8619_v25 }
 0x56c   : > { %8158 = vmatpush3.bf16.msra.mxu0 %v8618_v45 }
 0x56d   : > { %8159 = vmatprep.subr.bf16.mxu0 %v8620_v47 }
 0x56e   : > { %8136 = vmatpush3.bf16.msra.mxu1 %v8619_v25 }
 0x56f   : > { %8137 = vmatprep.subr.bf16.mxu1 %v8621_v62 }
 0x570   : > { %8160 = vmatpush3.bf16.msra.mxu0 %v8620_v47 }
 0x571   : > { %8161 = vmatprep.subr.bf16.mxu0 %v8622_v48 }
 0x572   : > { %8138 = vmatpush3.bf16.msra.mxu1 %v8621_v62 }
 0x573   : > { %8139 = vmatprep.subr.bf16.mxu1 %v8623_v44 }
 0x574   : > { %8162 = vmatpush3.bf16.msra.mxu0 %v8622_v48 }
 0x575   : > { %8163 = vmatprep.subr.bf16.mxu0 %v8624_v53 }
 0x576   : > { %8140 = vmatpush3.bf16.msra.mxu1 %v8623_v44 }
 0x577   : > { %8141 = vmatprep.subr.bf16.mxu1 %v8625_v49 }
 0x578   : > { %8164 = vmatpush3.bf16.msra.mxu0 %v8624_v53 }
 0x579   : > { %8165 = vmatprep.subr.bf16.mxu0 %v8626_v50 }
 0x57a   : > { %8142 = vmatpush3.bf16.msra.mxu1 %v8625_v49 }
 0x57b   : > { %8143 = vmatprep.subr.bf16.mxu1 %v8627_v51 }
 0x57c   : > { %8166 = vmatpush3.bf16.msra.mxu0 %v8626_v50 }
 0x57d   : > { %8191 = vmatprep.subr.bf16.mxu0 %v8638_v1 }
 0x57e   : > { %8144 = vmatpush3.bf16.msra.mxu1 %v8627_v51 }
 0x57f   : > { %8168 = vmatmul.mubr.bf16.vlgmr.msra.gmra.mxu0 %v5638_v17  ;;  %8145 = vmatprep.subr.bf16.mxu1 %v8628_v55 }
 0x580   : > { %8192 = vmatpush3.bf16.msra.mxu0 %v8638_v1 }
 0x581   : > { %8193 = vmatprep.subr.bf16.mxu0 %v8639_v39 }
 0x582   : > { %8146 = vmatpush3.bf16.msra.mxu1 %v8628_v55 }
 0x583   : > { %8171 = vmatprep.subr.bf16.mxu1 %v8629_v42 }
 0x584   : > { %8194 = vmatpush3.bf16.msra.mxu0 %v8639_v39 }
 0x585   : > { %8148 = vmatmul.mubr.bf16.vlgmr.msra.gmra.mxu1 %v5499_v38  ;;  %8195 = vmatprep.subr.bf16.mxu0 %v8640_v63 }
 0x586   : > { %8172 = vmatpush3.bf16.msra.mxu1 %v8629_v42  ;;  %8187 = vmatprep.mubr.bf16.mxu1 %v5764_v57 }
 0x587   : > { %8173 = vmatprep.subr.bf16.mxu1 %v8631_v19 }
 0x588   : > { %8196 = vmatpush3.bf16.msra.mxu0 %v8640_v63 }
 0x589   : > { %8197 = vmatprep.subr.bf16.mxu0 %v8641_v2 }
 0x58a   : > { %8174 = vmatpush3.bf16.msra.mxu1 %v8631_v19 }
 0x58b   : > { %8175 = vmatprep.subr.bf16.mxu1 %v8632_v14 }
 0x58c   : > { %8198 = vmatpush3.bf16.msra.mxu0 %v8641_v2 }
 0x58d   : > { %8199 = vmatprep.subr.bf16.mxu0 %v8642_v3 }
 0x58e   : > { %8176 = vmatpush3.bf16.msra.mxu1 %v8632_v14 }
 0x58f   : > { %8177 = vmatprep.subr.bf16.mxu1 %v8633_v61 }
 0x590   : > { %8200 = vmatpush3.bf16.msra.mxu0 %v8642_v3 }
 0x591   : > { %8201 = vmatprep.subr.bf16.mxu0 %v8643_v10 }
 0x592   : > { %8178 = vmatpush3.bf16.msra.mxu1 %v8633_v61 }
 0x593   : > { %8179 = vmatprep.subr.bf16.mxu1 %v8634_v58 }
 0x594   : > { %8202 = vmatpush3.bf16.msra.mxu0 %v8643_v10 }
 0x595   : > { %8203 = vmatprep.subr.bf16.mxu0 %v8644_v22 }
 0x596   : > { %8180 = vmatpush3.bf16.msra.mxu1 %v8634_v58 }
 0x597   : > { %8181 = vmatprep.subr.bf16.mxu1 %v8635_v59 }
 0x598   : > { %8204 = vmatpush3.bf16.msra.mxu0 %v8644_v22 }
 0x599   : > { %8205 = vmatprep.subr.bf16.mxu0 %v8645_v24 }
 0x59a   : > { %8182 = vmatpush3.bf16.msra.mxu1 %v8635_v59 }
 0x59b   : > { %8183 = vmatprep.subr.bf16.mxu1 %v8636_v60 }
 0x59c   : > { %8206 = vmatpush3.bf16.msra.mxu0 %v8645_v24 }
 0x59e   : > { %8184 = vmatpush3.bf16.msra.mxu1 %v8636_v60 }
 0x59f   : > { %8185 = vmatprep.subr.bf16.mxu1 %v8637_v0 }
 0x5a2   : > { %8186 = vmatpush3.bf16.msra.mxu1 %v8637_v0 }
 0x5a5   : > { %8188 = vmatmul.mubr.bf16.vlgmr.msra.gmra.mxu1 %v5763_v20 }
 0x5df   : > { %v8049_v4 = vpop.f32.mrf.mxu0 }
 0x5e1   : > { %v4940_v40 = vpop.f32.mrf.mxu0 }
 0x5e3   : > { %v8050_v5 = vpop.f32.mrf.mxu0 }
 0x5e5   : > { %v8029_v7 = vpop.f32.mrf.mxu1  ;;  %v4943_v15 = vpop.f32.mrf.mxu0 }
 0x5e6   : > { %v4949_v46 = vadd.f32 %v8049_v4, %v8029_v7 }
 0x5e7   : > { %v4841_v8 = vpop.f32.mrf.mxu1 }
 0x5e8   : > { %v4941_v11 = vadd.f32 %v4940_v40, %v4841_v8 }
 0x5e9   : > { %v8030_v13 = vpop.f32.mrf.mxu1 }
 0x5eb   : > { %v4844_v21 = vpop.f32.mrf.mxu1 }
 0x5ec   : > { %v4944_v16 = vadd.f32 %v4943_v15, %v4844_v21 }
 0x5ff   : > { %v8089_v35 = vpop.f32.mrf.mxu0 }
 0x601   : > { %v5191_v26 = vpop.f32.mrf.mxu0 }
 0x603   : > { %v8090_v9 = vpop.f32.mrf.mxu0 }
 0x605   : > { %v8069_v28 = vpop.f32.mrf.mxu1  ;;  %v5194_v38 = vpop.f32.mrf.mxu0 }
 0x606   : > { %v5078_v29 = vadd.f32 %v8069_v28, %v4949_v46 }
 0x607   : > { %v5062_v17 = vpop.f32.mrf.mxu1 }
 0x608   : > { %v5076_v30 = vadd.f32 %v5062_v17, %v4941_v11  ;;  %v5207_v31 = vadd.f32 %v8089_v35, %v5078_v29 }
 0x609   : > { %v8070_v12 = vpop.f32.mrf.mxu1 }
 0x60a   : > { %v5205_v32 = vadd.f32 %v5191_v26, %v5076_v30 }
 0x60b   : > { %v5065_v33 = vpop.f32.mrf.mxu1 }
 0x60c   : > { %v5077_v36 = vadd.f32 %v5065_v33, %v4944_v16 }
 0x60e   : > { %v5206_v34 = vadd.f32 %v5194_v38, %v5077_v36 }
 0x61f   : > { %v8129_v43 = vpop.f32.mrf.mxu0 }
 0x621   : > { %v5450_v45 = vpop.f32.mrf.mxu0 }
 0x623   : > { %v8130_v25 = vpop.f32.mrf.mxu0 }
 0x625   : > { %v8109_v47 = vpop.f32.mrf.mxu1  ;;  %v5453_v51 = vpop.f32.mrf.mxu0 }
 0x626   : > { %v5346_v62 = vadd.f32 %v8109_v47, %v5207_v31 }
 0x627   : > { %v5330_v48 = vpop.f32.mrf.mxu1 }
 0x628   : > { %v5344_v44 = vadd.f32 %v5330_v48, %v5205_v32  ;;  %v5466_v53 = vadd.f32 %v8129_v43, %v5346_v62 }
 0x629   : > { %v8110_v49 = vpop.f32.mrf.mxu1 }
 0x62a   : > { %v5464_v50 = vadd.f32 %v5450_v45, %v5344_v44 }
 0x62b   : > { %v5333_v54 = vpop.f32.mrf.mxu1 }
 0x62c   : > { %v5345_v57 = vadd.f32 %v5333_v54, %v5206_v34 }
 0x62e   : > { %v5465_v59 = vadd.f32 %v5453_v51, %v5345_v57 }
 0x63f   : > { %v8169_v55 = vpop.f32.mrf.mxu0 }
 0x641   : > { %v5724_v52 = vpop.f32.mrf.mxu0 }
 0x643   : > { %v8170_v42 = vpop.f32.mrf.mxu0 }
 0x645   : > { %v8149_v56 = vpop.f32.mrf.mxu1  ;;  %v5727_v2 = vpop.f32.mrf.mxu0 }
 0x646   : > { %v5601_v14 = vadd.f32 %v8149_v56, %v5466_v53 }
 0x647   : > { %v5585_v20 = vpop.f32.mrf.mxu1 }
 0x648   : > { %v5599_v58 = vadd.f32 %v5585_v20, %v5464_v50  ;;  %v5740_v1 = vadd.f32 %v8169_v55, %v5601_v14 }
 0x649   : > { %v8150_v19 = vpop.f32.mrf.mxu1 }
 0x64a   : > { %v5738_v63 = vadd.f32 %v5724_v52, %v5599_v58 }
 0x64b   : > { %v5588_v61 = vpop.f32.mrf.mxu1 }
 0x64c   : > { %v5600_v0 = vadd.f32 %v5588_v61, %v5465_v59 }
 0x64e   : > { %v5739_v5 = vadd.f32 %v5727_v2, %v5600_v0 }
 0x665   : > { %v8189_v60 = vpop.f32.mrf.mxu1 }
 0x666   : > { %v5865_v3 = vadd.f32 %v8189_v60, %v5740_v1 }
 0x667   : > { %v5849_v39 = vpop.f32.mrf.mxu1 }
 0x668   : > { %v5863_v40 = vadd.f32 %v5849_v39, %v5738_v63  ;;  %v5868_v8 = vmax.f32 %v5865_v3, 0.0 }
 0x669   : > { %v8190_v4 = vpop.f32.mrf.mxu1 }
 0x66a   : > { %v5866_v11 = vmax.f32 %v5863_v40, 0.0  ;;  %v5870_v15 = vpack.c.bf16 %v5868_v8, %v5868_v8 }
 0x66b   : > { %v5852_v7 = vpop.f32.mrf.mxu1 }
 0x66c   : > { %v5864_v46 = vadd.f32 %v5852_v7, %v5739_v5 }
 0x66e   : > { %v5867_v13 = vmax.f32 %v5864_v46, 0.0 }
 0x670   : > { %v5869_v10 = vpack.c.bf16 %v5867_v13, %v5866_v11 }
 0x672   : > { %8207 = vmatprep.mubr.bf16.mxu0 %v5869_v10 }
 0x673   : > { %8208 = vmatmul.mubr.bf16.vlgmr.msra.gmra.mxu0 %v5870_v15 }
 0x733   : > { %v8209_v21 = vpop.f32.mrf.mxu0 }
 0x734   : > { %v5986_v16 = vmul.f32 %v8209_v21, %v9309_v37 }
 0x735   : > { %v5970_v22 = vpop.f32.mrf.mxu0 }
 0x736   : > { %v5989_v24 = vadd.f32 %v5986_v16, %v9943_v18  ;;  %v5984_v35 = vmul.f32 %v5970_v22, %v9303_v6 }
 0x737   : > { %v8210_v26 = vpop.f32.mrf.mxu0 }
 0x738   : > { %v5992_v9 = vmax.f32 %v5989_v24, 0.0  ;;  %v5987_v28 = vadd.f32 %v5984_v35, %v9948_v23 }
 0x739   : > { %v5973_v29 = vpop.f32.mrf.mxu0 }
 0x73a   : > { %5995 = vst [vmem:[%s305_s14 + $0x10] sm:$0xff] %v5992_v9  ;;  %v5990_v17 = vmax.f32 %v5987_v28, 0.0  ;;  %v5985_v30 = vmul.f32 %v5973_v29, %v9306_v27 }
 0x73c   : > { %5993 = vst [vmem:[%s305_s14] sm:$0xff] %v5990_v17  ;;  %v5988_v37 = vadd.f32 %v5985_v30, %v9953_v41 }
 0x73e   : > { %v5991_v31 = vmax.f32 %v5988_v37, 0.0 }
 0x740   : > { %5994 = vst [vmem:[%s305_s14 + $0x8] sm:$0xff] %v5991_v31 }
 0x741 PF: > { %s18_s27 = sadd.s32 1, %s8652_s27  }
 0x742   : > { %p15_p4 = scmp.ge.s32.totalorder %s18_s27, 4  }
 0x744   :  { %17 = sbr.rel (!%p15_p4) target bundleno = 1 (0x1), region = 111 }

</bundles_post_ra>
